<compile_context>
chip_gen: v6e
topology: v6e:2x2x1
jax: 0.10.0
libtpu: 0.0.40
codegen_flags: <defaults>
</compile_context>

<pallas_src>
import functools
import math

import jax
import jax.numpy as jnp
from jax import lax
from jax.experimental import pallas as pl
from jax.experimental.pallas import tpu as pltpu


def _round_up(x, m):
    return ((x + m - 1) // m) * m


def _vmem_limit(nbytes):
    # Actual block footprint + headroom for compiler-internal scratch,
    # clamped to v7x's 64 MiB physical VMEM per TensorCore.
    return int(min(max(nbytes + (8 << 20), 32 << 20), 64 << 20))


def _sigmoid(x):
    # Explicit EUP-friendly sigmoid (exp + reciprocal); avoids relying on a
    # `logistic` lowering.
    return 1.0 / (1.0 + jnp.exp(-x))


# ---------------------------------------------------------------------------
# Capability probe: single-buffered resident blocks via pl.Buffered(1).
# ---------------------------------------------------------------------------
@functools.lru_cache(maxsize=None)
def _buffered_supported():
    if not hasattr(pl, "Buffered"):
        return False
    try:
        def _probe_kernel(x_ref, w_ref, o_ref):
            o_ref[...] = x_ref[...] + w_ref[...]

        x = jnp.zeros((16, 128), jnp.float32)
        w = jnp.zeros((8, 128), jnp.float32)
        out = pl.pallas_call(
            _probe_kernel,
            out_shape=jax.ShapeDtypeStruct((16, 128), jnp.float32),
            grid=(2,),
            in_specs=[
                pl.BlockSpec((8, 128), lambda i: (i, 0)),
                pl.BlockSpec((8, 128), lambda i: (0, 0),
                             pipeline_mode=pl.Buffered(1)),
            ],
            out_specs=pl.BlockSpec((8, 128), lambda i: (i, 0)),
        )(x, w)
        jax.block_until_ready(out)
        return True
    except Exception:
        return False


def _resident_spec(block_shape, index_map):
    """BlockSpec for a grid-invariant operand; single-buffered if supported."""
    if _buffered_supported():
        return pl.BlockSpec(block_shape, index_map, pipeline_mode=pl.Buffered(1))
    return pl.BlockSpec(block_shape, index_map)


# ---------------------------------------------------------------------------
# Kernel 1: fused LSTM layer (chunked input projection + recurrence).
# ---------------------------------------------------------------------------
def _lstm_layer_kernel(x_ref, w_ih_ref, w_hh_ref, b_ref, out_ref,
                       g_scr, h_scr, c_scr):
    # x_ref:    (Tc, Bb, Dp)  bf16   input chunk
    # w_ih_ref: (Dp, 4Hp)     bf16   resident
    # w_hh_ref: (Hp, 4Hp)     bf16   resident
    # b_ref:    (1, 4Hp)      f32    resident (b_ih + b_hh, per-gate padded)
    # out_ref:  (Tc, Bb, Hp)  bf16   hidden sequence for this chunk
    # g_scr:    (Tc*Bb, 4Hp)  f32    chunk gate pre-activations (VMEM only)
    # h_scr:    (Bb, Hp)      bf16   h state carried across time chunks
    # c_scr:    (Bb, Hp)      f32    c state carried across time chunks
    @pl.when(pl.program_id(1) == 0)   # first time-chunk of this batch block
    def _():
        h_scr[...] = jnp.zeros_like(h_scr)   # h0 = c0 = 0 (as in PyTorch module)
        c_scr[...] = jnp.zeros_like(c_scr)

    t_chunk, b_block, dp = x_ref.shape
    hp = h_scr.shape[-1]

    # Hoisted input projection for the whole chunk: one big MXU matmul.
    # Result stays in VMEM (g_scr) -> no HBM round-trip of the f32 gates.
    x2d = x_ref[...].reshape(t_chunk * b_block, dp)
    g_scr[...] = (
        jnp.dot(x2d, w_ih_ref[...], preferred_element_type=jnp.float32)
        + b_ref[...]
    )

    w_hh = w_hh_ref[...]  # read once per chunk

    def step(t, carry):
        h_prev, c_prev = carry          # h_prev bf16, c_prev f32
        r0 = pl.multiple_of(t * b_block, 8)
        gates = g_scr[pl.ds(r0, b_block), :] + jnp.dot(
            h_prev, w_hh, preferred_element_type=jnp.float32
        )
        # PyTorch gate order i, f, g, o; slices are 128-lane aligned (Hp%128==0).
        i_g = _sigmoid(gates[:, 0 * hp:1 * hp])
        f_g = _sigmoid(gates[:, 1 * hp:2 * hp])
        g_g = jnp.tanh(gates[:, 2 * hp:3 * hp])
        o_g = _sigmoid(gates[:, 3 * hp:4 * hp])
        c_new = f_g * c_prev + i_g * g_g
        h_new = (o_g * jnp.tanh(c_new)).astype(jnp.bfloat16)
        out_ref[t] = h_new
        return h_new, c_new

    h_last, c_last = lax.fori_loop(
        0, t_chunk, step, (h_scr[...], c_scr[...]), unroll=True
    )
    h_scr[...] = h_last
    c_scr[...] = c_last


def lstm_layer_pallas(x_tbd, w_ih_t, w_hh_t, bias, *, t_chunk):
    """x_tbd: (Tp, Bp, Dp) bf16 -> (Tp, Bp, Hp) bf16."""
    Tp, Bp, Dp = x_tbd.shape
    Hp, G4 = w_hh_t.shape
    assert Tp % t_chunk == 0, (Tp, t_chunk)

    # Optional batch-block parallel axis (feeds v7x's 2nd TensorCore; on
    # v5e/v6e it just becomes an outer serial loop).
    n_bb = 2 if (Bp % 32 == 0) else 1
    b_block = Bp // n_bb

    blk_bytes = (
        2 * t_chunk * b_block * Dp * 2        # x chunk, 2 buffers, bf16
        + Dp * G4 * 2                         # W_ih resident, bf16
        + Hp * G4 * 2                         # W_hh resident, bf16
        + G4 * 4                              # bias, f32
        + 2 * t_chunk * b_block * Hp * 2      # out chunk, 2 buffers, bf16
        + t_chunk * b_block * G4 * 4          # gate scratch, f32
        + b_block * Hp * (2 + 4)              # h (bf16) + c (f32) state
    )
    if not _buffered_supported():             # resident blocks double-buffered
        blk_bytes += Dp * G4 * 2 + Hp * G4 * 2 + G4 * 4

    return pl.pallas_call(
        _lstm_layer_kernel,
        out_shape=jax.ShapeDtypeStruct((Tp, Bp, Hp), jnp.bfloat16),
        grid_spec=pltpu.PrefetchScalarGridSpec(
            num_scalar_prefetch=0,
            grid=(n_bb, Tp // t_chunk),
            in_specs=[
                pl.BlockSpec((t_chunk, b_block, Dp), lambda b, t: (t, b, 0)),
                _resident_spec((Dp, G4), lambda b, t: (0, 0)),
                _resident_spec((Hp, G4), lambda b, t: (0, 0)),
                _resident_spec((1, G4), lambda b, t: (0, 0)),
            ],
            out_specs=pl.BlockSpec((t_chunk, b_block, Hp), lambda b, t: (t, b, 0)),
            scratch_shapes=[
                pltpu.VMEM((t_chunk * b_block, G4), jnp.float32),  # gates
                pltpu.VMEM((b_block, Hp), jnp.bfloat16),           # h state
                pltpu.VMEM((b_block, Hp), jnp.float32),            # c state
            ],
        ),
        compiler_params=pltpu.CompilerParams(
            dimension_semantics=("parallel", "arbitrary"),
            vmem_limit_bytes=_vmem_limit(blk_bytes),
        ),
    )(x_tbd, w_ih_t, w_hh_t, bias)


# ---------------------------------------------------------------------------
# Kernel 2: row-tiled matmul + bias (final Linear head).
# ---------------------------------------------------------------------------
def _matmul_bias_kernel(x_ref, w_ref, b_ref, o_ref):
    o_ref[...] = (
        jnp.dot(x_ref[...], w_ref[...], preferred_element_type=jnp.float32)
        + b_ref[...]
    ).astype(o_ref.dtype)


def matmul_bias_pallas(x2d, w_t, bias, *, row_block):
    """x2d: (N, D) bf16, w_t: (D, M) bf16, bias: (1, M) f32 -> (N, M) f32."""
    N, D = x2d.shape
    M = w_t.shape[1]
    assert N % row_block == 0, (N, row_block)

    blk_bytes = (
        2 * row_block * D * 2        # input rows, 2 buffers, bf16
        + D * M * 2                  # resident weight, bf16
        + M * 4                      # resident bias, f32
        + 2 * row_block * M * 4      # output rows, 2 buffers, f32
    )
    if not _buffered_supported():
        blk_bytes += D * M * 2 + M * 4

    return pl.pallas_call(
        _matmul_bias_kernel,
        out_shape=jax.ShapeDtypeStruct((N, M), jnp.float32),
        grid_spec=pltpu.PrefetchScalarGridSpec(
            num_scalar_prefetch=0,
            grid=(N // row_block,),
            in_specs=[
                pl.BlockSpec((row_block, D), lambda r: (r, 0)),
                _resident_spec((D, M), lambda r: (0, 0)),   # resident weight
                _resident_spec((1, M), lambda r: (0, 0)),   # resident bias
            ],
            out_specs=pl.BlockSpec((row_block, M), lambda r: (r, 0)),
        ),
        compiler_params=pltpu.CompilerParams(
            dimension_semantics=("parallel",),
            vmem_limit_bytes=_vmem_limit(blk_bytes),
        ),
    )(x2d, w_t, bias)


# ---------------------------------------------------------------------------
# Parameter setup: PyTorch-style init, then padded / transposed / bf16 layout.
# Unpadded f32 copies are kept under "ref" for the correctness check.
# ---------------------------------------------------------------------------
def init_params(key, input_size, hidden_size, num_layers, output_size):
    H = hidden_size
    Hp = _round_up(H, 128)
    O = output_size
    Op = _round_up(O, 128)
    Dp0 = _round_up(input_size, 128)   # layer-0 feature dim padded to 128 lanes

    params = {"layers": []}
    k = 1.0 / math.sqrt(H)
    for layer in range(num_layers):
        in_l = input_size if layer == 0 else H
        in_lp = Dp0 if layer == 0 else Hp
        key, k1, k2, k3, k4 = jax.random.split(key, 5)
        w_ih = jax.random.uniform(k1, (4 * H, in_l), jnp.float32, -k, k)
        w_hh = jax.random.uniform(k2, (4 * H, H), jnp.float32, -k, k)
        b_ih = jax.random.uniform(k3, (4 * H,), jnp.float32, -k, k)
        b_hh = jax.random.uniform(k4, (4 * H,), jnp.float32, -k, k)

        # Per-gate zero padding to Hp lanes (and in_lp input columns).
        w_ih_p = jnp.zeros((4 * Hp, in_lp), jnp.float32)
        w_hh_p = jnp.zeros((4 * Hp, Hp), jnp.float32)
        b_p = jnp.zeros((4 * Hp,), jnp.float32)
        for g in range(4):
            w_ih_p = w_ih_p.at[g * Hp:g * Hp + H, :in_l].set(w_ih[g * H:(g + 1) * H, :])
            w_hh_p = w_hh_p.at[g * Hp:g * Hp + H, :H].set(w_hh[g * H:(g + 1) * H, :])
            b_p = b_p.at[g * Hp:g * Hp + H].set(
                b_ih[g * H:(g + 1) * H] + b_hh[g * H:(g + 1) * H]
            )

        params["layers"].append(
            dict(
                w_ih_t=w_ih_p.T.astype(jnp.bfloat16),   # (in_lp, 4Hp) bf16
                w_hh_t=w_hh_p.T.astype(jnp.bfloat16),   # (Hp,   4Hp) bf16
                bias=b_p[None, :],                      # (1,    4Hp) f32 (combined)
                ref=dict(w_ih=w_ih, w_hh=w_hh, b=b_ih + b_hh),
            )
        )

    key, k5, k6 = jax.random.split(key, 3)
    kl = 1.0 / math.sqrt(H)
    w_lin = jax.random.uniform(k5, (O, H), jnp.float32, -kl, kl)
    b_lin = jax.random.uniform(k6, (O,), jnp.float32, -kl, kl)
    w_lin_p = jnp.zeros((Op, Hp), jnp.float32).at[:O, :H].set(w_lin)
    b_lin_p = jnp.zeros((Op,), jnp.float32).at[:O].set(b_lin)
    params["linear"] = dict(
        w_t=w_lin_p.T.astype(jnp.bfloat16),  # (Hp, Op) bf16
        bias=b_lin_p[None, :],               # (1, Op) f32
        ref=dict(w=w_lin, b=b_lin),
    )
    return params


# ---------------------------------------------------------------------------
# Full model: batch_first (B, T, input_size) -> (B, T, output_size)
# ---------------------------------------------------------------------------
@jax.jit
def lstm_model_pallas(params, x_btd):
    B, T, D = x_btd.shape
    Bp = _round_up(B, 16)                       # bf16 vreg sublane packing
    t_chunk = min(16, _round_up(T, 8))          # timesteps per sequential step
    Tp = _round_up(T, t_chunk)
    Dp = params["layers"][0]["w_ih_t"].shape[0]
    Hp = params["layers"][0]["w_hh_t"].shape[0]
    O = params["linear"]["ref"]["w"].shape[0]

    # time-major, padded: (Tp, Bp, Dp), bf16 MXU operand
    x = jnp.transpose(x_btd, (1, 0, 2)).astype(jnp.float32)
    x = jnp.pad(x, ((0, Tp - T), (0, Bp - B), (0, Dp - D)))
    h = x.astype(jnp.bfloat16)

    # Fused LSTM layers (input projection + recurrence in one kernel each).
    for lp in params["layers"]:
        h = lstm_layer_pallas(h, lp["w_ih_t"], lp["w_hh_t"], lp["bias"],
                              t_chunk=t_chunk)

    # Final Linear head: row-tiled parallel matmul, weight resident.
    h2d = h.reshape(Tp * Bp, Hp)
    N = Tp * Bp
    row_block = min(512, N)
    Np = _round_up(N, row_block)
    if Np != N:
        h2d = jnp.pad(h2d, ((0, Np - N), (0, 0)))
    y2d = matmul_bias_pallas(h2d, params["linear"]["w_t"],
                             params["linear"]["bias"], row_block=row_block)
    Op = y2d.shape[1]
    y = y2d[:N].reshape(Tp, Bp, Op)[:T, :B, :O]
    return jnp.transpose(y, (1, 0, 2))          # (B, T, output_size)


# ---------------------------------------------------------------------------
# Pure-JAX f32 reference (unpadded weights) for a correctness check.
# ---------------------------------------------------------------------------
def lstm_model_ref(params, x_btd):
    h_seq = jnp.transpose(x_btd, (1, 0, 2)).astype(jnp.float32)  # (T, B, D)
    B = x_btd.shape[0]
    for lp in params["layers"]:
        w_ih = lp["ref"]["w_ih"]
        w_hh = lp["ref"]["w_hh"]
        b = lp["ref"]["b"]
        H = w_hh.shape[1]

        def step(carry, x_t, w_ih=w_ih, w_hh=w_hh, b=b, H=H):
            h_prev, c_prev = carry
            gates = x_t @ w_ih.T + h_prev @ w_hh.T + b
            i = jax.nn.sigmoid(gates[:, 0 * H:1 * H])
            f = jax.nn.sigmoid(gates[:, 1 * H:2 * H])
            g = jnp.tanh(gates[:, 2 * H:3 * H])
            o = jax.nn.sigmoid(gates[:, 3 * H:4 * H])
            c = f * c_prev + i * g
            h = o * jnp.tanh(c)
            return (h, c), h

        init = (jnp.zeros((B, H), jnp.float32), jnp.zeros((B, H), jnp.float32))
        _, h_seq = lax.scan(step, init, h_seq)
    out = h_seq @ params["linear"]["ref"]["w"].T + params["linear"]["ref"]["b"]
    return jnp.transpose(out, (1, 0, 2))


if __name__ == "__main__":
    B, T = 2, 8
    input_size, hidden_size, num_layers, output_size = 16, 32, 2, 8

    key = jax.random.PRNGKey(0)
    kp, kx = jax.random.split(key)
    params = init_params(kp, input_size, hidden_size, num_layers, output_size)
    x = jax.random.normal(kx, (B, T, input_size), jnp.float32)

    _buffered_supported()  # warm the single-buffering capability probe

    out = lstm_model_pallas(params, x)
    jax.block_until_ready(out)

    ref = lstm_model_ref(params, x)
    assert out.shape == (B, T, output_size), out.shape
    max_err = float(jnp.max(jnp.abs(out - ref)))
    # bf16 MXU operands / bf16 inter-layer activations with f32 cell math ->
    # small rounding vs the f32 reference at these sizes.
    assert max_err < 5e-2, max_err
    print("KERNEL_OK")
</pallas_src>

<mosaic_0001>
module attributes {stable_mosaic.version = 11 : i64} {
  func.func @_probe_kernel(%arg0: i32, %arg1: memref<8x128xf32, #tpu.memory_space<vmem>>, %arg2: memref<8x128xf32, #tpu.memory_space<vmem>>, %arg3: memref<8x128xf32, #tpu.memory_space<vmem>>) attributes {dimension_semantics = [#tpu.dimension_semantics<arbitrary>], iteration_bounds = array<i64: 2>, scalar_prefetch = 0 : i64, scratch_operands = 0 : i64, tpu.core_type = #tpu.core_type<tc>, window_params = [{transform_indices = @transform_0, window_bounds = array<i64: 8, 128>}, {pipeline_mode = #tpu.pipeline_mode<synchronous>, transform_indices = @transform_1, window_bounds = array<i64: 8, 128>}, {transform_indices = @transform_2, window_bounds = array<i64: 8, 128>}]} {
    %c0 = arith.constant 0 : index
    %c0_0 = arith.constant 0 : index
    %0 = vector.load %arg1[%c0, %c0_0] : memref<8x128xf32, #tpu.memory_space<vmem>>, vector<8x128xf32>
    %c0_1 = arith.constant 0 : index
    %c0_2 = arith.constant 0 : index
    %1 = vector.load %arg2[%c0_1, %c0_2] : memref<8x128xf32, #tpu.memory_space<vmem>>, vector<8x128xf32>
    %2 = arith.addf %0, %1 : vector<8x128xf32>
    %c0_3 = arith.constant 0 : index
    %c0_4 = arith.constant 0 : index
    %3 = vector.load %arg3[%c0_3, %c0_4] : memref<8x128xf32, #tpu.memory_space<vmem>>, vector<8x128xf32>
    tpu.vector_store %arg3[%c0_3, %c0_4], %2 {strides = array<i32>} : memref<8x128xf32, #tpu.memory_space<vmem>>, vector<8x128xf32>,
    return
  }
  func.func @transform_0(%arg0: i32) -> (i32, i32) {
    %c0_i32 = arith.constant 0 : i32
    %c0_i32_0 = arith.constant 0 : i32
    return %arg0, %c0_i32 : i32, i32
  }
  func.func @transform_1(%arg0: i32) -> (i32, i32) {
    %c0_i32 = arith.constant 0 : i32
    %c0_i32_0 = arith.constant 0 : i32
    %c0_i32_1 = arith.constant 0 : i32
    return %c0_i32, %c0_i32_0 : i32, i32
  }
  func.func @transform_2(%arg0: i32) -> (i32, i32) {
    %c0_i32 = arith.constant 0 : i32
    %c0_i32_0 = arith.constant 0 : i32
    return %arg0, %c0_i32 : i32, i32
  }
}

module attributes {stable_mosaic.version = 11 : i64} {
  func.func @_lstm_layer_kernel(%arg0: i32, %arg1: i32, %arg2: memref<8x16x128xbf16, #tpu.memory_space<vmem>>, %arg3: memref<128x512xbf16, #tpu.memory_space<vmem>>, %arg4: memref<128x512xbf16, #tpu.memory_space<vmem>>, %arg5: memref<1x512xf32, #tpu.memory_space<vmem>>, %arg6: memref<8x16x128xbf16, #tpu.memory_space<vmem>>, %arg7: memref<128x512xf32, #tpu.memory_space<vmem>>, %arg8: memref<16x128xbf16, #tpu.memory_space<vmem>>, %arg9: memref<16x128xf32, #tpu.memory_space<vmem>>) attributes {dimension_semantics = [#tpu.dimension_semantics<parallel>, #tpu.dimension_semantics<arbitrary>], iteration_bounds = array<i64: 1, 1>, scalar_prefetch = 0 : i64, scratch_operands = 3 : i64, tpu.core_type = #tpu.core_type<tc>, window_params = [{transform_indices = @transform_0, window_bounds = array<i64: 8, 16, 128>}, {pipeline_mode = #tpu.pipeline_mode<synchronous>, transform_indices = @transform_1, window_bounds = array<i64: 128, 512>}, {pipeline_mode = #tpu.pipeline_mode<synchronous>, transform_indices = @transform_2, window_bounds = array<i64: 128, 512>}, {pipeline_mode = #tpu.pipeline_mode<synchronous>, transform_indices = @transform_3, window_bounds = array<i64: 1, 512>}, {transform_indices = @transform_4, window_bounds = array<i64: 8, 16, 128>}]} {
    %c0_i32 = arith.constant 0 : i32
    %0 = arith.cmpi eq, %arg1, %c0_i32 : i32
    %1 = arith.extui %0 : i1 to i32
    %c0_i32_0 = arith.constant 0 : i32
    %2 = arith.cmpi ne, %1, %c0_i32_0 : i32
    scf.if %2 {
      %cst_131 = arith.constant 0.000000e+00 : bf16
      %352 = vector.broadcast %cst_131 : bf16 to vector<16x128xbf16>
      %c0_132 = arith.constant 0 : index
      %c0_133 = arith.constant 0 : index
      %353 = vector.load %arg8[%c0_132, %c0_133] : memref<16x128xbf16, #tpu.memory_space<vmem>>, vector<16x128xbf16>
      tpu.vector_store %arg8[%c0_132, %c0_133], %352 {strides = array<i32>} : memref<16x128xbf16, #tpu.memory_space<vmem>>, vector<16x128xbf16>,
      %cst_134 = arith.constant 0.000000e+00 : f32
      %354 = vector.broadcast %cst_134 : f32 to vector<16x128xf32>
      %c0_135 = arith.constant 0 : index
      %c0_136 = arith.constant 0 : index
      %355 = vector.load %arg9[%c0_135, %c0_136] : memref<16x128xf32, #tpu.memory_space<vmem>>, vector<16x128xf32>
      tpu.vector_store %arg9[%c0_135, %c0_136], %354 {strides = array<i32>} : memref<16x128xf32, #tpu.memory_space<vmem>>, vector<16x128xf32>,
    } else {
    }
    %c0 = arith.constant 0 : index
    %c0_1 = arith.constant 0 : index
    %c0_2 = arith.constant 0 : index
    %3 = vector.load %arg2[%c0, %c0_1, %c0_2] : memref<8x16x128xbf16, #tpu.memory_space<vmem>>, vector<8x16x128xbf16>
    %4 = vector.shape_cast %3 : vector<8x16x128xbf16> to vector<128x128xbf16>
    %c0_3 = arith.constant 0 : index
    %c0_4 = arith.constant 0 : index
    %5 = vector.load %arg3[%c0_3, %c0_4] : memref<128x512xbf16, #tpu.memory_space<vmem>>, vector<128x512xbf16>
    %cst = arith.constant dense<0.000000e+00> : vector<128x512xf32>
    %6 = tpu.matmul %4, %5, %cst {dimension_numbers = #tpu.dot_dimension_numbers<[1], [0], [0], [1], [0, 0, 1, 1], [], []>} : vector<128x128xbf16>, vector<128x512xbf16>, vector<128x512xf32> -> vector<128x512xf32>
    %c0_5 = arith.constant 0 : index
    %c0_6 = arith.constant 0 : index
    %7 = vector.load %arg5[%c0_5, %c0_6] : memref<1x512xf32, #tpu.memory_space<vmem>>, vector<1x512xf32>
    %8 = vector.broadcast %7 : vector<1x512xf32> to vector<128x512xf32>
    %9 = arith.addf %6, %8 : vector<128x512xf32>
    %c0_7 = arith.constant 0 : index
    %c0_8 = arith.constant 0 : index
    %10 = vector.load %arg7[%c0_7, %c0_8] : memref<128x512xf32, #tpu.memory_space<vmem>>, vector<128x512xf32>
    tpu.vector_store %arg7[%c0_7, %c0_8], %9 {strides = array<i32>} : memref<128x512xf32, #tpu.memory_space<vmem>>, vector<128x512xf32>,
    %c0_9 = arith.constant 0 : index
    %c0_10 = arith.constant 0 : index
    %11 = vector.load %arg4[%c0_9, %c0_10] : memref<128x512xbf16, #tpu.memory_space<vmem>>, vector<128x512xbf16>
    %c0_11 = arith.constant 0 : index
    %c0_12 = arith.constant 0 : index
    %12 = vector.load %arg8[%c0_11, %c0_12] : memref<16x128xbf16, #tpu.memory_space<vmem>>, vector<16x128xbf16>
    %c0_13 = arith.constant 0 : index
    %c0_14 = arith.constant 0 : index
    %13 = vector.load %arg9[%c0_13, %c0_14] : memref<16x128xf32, #tpu.memory_space<vmem>>, vector<16x128xf32>
    %c0_i32_15 = arith.constant 0 : i32
    %c16_i32 = arith.constant 16 : i32
    %14 = arith.muli %c0_i32_15, %c16_i32 : i32
    %15 = tpu.assume_multiple %14, 8 : i32
    %16 = arith.index_cast %15 : i32 to index
    %c0_16 = arith.constant 0 : index
    %17 = vector.load %arg7[%16, %c0_16] : memref<128x512xf32, #tpu.memory_space<vmem>>, vector<16x512xf32>
    %cst_17 = arith.constant dense<0.000000e+00> : vector<16x512xf32>
    %18 = tpu.matmul %12, %11, %cst_17 {dimension_numbers = #tpu.dot_dimension_numbers<[1], [0], [0], [1], [0, 0, 1, 1], [], []>} : vector<16x128xbf16>, vector<128x512xbf16>, vector<16x512xf32> -> vector<16x512xf32>
    %19 = arith.addf %17, %18 : vector<16x512xf32>
    %20 = vector.extract_strided_slice %19 {offsets = [0, 0], sizes = [16, 128], strides = [1, 1]} : vector<16x512xf32> to vector<16x128xf32>
    %cst_18 = arith.constant 0.000000e+00 : f32
    %21 = vector.broadcast %cst_18 : f32 to vector<16x128xf32>
    %22 = arith.subf %21, %20 : vector<16x128xf32>
    %23 = math.exp %22 : vector<16x128xf32>
    %cst_19 = arith.constant 1.000000e+00 : f32
    %24 = vector.broadcast %cst_19 : f32 to vector<16x128xf32>
    %25 = arith.addf %24, %23 : vector<16x128xf32>
    %cst_20 = arith.constant 1.000000e+00 : f32
    %26 = vector.broadcast %cst_20 : f32 to vector<16x128xf32>
    %27 = arith.divf %26, %25 : vector<16x128xf32>
    %28 = vector.extract_strided_slice %19 {offsets = [0, 128], sizes = [16, 128], strides = [1, 1]} : vector<16x512xf32> to vector<16x128xf32>
    %cst_21 = arith.constant 0.000000e+00 : f32
    %29 = vector.broadcast %cst_21 : f32 to vector<16x128xf32>
    %30 = arith.subf %29, %28 : vector<16x128xf32>
    %31 = math.exp %30 : vector<16x128xf32>
    %cst_22 = arith.constant 1.000000e+00 : f32
    %32 = vector.broadcast %cst_22 : f32 to vector<16x128xf32>
    %33 = arith.addf %32, %31 : vector<16x128xf32>
    %cst_23 = arith.constant 1.000000e+00 : f32
    %34 = vector.broadcast %cst_23 : f32 to vector<16x128xf32>
    %35 = arith.divf %34, %33 : vector<16x128xf32>
    %36 = vector.extract_strided_slice %19 {offsets = [0, 256], sizes = [16, 128], strides = [1, 1]} : vector<16x512xf32> to vector<16x128xf32>
    %37 = math.tanh %36 : vector<16x128xf32>
    %38 = vector.extract_strided_slice %19 {offsets = [0, 384], sizes = [16, 128], strides = [1, 1]} : vector<16x512xf32> to vector<16x128xf32>
    %cst_24 = arith.constant 0.000000e+00 : f32
    %39 = vector.broadcast %cst_24 : f32 to vector<16x128xf32>
    %40 = arith.subf %39, %38 : vector<16x128xf32>
    %41 = math.exp %40 : vector<16x128xf32>
    %cst_25 = arith.constant 1.000000e+00 : f32
    %42 = vector.broadcast %cst_25 : f32 to vector<16x128xf32>
    %43 = arith.addf %42, %41 : vector<16x128xf32>
    %cst_26 = arith.constant 1.000000e+00 : f32
    %44 = vector.broadcast %cst_26 : f32 to vector<16x128xf32>
    %45 = arith.divf %44, %43 : vector<16x128xf32>
    %46 = arith.mulf %35, %13 : vector<16x128xf32>
    %47 = arith.mulf %27, %37 : vector<16x128xf32>
    %48 = arith.addf %46, %47 : vector<16x128xf32>
    %49 = math.tanh %48 : vector<16x128xf32>
    %50 = arith.mulf %45, %49 : vector<16x128xf32>
    %51 = arith.truncf %50 : vector<16x128xf32> to vector<16x128xbf16>
    %52 = arith.index_cast %c0_i32_15 : i32 to index
    %c0_27 = arith.constant 0 : index
    %c0_28 = arith.constant 0 : index
    %53 = vector.load %arg6[%52, %c0_27, %c0_28] : memref<8x16x128xbf16, #tpu.memory_space<vmem>>, vector<1x16x128xbf16>
    %54 = vector.shape_cast %53 : vector<1x16x128xbf16> to vector<16x128xbf16>
    %55 = vector.shape_cast %51 : vector<16x128xbf16> to vector<1x16x128xbf16>
    tpu.vector_store %arg6[%52, %c0_27, %c0_28], %55 {strides = array<i32>} : memref<8x16x128xbf16, #tpu.memory_space<vmem>>, vector<1x16x128xbf16>,
    %c1_i32 = arith.constant 1 : i32
    %c16_i32_29 = arith.constant 16 : i32
    %56 = arith.muli %c1_i32, %c16_i32_29 : i32
    %57 = tpu.assume_multiple %56, 8 : i32
    %58 = arith.index_cast %57 : i32 to index
    %c0_30 = arith.constant 0 : index
    %59 = vector.load %arg7[%58, %c0_30] : memref<128x512xf32, #tpu.memory_space<vmem>>, vector<16x512xf32>
    %cst_31 = arith.constant dense<0.000000e+00> : vector<16x512xf32>
    %60 = tpu.matmul %51, %11, %cst_31 {dimension_numbers = #tpu.dot_dimension_numbers<[1], [0], [0], [1], [0, 0, 1, 1], [], []>} : vector<16x128xbf16>, vector<128x512xbf16>, vector<16x512xf32> -> vector<16x512xf32>
    %61 = arith.addf %59, %60 : vector<16x512xf32>
    %62 = vector.extract_strided_slice %61 {offsets = [0, 0], sizes = [16, 128], strides = [1, 1]} : vector<16x512xf32> to vector<16x128xf32>
    %cst_32 = arith.constant 0.000000e+00 : f32
    %63 = vector.broadcast %cst_32 : f32 to vector<16x128xf32>
    %64 = arith.subf %63, %62 : vector<16x128xf32>
    %65 = math.exp %64 : vector<16x128xf32>
    %cst_33 = arith.constant 1.000000e+00 : f32
    %66 = vector.broadcast %cst_33 : f32 to vector<16x128xf32>
    %67 = arith.addf %66, %65 : vector<16x128xf32>
    %cst_34 = arith.constant 1.000000e+00 : f32
    %68 = vector.broadcast %cst_34 : f32 to vector<16x128xf32>
    %69 = arith.divf %68, %67 : vector<16x128xf32>
    %70 = vector.extract_strided_slice %61 {offsets = [0, 128], sizes = [16, 128], strides = [1, 1]} : vector<16x512xf32> to vector<16x128xf32>
    %cst_35 = arith.constant 0.000000e+00 : f32
    %71 = vector.broadcast %cst_35 : f32 to vector<16x128xf32>
    %72 = arith.subf %71, %70 : vector<16x128xf32>
    %73 = math.exp %72 : vector<16x128xf32>
    %cst_36 = arith.constant 1.000000e+00 : f32
    %74 = vector.broadcast %cst_36 : f32 to vector<16x128xf32>
    %75 = arith.addf %74, %73 : vector<16x128xf32>
    %cst_37 = arith.constant 1.000000e+00 : f32
    %76 = vector.broadcast %cst_37 : f32 to vector<16x128xf32>
    %77 = arith.divf %76, %75 : vector<16x128xf32>
    %78 = vector.extract_strided_slice %61 {offsets = [0, 256], sizes = [16, 128], strides = [1, 1]} : vector<16x512xf32> to vector<16x128xf32>
    %79 = math.tanh %78 : vector<16x128xf32>
    %80 = vector.extract_strided_slice %61 {offsets = [0, 384], sizes = [16, 128], strides = [1, 1]} : vector<16x512xf32> to vector<16x128xf32>
    %cst_38 = arith.constant 0.000000e+00 : f32
    %81 = vector.broadcast %cst_38 : f32 to vector<16x128xf32>
    %82 = arith.subf %81, %80 : vector<16x128xf32>
    %83 = math.exp %82 : vector<16x128xf32>
    %cst_39 = arith.constant 1.000000e+00 : f32
    %84 = vector.broadcast %cst_39 : f32 to vector<16x128xf32>
    %85 = arith.addf %84, %83 : vector<16x128xf32>
    %cst_40 = arith.constant 1.000000e+00 : f32
    %86 = vector.broadcast %cst_40 : f32 to vector<16x128xf32>
    %87 = arith.divf %86, %85 : vector<16x128xf32>
    %88 = arith.mulf %77, %48 : vector<16x128xf32>
    %89 = arith.mulf %69, %79 : vector<16x128xf32>
    %90 = arith.addf %88, %89 : vector<16x128xf32>
    %91 = math.tanh %90 : vector<16x128xf32>
    %92 = arith.mulf %87, %91 : vector<16x128xf32>
    %93 = arith.truncf %92 : vector<16x128xf32> to vector<16x128xbf16>
    %94 = arith.index_cast %c1_i32 : i32 to index
    %c0_41 = arith.constant 0 : index
    %c0_42 = arith.constant 0 : index
    %95 = vector.load %arg6[%94, %c0_41, %c0_42] : memref<8x16x128xbf16, #tpu.memory_space<vmem>>, vector<1x16x128xbf16>
    %96 = vector.shape_cast %95 : vector<1x16x128xbf16> to vector<16x128xbf16>
    %97 = vector.shape_cast %93 : vector<16x128xbf16> to vector<1x16x128xbf16>
    tpu.vector_store %arg6[%94, %c0_41, %c0_42], %97 {strides = array<i32>} : memref<8x16x128xbf16, #tpu.memory_space<vmem>>, vector<1x16x128xbf16>,
    %c2_i32 = arith.constant 2 : i32
    %c16_i32_43 = arith.constant 16 : i32
    %98 = arith.muli %c2_i32, %c16_i32_43 : i32
    %99 = tpu.assume_multiple %98, 8 : i32
    %100 = arith.index_cast %99 : i32 to index
    %c0_44 = arith.constant 0 : index
    %101 = vector.load %arg7[%100, %c0_44] : memref<128x512xf32, #tpu.memory_space<vmem>>, vector<16x512xf32>
    %cst_45 = arith.constant dense<0.000000e+00> : vector<16x512xf32>
    %102 = tpu.matmul %93, %11, %cst_45 {dimension_numbers = #tpu.dot_dimension_numbers<[1], [0], [0], [1], [0, 0, 1, 1], [], []>} : vector<16x128xbf16>, vector<128x512xbf16>, vector<16x512xf32> -> vector<16x512xf32>
    %103 = arith.addf %101, %102 : vector<16x512xf32>
    %104 = vector.extract_strided_slice %103 {offsets = [0, 0], sizes = [16, 128], strides = [1, 1]} : vector<16x512xf32> to vector<16x128xf32>
    %cst_46 = arith.constant 0.000000e+00 : f32
    %105 = vector.broadcast %cst_46 : f32 to vector<16x128xf32>
    %106 = arith.subf %105, %104 : vector<16x128xf32>
    %107 = math.exp %106 : vector<16x128xf32>
    %cst_47 = arith.constant 1.000000e+00 : f32
    %108 = vector.broadcast %cst_47 : f32 to vector<16x128xf32>
    %109 = arith.addf %108, %107 : vector<16x128xf32>
    %cst_48 = arith.constant 1.000000e+00 : f32
    %110 = vector.broadcast %cst_48 : f32 to vector<16x128xf32>
    %111 = arith.divf %110, %109 : vector<16x128xf32>
    %112 = vector.extract_strided_slice %103 {offsets = [0, 128], sizes = [16, 128], strides = [1, 1]} : vector<16x512xf32> to vector<16x128xf32>
    %cst_49 = arith.constant 0.000000e+00 : f32
    %113 = vector.broadcast %cst_49 : f32 to vector<16x128xf32>
    %114 = arith.subf %113, %112 : vector<16x128xf32>
    %115 = math.exp %114 : vector<16x128xf32>
    %cst_50 = arith.constant 1.000000e+00 : f32
    %116 = vector.broadcast %cst_50 : f32 to vector<16x128xf32>
    %117 = arith.addf %116, %115 : vector<16x128xf32>
    %cst_51 = arith.constant 1.000000e+00 : f32
    %118 = vector.broadcast %cst_51 : f32 to vector<16x128xf32>
    %119 = arith.divf %118, %117 : vector<16x128xf32>
    %120 = vector.extract_strided_slice %103 {offsets = [0, 256], sizes = [16, 128], strides = [1, 1]} : vector<16x512xf32> to vector<16x128xf32>
    %121 = math.tanh %120 : vector<16x128xf32>
    %122 = vector.extract_strided_slice %103 {offsets = [0, 384], sizes = [16, 128], strides = [1, 1]} : vector<16x512xf32> to vector<16x128xf32>
    %cst_52 = arith.constant 0.000000e+00 : f32
    %123 = vector.broadcast %cst_52 : f32 to vector<16x128xf32>
    %124 = arith.subf %123, %122 : vector<16x128xf32>
    %125 = math.exp %124 : vector<16x128xf32>
    %cst_53 = arith.constant 1.000000e+00 : f32
    %126 = vector.broadcast %cst_53 : f32 to vector<16x128xf32>
    %127 = arith.addf %126, %125 : vector<16x128xf32>
    %cst_54 = arith.constant 1.000000e+00 : f32
    %128 = vector.broadcast %cst_54 : f32 to vector<16x128xf32>
    %129 = arith.divf %128, %127 : vector<16x128xf32>
    %130 = arith.mulf %119, %90 : vector<16x128xf32>
    %131 = arith.mulf %111, %121 : vector<16x128xf32>
    %132 = arith.addf %130, %131 : vector<16x128xf32>
    %133 = math.tanh %132 : vector<16x128xf32>
    %134 = arith.mulf %129, %133 : vector<16x128xf32>
    %135 = arith.truncf %134 : vector<16x128xf32> to vector<16x128xbf16>
    %136 = arith.index_cast %c2_i32 : i32 to index
    %c0_55 = arith.constant 0 : index
    %c0_56 = arith.constant 0 : index
    %137 = vector.load %arg6[%136, %c0_55, %c0_56] : memref<8x16x128xbf16, #tpu.memory_space<vmem>>, vector<1x16x128xbf16>
    %138 = vector.shape_cast %137 : vector<1x16x128xbf16> to vector<16x128xbf16>
    %139 = vector.shape_cast %135 : vector<16x128xbf16> to vector<1x16x128xbf16>
    tpu.vector_store %arg6[%136, %c0_55, %c0_56], %139 {strides = array<i32>} : memref<8x16x128xbf16, #tpu.memory_space<vmem>>, vector<1x16x128xbf16>,
    %c3_i32 = arith.constant 3 : i32
    %c16_i32_57 = arith.constant 16 : i32
    %140 = arith.muli %c3_i32, %c16_i32_57 : i32
    %141 = tpu.assume_multiple %140, 8 : i32
    %142 = arith.index_cast %141 : i32 to index
    %c0_58 = arith.constant 0 : index
    %143 = vector.load %arg7[%142, %c0_58] : memref<128x512xf32, #tpu.memory_space<vmem>>, vector<16x512xf32>
    %cst_59 = arith.constant dense<0.000000e+00> : vector<16x512xf32>
    %144 = tpu.matmul %135, %11, %cst_59 {dimension_numbers = #tpu.dot_dimension_numbers<[1], [0], [0], [1], [0, 0, 1, 1], [], []>} : vector<16x128xbf16>, vector<128x512xbf16>, vector<16x512xf32> -> vector<16x512xf32>
    %145 = arith.addf %143, %144 : vector<16x512xf32>
    %146 = vector.extract_strided_slice %145 {offsets = [0, 0], sizes = [16, 128], strides = [1, 1]} : vector<16x512xf32> to vector<16x128xf32>
    %cst_60 = arith.constant 0.000000e+00 : f32
    %147 = vector.broadcast %cst_60 : f32 to vector<16x128xf32>
    %148 = arith.subf %147, %146 : vector<16x128xf32>
    %149 = math.exp %148 : vector<16x128xf32>
    %cst_61 = arith.constant 1.000000e+00 : f32
    %150 = vector.broadcast %cst_61 : f32 to vector<16x128xf32>
    %151 = arith.addf %150, %149 : vector<16x128xf32>
    %cst_62 = arith.constant 1.000000e+00 : f32
    %152 = vector.broadcast %cst_62 : f32 to vector<16x128xf32>
    %153 = arith.divf %152, %151 : vector<16x128xf32>
    %154 = vector.extract_strided_slice %145 {offsets = [0, 128], sizes = [16, 128], strides = [1, 1]} : vector<16x512xf32> to vector<16x128xf32>
    %cst_63 = arith.constant 0.000000e+00 : f32
    %155 = vector.broadcast %cst_63 : f32 to vector<16x128xf32>
    %156 = arith.subf %155, %154 : vector<16x128xf32>
    %157 = math.exp %156 : vector<16x128xf32>
    %cst_64 = arith.constant 1.000000e+00 : f32
    %158 = vector.broadcast %cst_64 : f32 to vector<16x128xf32>
    %159 = arith.addf %158, %157 : vector<16x128xf32>
    %cst_65 = arith.constant 1.000000e+00 : f32
    %160 = vector.broadcast %cst_65 : f32 to vector<16x128xf32>
    %161 = arith.divf %160, %159 : vector<16x128xf32>
    %162 = vector.extract_strided_slice %145 {offsets = [0, 256], sizes = [16, 128], strides = [1, 1]} : vector<16x512xf32> to vector<16x128xf32>
    %163 = math.tanh %162 : vector<16x128xf32>
    %164 = vector.extract_strided_slice %145 {offsets = [0, 384], sizes = [16, 128], strides = [1, 1]} : vector<16x512xf32> to vector<16x128xf32>
    %cst_66 = arith.constant 0.000000e+00 : f32
    %165 = vector.broadcast %cst_66 : f32 to vector<16x128xf32>
    %166 = arith.subf %165, %164 : vector<16x128xf32>
    %167 = math.exp %166 : vector<16x128xf32>
    %cst_67 = arith.constant 1.000000e+00 : f32
    %168 = vector.broadcast %cst_67 : f32 to vector<16x128xf32>
    %169 = arith.addf %168, %167 : vector<16x128xf32>
    %cst_68 = arith.constant 1.000000e+00 : f32
    %170 = vector.broadcast %cst_68 : f32 to vector<16x128xf32>
    %171 = arith.divf %170, %169 : vector<16x128xf32>
    %172 = arith.mulf %161, %132 : vector<16x128xf32>
    %173 = arith.mulf %153, %163 : vector<16x128xf32>
    %174 = arith.addf %172, %173 : vector<16x128xf32>
    %175 = math.tanh %174 : vector<16x128xf32>
    %176 = arith.mulf %171, %175 : vector<16x128xf32>
    %177 = arith.truncf %176 : vector<16x128xf32> to vector<16x128xbf16>
    %178 = arith.index_cast %c3_i32 : i32 to index
    %c0_69 = arith.constant 0 : index
    %c0_70 = arith.constant 0 : index
    %179 = vector.load %arg6[%178, %c0_69, %c0_70] : memref<8x16x128xbf16, #tpu.memory_space<vmem>>, vector<1x16x128xbf16>
    %180 = vector.shape_cast %179 : vector<1x16x128xbf16> to vector<16x128xbf16>
    %181 = vector.shape_cast %177 : vector<16x128xbf16> to vector<1x16x128xbf16>
    tpu.vector_store %arg6[%178, %c0_69, %c0_70], %181 {strides = array<i32>} : memref<8x16x128xbf16, #tpu.memory_space<vmem>>, vector<1x16x128xbf16>,
    %c4_i32 = arith.constant 4 : i32
    %c16_i32_71 = arith.constant 16 : i32
    %182 = arith.muli %c4_i32, %c16_i32_71 : i32
    %183 = tpu.assume_multiple %182, 8 : i32
    %184 = arith.index_cast %183 : i32 to index
    %c0_72 = arith.constant 0 : index
    %185 = vector.load %arg7[%184, %c0_72] : memref<128x512xf32, #tpu.memory_space<vmem>>, vector<16x512xf32>
    %cst_73 = arith.constant dense<0.000000e+00> : vector<16x512xf32>
    %186 = tpu.matmul %177, %11, %cst_73 {dimension_numbers = #tpu.dot_dimension_numbers<[1], [0], [0], [1], [0, 0, 1, 1], [], []>} : vector<16x128xbf16>, vector<128x512xbf16>, vector<16x512xf32> -> vector<16x512xf32>
    %187 = arith.addf %185, %186 : vector<16x512xf32>
    %188 = vector.extract_strided_slice %187 {offsets = [0, 0], sizes = [16, 128], strides = [1, 1]} : vector<16x512xf32> to vector<16x128xf32>
    %cst_74 = arith.constant 0.000000e+00 : f32
    %189 = vector.broadcast %cst_74 : f32 to vector<16x128xf32>
    %190 = arith.subf %189, %188 : vector<16x128xf32>
    %191 = math.exp %190 : vector<16x128xf32>
    %cst_75 = arith.constant 1.000000e+00 : f32
    %192 = vector.broadcast %cst_75 : f32 to vector<16x128xf32>
    %193 = arith.addf %192, %191 : vector<16x128xf32>
    %cst_76 = arith.constant 1.000000e+00 : f32
    %194 = vector.broadcast %cst_76 : f32 to vector<16x128xf32>
    %195 = arith.divf %194, %193 : vector<16x128xf32>
    %196 = vector.extract_strided_slice %187 {offsets = [0, 128], sizes = [16, 128], strides = [1, 1]} : vector<16x512xf32> to vector<16x128xf32>
    %cst_77 = arith.constant 0.000000e+00 : f32
    %197 = vector.broadcast %cst_77 : f32 to vector<16x128xf32>
    %198 = arith.subf %197, %196 : vector<16x128xf32>
    %199 = math.exp %198 : vector<16x128xf32>
    %cst_78 = arith.constant 1.000000e+00 : f32
    %200 = vector.broadcast %cst_78 : f32 to vector<16x128xf32>
    %201 = arith.addf %200, %199 : vector<16x128xf32>
    %cst_79 = arith.constant 1.000000e+00 : f32
    %202 = vector.broadcast %cst_79 : f32 to vector<16x128xf32>
    %203 = arith.divf %202, %201 : vector<16x128xf32>
    %204 = vector.extract_strided_slice %187 {offsets = [0, 256], sizes = [16, 128], strides = [1, 1]} : vector<16x512xf32> to vector<16x128xf32>
    %205 = math.tanh %204 : vector<16x128xf32>
    %206 = vector.extract_strided_slice %187 {offsets = [0, 384], sizes = [16, 128], strides = [1, 1]} : vector<16x512xf32> to vector<16x128xf32>
    %cst_80 = arith.constant 0.000000e+00 : f32
    %207 = vector.broadcast %cst_80 : f32 to vector<16x128xf32>
    %208 = arith.subf %207, %206 : vector<16x128xf32>
    %209 = math.exp %208 : vector<16x128xf32>
    %cst_81 = arith.constant 1.000000e+00 : f32
    %210 = vector.broadcast %cst_81 : f32 to vector<16x128xf32>
    %211 = arith.addf %210, %209 : vector<16x128xf32>
    %cst_82 = arith.constant 1.000000e+00 : f32
    %212 = vector.broadcast %cst_82 : f32 to vector<16x128xf32>
    %213 = arith.divf %212, %211 : vector<16x128xf32>
    %214 = arith.mulf %203, %174 : vector<16x128xf32>
    %215 = arith.mulf %195, %205 : vector<16x128xf32>
    %216 = arith.addf %214, %215 : vector<16x128xf32>
    %217 = math.tanh %216 : vector<16x128xf32>
    %218 = arith.mulf %213, %217 : vector<16x128xf32>
    %219 = arith.truncf %218 : vector<16x128xf32> to vector<16x128xbf16>
    %220 = arith.index_cast %c4_i32 : i32 to index
    %c0_83 = arith.constant 0 : index
    %c0_84 = arith.constant 0 : index
    %221 = vector.load %arg6[%220, %c0_83, %c0_84] : memref<8x16x128xbf16, #tpu.memory_space<vmem>>, vector<1x16x128xbf16>
    %222 = vector.shape_cast %221 : vector<1x16x128xbf16> to vector<16x128xbf16>
    %223 = vector.shape_cast %219 : vector<16x128xbf16> to vector<1x16x128xbf16>
    tpu.vector_store %arg6[%220, %c0_83, %c0_84], %223 {strides = array<i32>} : memref<8x16x128xbf16, #tpu.memory_space<vmem>>, vector<1x16x128xbf16>,
    %c5_i32 = arith.constant 5 : i32
    %c16_i32_85 = arith.constant 16 : i32
    %224 = arith.muli %c5_i32, %c16_i32_85 : i32
    %225 = tpu.assume_multiple %224, 8 : i32
    %226 = arith.index_cast %225 : i32 to index
    %c0_86 = arith.constant 0 : index
    %227 = vector.load %arg7[%226, %c0_86] : memref<128x512xf32, #tpu.memory_space<vmem>>, vector<16x512xf32>
    %cst_87 = arith.constant dense<0.000000e+00> : vector<16x512xf32>
    %228 = tpu.matmul %219, %11, %cst_87 {dimension_numbers = #tpu.dot_dimension_numbers<[1], [0], [0], [1], [0, 0, 1, 1], [], []>} : vector<16x128xbf16>, vector<128x512xbf16>, vector<16x512xf32> -> vector<16x512xf32>
    %229 = arith.addf %227, %228 : vector<16x512xf32>
    %230 = vector.extract_strided_slice %229 {offsets = [0, 0], sizes = [16, 128], strides = [1, 1]} : vector<16x512xf32> to vector<16x128xf32>
    %cst_88 = arith.constant 0.000000e+00 : f32
    %231 = vector.broadcast %cst_88 : f32 to vector<16x128xf32>
    %232 = arith.subf %231, %230 : vector<16x128xf32>
    %233 = math.exp %232 : vector<16x128xf32>
    %cst_89 = arith.constant 1.000000e+00 : f32
    %234 = vector.broadcast %cst_89 : f32 to vector<16x128xf32>
    %235 = arith.addf %234, %233 : vector<16x128xf32>
    %cst_90 = arith.constant 1.000000e+00 : f32
    %236 = vector.broadcast %cst_90 : f32 to vector<16x128xf32>
    %237 = arith.divf %236, %235 : vector<16x128xf32>
    %238 = vector.extract_strided_slice %229 {offsets = [0, 128], sizes = [16, 128], strides = [1, 1]} : vector<16x512xf32> to vector<16x128xf32>
    %cst_91 = arith.constant 0.000000e+00 : f32
    %239 = vector.broadcast %cst_91 : f32 to vector<16x128xf32>
    %240 = arith.subf %239, %238 : vector<16x128xf32>
    %241 = math.exp %240 : vector<16x128xf32>
    %cst_92 = arith.constant 1.000000e+00 : f32
    %242 = vector.broadcast %cst_92 : f32 to vector<16x128xf32>
    %243 = arith.addf %242, %241 : vector<16x128xf32>
    %cst_93 = arith.constant 1.000000e+00 : f32
    %244 = vector.broadcast %cst_93 : f32 to vector<16x128xf32>
    %245 = arith.divf %244, %243 : vector<16x128xf32>
    %246 = vector.extract_strided_slice %229 {offsets = [0, 256], sizes = [16, 128], strides = [1, 1]} : vector<16x512xf32> to vector<16x128xf32>
    %247 = math.tanh %246 : vector<16x128xf32>
    %248 = vector.extract_strided_slice %229 {offsets = [0, 384], sizes = [16, 128], strides = [1, 1]} : vector<16x512xf32> to vector<16x128xf32>
    %cst_94 = arith.constant 0.000000e+00 : f32
    %249 = vector.broadcast %cst_94 : f32 to vector<16x128xf32>
    %250 = arith.subf %249, %248 : vector<16x128xf32>
    %251 = math.exp %250 : vector<16x128xf32>
    %cst_95 = arith.constant 1.000000e+00 : f32
    %252 = vector.broadcast %cst_95 : f32 to vector<16x128xf32>
    %253 = arith.addf %252, %251 : vector<16x128xf32>
    %cst_96 = arith.constant 1.000000e+00 : f32
    %254 = vector.broadcast %cst_96 : f32 to vector<16x128xf32>
    %255 = arith.divf %254, %253 : vector<16x128xf32>
    %256 = arith.mulf %245, %216 : vector<16x128xf32>
    %257 = arith.mulf %237, %247 : vector<16x128xf32>
    %258 = arith.addf %256, %257 : vector<16x128xf32>
    %259 = math.tanh %258 : vector<16x128xf32>
    %260 = arith.mulf %255, %259 : vector<16x128xf32>
    %261 = arith.truncf %260 : vector<16x128xf32> to vector<16x128xbf16>
    %262 = arith.index_cast %c5_i32 : i32 to index
    %c0_97 = arith.constant 0 : index
    %c0_98 = arith.constant 0 : index
    %263 = vector.load %arg6[%262, %c0_97, %c0_98] : memref<8x16x128xbf16, #tpu.memory_space<vmem>>, vector<1x16x128xbf16>
    %264 = vector.shape_cast %263 : vector<1x16x128xbf16> to vector<16x128xbf16>
    %265 = vector.shape_cast %261 : vector<16x128xbf16> to vector<1x16x128xbf16>
    tpu.vector_store %arg6[%262, %c0_97, %c0_98], %265 {strides = array<i32>} : memref<8x16x128xbf16, #tpu.memory_space<vmem>>, vector<1x16x128xbf16>,
    %c6_i32 = arith.constant 6 : i32
    %c16_i32_99 = arith.constant 16 : i32
    %266 = arith.muli %c6_i32, %c16_i32_99 : i32
    %267 = tpu.assume_multiple %266, 8 : i32
    %268 = arith.index_cast %267 : i32 to index
    %c0_100 = arith.constant 0 : index
    %269 = vector.load %arg7[%268, %c0_100] : memref<128x512xf32, #tpu.memory_space<vmem>>, vector<16x512xf32>
    %cst_101 = arith.constant dense<0.000000e+00> : vector<16x512xf32>
    %270 = tpu.matmul %261, %11, %cst_101 {dimension_numbers = #tpu.dot_dimension_numbers<[1], [0], [0], [1], [0, 0, 1, 1], [], []>} : vector<16x128xbf16>, vector<128x512xbf16>, vector<16x512xf32> -> vector<16x512xf32>
    %271 = arith.addf %269, %270 : vector<16x512xf32>
    %272 = vector.extract_strided_slice %271 {offsets = [0, 0], sizes = [16, 128], strides = [1, 1]} : vector<16x512xf32> to vector<16x128xf32>
    %cst_102 = arith.constant 0.000000e+00 : f32
    %273 = vector.broadcast %cst_102 : f32 to vector<16x128xf32>
    %274 = arith.subf %273, %272 : vector<16x128xf32>
    %275 = math.exp %274 : vector<16x128xf32>
    %cst_103 = arith.constant 1.000000e+00 : f32
    %276 = vector.broadcast %cst_103 : f32 to vector<16x128xf32>
    %277 = arith.addf %276, %275 : vector<16x128xf32>
    %cst_104 = arith.constant 1.000000e+00 : f32
    %278 = vector.broadcast %cst_104 : f32 to vector<16x128xf32>
    %279 = arith.divf %278, %277 : vector<16x128xf32>
    %280 = vector.extract_strided_slice %271 {offsets = [0, 128], sizes = [16, 128], strides = [1, 1]} : vector<16x512xf32> to vector<16x128xf32>
    %cst_105 = arith.constant 0.000000e+00 : f32
    %281 = vector.broadcast %cst_105 : f32 to vector<16x128xf32>
    %282 = arith.subf %281, %280 : vector<16x128xf32>
    %283 = math.exp %282 : vector<16x128xf32>
    %cst_106 = arith.constant 1.000000e+00 : f32
    %284 = vector.broadcast %cst_106 : f32 to vector<16x128xf32>
    %285 = arith.addf %284, %283 : vector<16x128xf32>
    %cst_107 = arith.constant 1.000000e+00 : f32
    %286 = vector.broadcast %cst_107 : f32 to vector<16x128xf32>
    %287 = arith.divf %286, %285 : vector<16x128xf32>
    %288 = vector.extract_strided_slice %271 {offsets = [0, 256], sizes = [16, 128], strides = [1, 1]} : vector<16x512xf32> to vector<16x128xf32>
    %289 = math.tanh %288 : vector<16x128xf32>
    %290 = vector.extract_strided_slice %271 {offsets = [0, 384], sizes = [16, 128], strides = [1, 1]} : vector<16x512xf32> to vector<16x128xf32>
    %cst_108 = arith.constant 0.000000e+00 : f32
    %291 = vector.broadcast %cst_108 : f32 to vector<16x128xf32>
    %292 = arith.subf %291, %290 : vector<16x128xf32>
    %293 = math.exp %292 : vector<16x128xf32>
    %cst_109 = arith.constant 1.000000e+00 : f32
    %294 = vector.broadcast %cst_109 : f32 to vector<16x128xf32>
    %295 = arith.addf %294, %293 : vector<16x128xf32>
    %cst_110 = arith.constant 1.000000e+00 : f32
    %296 = vector.broadcast %cst_110 : f32 to vector<16x128xf32>
    %297 = arith.divf %296, %295 : vector<16x128xf32>
    %298 = arith.mulf %287, %258 : vector<16x128xf32>
    %299 = arith.mulf %279, %289 : vector<16x128xf32>
    %300 = arith.addf %298, %299 : vector<16x128xf32>
    %301 = math.tanh %300 : vector<16x128xf32>
    %302 = arith.mulf %297, %301 : vector<16x128xf32>
    %303 = arith.truncf %302 : vector<16x128xf32> to vector<16x128xbf16>
    %304 = arith.index_cast %c6_i32 : i32 to index
    %c0_111 = arith.constant 0 : index
    %c0_112 = arith.constant 0 : index
    %305 = vector.load %arg6[%304, %c0_111, %c0_112] : memref<8x16x128xbf16, #tpu.memory_space<vmem>>, vector<1x16x128xbf16>
    %306 = vector.shape_cast %305 : vector<1x16x128xbf16> to vector<16x128xbf16>
    %307 = vector.shape_cast %303 : vector<16x128xbf16> to vector<1x16x128xbf16>
    tpu.vector_store %arg6[%304, %c0_111, %c0_112], %307 {strides = array<i32>} : memref<8x16x128xbf16, #tpu.memory_space<vmem>>, vector<1x16x128xbf16>,
    %c7_i32 = arith.constant 7 : i32
    %c16_i32_113 = arith.constant 16 : i32
    %308 = arith.muli %c7_i32, %c16_i32_113 : i32
    %309 = tpu.assume_multiple %308, 8 : i32
    %310 = arith.index_cast %309 : i32 to index
    %c0_114 = arith.constant 0 : index
    %311 = vector.load %arg7[%310, %c0_114] : memref<128x512xf32, #tpu.memory_space<vmem>>, vector<16x512xf32>
    %cst_115 = arith.constant dense<0.000000e+00> : vector<16x512xf32>
    %312 = tpu.matmul %303, %11, %cst_115 {dimension_numbers = #tpu.dot_dimension_numbers<[1], [0], [0], [1], [0, 0, 1, 1], [], []>} : vector<16x128xbf16>, vector<128x512xbf16>, vector<16x512xf32> -> vector<16x512xf32>
    %313 = arith.addf %311, %312 : vector<16x512xf32>
    %314 = vector.extract_strided_slice %313 {offsets = [0, 0], sizes = [16, 128], strides = [1, 1]} : vector<16x512xf32> to vector<16x128xf32>
    %cst_116 = arith.constant 0.000000e+00 : f32
    %315 = vector.broadcast %cst_116 : f32 to vector<16x128xf32>
    %316 = arith.subf %315, %314 : vector<16x128xf32>
    %317 = math.exp %316 : vector<16x128xf32>
    %cst_117 = arith.constant 1.000000e+00 : f32
    %318 = vector.broadcast %cst_117 : f32 to vector<16x128xf32>
    %319 = arith.addf %318, %317 : vector<16x128xf32>
    %cst_118 = arith.constant 1.000000e+00 : f32
    %320 = vector.broadcast %cst_118 : f32 to vector<16x128xf32>
    %321 = arith.divf %320, %319 : vector<16x128xf32>
    %322 = vector.extract_strided_slice %313 {offsets = [0, 128], sizes = [16, 128], strides = [1, 1]} : vector<16x512xf32> to vector<16x128xf32>
    %cst_119 = arith.constant 0.000000e+00 : f32
    %323 = vector.broadcast %cst_119 : f32 to vector<16x128xf32>
    %324 = arith.subf %323, %322 : vector<16x128xf32>
    %325 = math.exp %324 : vector<16x128xf32>
    %cst_120 = arith.constant 1.000000e+00 : f32
    %326 = vector.broadcast %cst_120 : f32 to vector<16x128xf32>
    %327 = arith.addf %326, %325 : vector<16x128xf32>
    %cst_121 = arith.constant 1.000000e+00 : f32
    %328 = vector.broadcast %cst_121 : f32 to vector<16x128xf32>
    %329 = arith.divf %328, %327 : vector<16x128xf32>
    %330 = vector.extract_strided_slice %313 {offsets = [0, 256], sizes = [16, 128], strides = [1, 1]} : vector<16x512xf32> to vector<16x128xf32>
    %331 = math.tanh %330 : vector<16x128xf32>
    %332 = vector.extract_strided_slice %313 {offsets = [0, 384], sizes = [16, 128], strides = [1, 1]} : vector<16x512xf32> to vector<16x128xf32>
    %cst_122 = arith.constant 0.000000e+00 : f32
    %333 = vector.broadcast %cst_122 : f32 to vector<16x128xf32>
    %334 = arith.subf %333, %332 : vector<16x128xf32>
    %335 = math.exp %334 : vector<16x128xf32>
    %cst_123 = arith.constant 1.000000e+00 : f32
    %336 = vector.broadcast %cst_123 : f32 to vector<16x128xf32>
    %337 = arith.addf %336, %335 : vector<16x128xf32>
    %cst_124 = arith.constant 1.000000e+00 : f32
    %338 = vector.broadcast %cst_124 : f32 to vector<16x128xf32>
    %339 = arith.divf %338, %337 : vector<16x128xf32>
    %340 = arith.mulf %329, %300 : vector<16x128xf32>
    %341 = arith.mulf %321, %331 : vector<16x128xf32>
    %342 = arith.addf %340, %341 : vector<16x128xf32>
    %343 = math.tanh %342 : vector<16x128xf32>
    %344 = arith.mulf %339, %343 : vector<16x128xf32>
    %345 = arith.truncf %344 : vector<16x128xf32> to vector<16x128xbf16>
    %346 = arith.index_cast %c7_i32 : i32 to index
    %c0_125 = arith.constant 0 : index
    %c0_126 = arith.constant 0 : index
    %347 = vector.load %arg6[%346, %c0_125, %c0_126] : memref<8x16x128xbf16, #tpu.memory_space<vmem>>, vector<1x16x128xbf16>
    %348 = vector.shape_cast %347 : vector<1x16x128xbf16> to vector<16x128xbf16>
    %349 = vector.shape_cast %345 : vector<16x128xbf16> to vector<1x16x128xbf16>
    tpu.vector_store %arg6[%346, %c0_125, %c0_126], %349 {strides = array<i32>} : memref<8x16x128xbf16, #tpu.memory_space<vmem>>, vector<1x16x128xbf16>,
    %c8_i32 = arith.constant 8 : i32
    %c0_127 = arith.constant 0 : index
    %c0_128 = arith.constant 0 : index
    %350 = vector.load %arg8[%c0_127, %c0_128] : memref<16x128xbf16, #tpu.memory_space<vmem>>, vector<16x128xbf16>
    tpu.vector_store %arg8[%c0_127, %c0_128], %345 {strides = array<i32>} : memref<16x128xbf16, #tpu.memory_space<vmem>>, vector<16x128xbf16>,
    %c0_129 = arith.constant 0 : index
    %c0_130 = arith.constant 0 : index
    %351 = vector.load %arg9[%c0_129, %c0_130] : memref<16x128xf32, #tpu.memory_space<vmem>>, vector<16x128xf32>
    tpu.vector_store %arg9[%c0_129, %c0_130], %342 {strides = array<i32>} : memref<16x128xf32, #tpu.memory_space<vmem>>, vector<16x128xf32>,
    return
  }
  func.func @transform_0(%arg0: i32, %arg1: i32) -> (i32, i32, i32) {
    %c0_i32 = arith.constant 0 : i32
    %c0_i32_0 = arith.constant 0 : i32
    return %arg1, %arg0, %c0_i32 : i32, i32, i32
  }
  func.func @transform_1(%arg0: i32, %arg1: i32) -> (i32, i32) {
    %c0_i32 = arith.constant 0 : i32
    %c0_i32_0 = arith.constant 0 : i32
    %c0_i32_1 = arith.constant 0 : i32
    return %c0_i32, %c0_i32_0 : i32, i32
  }
  func.func @transform_2(%arg0: i32, %arg1: i32) -> (i32, i32) {
    %c0_i32 = arith.constant 0 : i32
    %c0_i32_0 = arith.constant 0 : i32
    %c0_i32_1 = arith.constant 0 : i32
    return %c0_i32, %c0_i32_0 : i32, i32
  }
  func.func @transform_3(%arg0: i32, %arg1: i32) -> (i32, i32) {
    %c0_i32 = arith.constant 0 : i32
    %c0_i32_0 = arith.constant 0 : i32
    %c0_i32_1 = arith.constant 0 : i32
    return %c0_i32, %c0_i32_0 : i32, i32
  }
  func.func @transform_4(%arg0: i32, %arg1: i32) -> (i32, i32, i32) {
    %c0_i32 = arith.constant 0 : i32
    %c0_i32_0 = arith.constant 0 : i32
    return %arg1, %arg0, %c0_i32 : i32, i32, i32
  }
}

module attributes {stable_mosaic.version = 11 : i64} {
  func.func @_matmul_bias_kernel(%arg0: i32, %arg1: memref<128x128xbf16, #tpu.memory_space<vmem>>, %arg2: memref<128x128xbf16, #tpu.memory_space<vmem>>, %arg3: memref<1x128xf32, #tpu.memory_space<vmem>>, %arg4: memref<128x128xf32, #tpu.memory_space<vmem>>) attributes {dimension_semantics = [#tpu.dimension_semantics<parallel>], iteration_bounds = array<i64: 1>, scalar_prefetch = 0 : i64, scratch_operands = 0 : i64, tpu.core_type = #tpu.core_type<tc>, window_params = [{transform_indices = @transform_0, window_bounds = array<i64: 128, 128>}, {pipeline_mode = #tpu.pipeline_mode<synchronous>, transform_indices = @transform_1, window_bounds = array<i64: 128, 128>}, {pipeline_mode = #tpu.pipeline_mode<synchronous>, transform_indices = @transform_2, window_bounds = array<i64: 1, 128>}, {transform_indices = @transform_3, window_bounds = array<i64: 128, 128>}]} {
    %c0 = arith.constant 0 : index
    %c0_0 = arith.constant 0 : index
    %0 = vector.load %arg1[%c0, %c0_0] : memref<128x128xbf16, #tpu.memory_space<vmem>>, vector<128x128xbf16>
    %c0_1 = arith.constant 0 : index
    %c0_2 = arith.constant 0 : index
    %1 = vector.load %arg2[%c0_1, %c0_2] : memref<128x128xbf16, #tpu.memory_space<vmem>>, vector<128x128xbf16>
    %cst = arith.constant dense<0.000000e+00> : vector<128x128xf32>
    %2 = tpu.matmul %0, %1, %cst {dimension_numbers = #tpu.dot_dimension_numbers<[1], [0], [0], [1], [0, 0, 1, 1], [], []>} : vector<128x128xbf16>, vector<128x128xbf16>, vector<128x128xf32> -> vector<128x128xf32>
    %c0_3 = arith.constant 0 : index
    %c0_4 = arith.constant 0 : index
    %3 = vector.load %arg3[%c0_3, %c0_4] : memref<1x128xf32, #tpu.memory_space<vmem>>, vector<1x128xf32>
    %4 = vector.broadcast %3 : vector<1x128xf32> to vector<128x128xf32>
    %5 = arith.addf %2, %4 : vector<128x128xf32>
    %c0_5 = arith.constant 0 : index
    %c0_6 = arith.constant 0 : index
    %6 = vector.load %arg4[%c0_5, %c0_6] : memref<128x128xf32, #tpu.memory_space<vmem>>, vector<128x128xf32>
    tpu.vector_store %arg4[%c0_5, %c0_6], %5 {strides = array<i32>} : memref<128x128xf32, #tpu.memory_space<vmem>>, vector<128x128xf32>,
    return
  }
  func.func @transform_0(%arg0: i32) -> (i32, i32) {
    %c0_i32 = arith.constant 0 : i32
    %c0_i32_0 = arith.constant 0 : i32
    return %arg0, %c0_i32 : i32, i32
  }
  func.func @transform_1(%arg0: i32) -> (i32, i32) {
    %c0_i32 = arith.constant 0 : i32
    %c0_i32_0 = arith.constant 0 : i32
    %c0_i32_1 = arith.constant 0 : i32
    return %c0_i32, %c0_i32_0 : i32, i32
  }
  func.func @transform_2(%arg0: i32) -> (i32, i32) {
    %c0_i32 = arith.constant 0 : i32
    %c0_i32_0 = arith.constant 0 : i32
    %c0_i32_1 = arith.constant 0 : i32
    return %c0_i32, %c0_i32_0 : i32, i32
  }
  func.func @transform_3(%arg0: i32) -> (i32, i32) {
    %c0_i32 = arith.constant 0 : i32
    %c0_i32_0 = arith.constant 0 : i32
    return %arg0, %c0_i32 : i32, i32
  }
}

module attributes {stable_mosaic.version = 11 : i64} {
  func.func @_lstm_layer_kernel(%arg0: i32, %arg1: i32, %arg2: memref<8x16x128xbf16, #tpu.memory_space<vmem>>, %arg3: memref<128x512xbf16, #tpu.memory_space<vmem>>, %arg4: memref<128x512xbf16, #tpu.memory_space<vmem>>, %arg5: memref<1x512xf32, #tpu.memory_space<vmem>>, %arg6: memref<8x16x128xbf16, #tpu.memory_space<vmem>>, %arg7: memref<128x512xf32, #tpu.memory_space<vmem>>, %arg8: memref<16x128xbf16, #tpu.memory_space<vmem>>, %arg9: memref<16x128xf32, #tpu.memory_space<vmem>>) attributes {dimension_semantics = [#tpu.dimension_semantics<parallel>, #tpu.dimension_semantics<arbitrary>], iteration_bounds = array<i64: 1, 1>, scalar_prefetch = 0 : i64, scratch_operands = 3 : i64, tpu.core_type = #tpu.core_type<tc>, window_params = [{transform_indices = @transform_0, window_bounds = array<i64: 8, 16, 128>}, {pipeline_mode = #tpu.pipeline_mode<synchronous>, transform_indices = @transform_1, window_bounds = array<i64: 128, 512>}, {pipeline_mode = #tpu.pipeline_mode<synchronous>, transform_indices = @transform_2, window_bounds = array<i64: 128, 512>}, {pipeline_mode = #tpu.pipeline_mode<synchronous>, transform_indices = @transform_3, window_bounds = array<i64: 1, 512>}, {transform_indices = @transform_4, window_bounds = array<i64: 8, 16, 128>}]} {
    %c0_i32 = arith.constant 0 : i32
    %0 = arith.cmpi eq, %arg1, %c0_i32 : i32
    %1 = arith.extui %0 : i1 to i32
    %c0_i32_0 = arith.constant 0 : i32
    %2 = arith.cmpi ne, %1, %c0_i32_0 : i32
    scf.if %2 {
      %cst_131 = arith.constant 0.000000e+00 : bf16
      %352 = vector.broadcast %cst_131 : bf16 to vector<16x128xbf16>
      %c0_132 = arith.constant 0 : index
      %c0_133 = arith.constant 0 : index
      %353 = vector.load %arg8[%c0_132, %c0_133] : memref<16x128xbf16, #tpu.memory_space<vmem>>, vector<16x128xbf16>
      tpu.vector_store %arg8[%c0_132, %c0_133], %352 {strides = array<i32>} : memref<16x128xbf16, #tpu.memory_space<vmem>>, vector<16x128xbf16>,
      %cst_134 = arith.constant 0.000000e+00 : f32
      %354 = vector.broadcast %cst_134 : f32 to vector<16x128xf32>
      %c0_135 = arith.constant 0 : index
      %c0_136 = arith.constant 0 : index
      %355 = vector.load %arg9[%c0_135, %c0_136] : memref<16x128xf32, #tpu.memory_space<vmem>>, vector<16x128xf32>
      tpu.vector_store %arg9[%c0_135, %c0_136], %354 {strides = array<i32>} : memref<16x128xf32, #tpu.memory_space<vmem>>, vector<16x128xf32>,
    } else {
    }
    %c0 = arith.constant 0 : index
    %c0_1 = arith.constant 0 : index
    %c0_2 = arith.constant 0 : index
    %3 = vector.load %arg2[%c0, %c0_1, %c0_2] : memref<8x16x128xbf16, #tpu.memory_space<vmem>>, vector<8x16x128xbf16>
    %4 = vector.shape_cast %3 : vector<8x16x128xbf16> to vector<128x128xbf16>
    %c0_3 = arith.constant 0 : index
    %c0_4 = arith.constant 0 : index
    %5 = vector.load %arg3[%c0_3, %c0_4] : memref<128x512xbf16, #tpu.memory_space<vmem>>, vector<128x512xbf16>
    %cst = arith.constant dense<0.000000e+00> : vector<128x512xf32>
    %6 = tpu.matmul %4, %5, %cst {dimension_numbers = #tpu.dot_dimension_numbers<[1], [0], [0], [1], [0, 0, 1, 1], [], []>} : vector<128x128xbf16>, vector<128x512xbf16>, vector<128x512xf32> -> vector<128x512xf32>
    %c0_5 = arith.constant 0 : index
    %c0_6 = arith.constant 0 : index
    %7 = vector.load %arg5[%c0_5, %c0_6] : memref<1x512xf32, #tpu.memory_space<vmem>>, vector<1x512xf32>
    %8 = vector.broadcast %7 : vector<1x512xf32> to vector<128x512xf32>
    %9 = arith.addf %6, %8 : vector<128x512xf32>
    %c0_7 = arith.constant 0 : index
    %c0_8 = arith.constant 0 : index
    %10 = vector.load %arg7[%c0_7, %c0_8] : memref<128x512xf32, #tpu.memory_space<vmem>>, vector<128x512xf32>
    tpu.vector_store %arg7[%c0_7, %c0_8], %9 {strides = array<i32>} : memref<128x512xf32, #tpu.memory_space<vmem>>, vector<128x512xf32>,
    %c0_9 = arith.constant 0 : index
    %c0_10 = arith.constant 0 : index
    %11 = vector.load %arg4[%c0_9, %c0_10] : memref<128x512xbf16, #tpu.memory_space<vmem>>, vector<128x512xbf16>
    %c0_11 = arith.constant 0 : index
    %c0_12 = arith.constant 0 : index
    %12 = vector.load %arg8[%c0_11, %c0_12] : memref<16x128xbf16, #tpu.memory_space<vmem>>, vector<16x128xbf16>
    %c0_13 = arith.constant 0 : index
    %c0_14 = arith.constant 0 : index
    %13 = vector.load %arg9[%c0_13, %c0_14] : memref<16x128xf32, #tpu.memory_space<vmem>>, vector<16x128xf32>
    %c0_i32_15 = arith.constant 0 : i32
    %c16_i32 = arith.constant 16 : i32
    %14 = arith.muli %c0_i32_15, %c16_i32 : i32
    %15 = tpu.assume_multiple %14, 8 : i32
    %16 = arith.index_cast %15 : i32 to index
    %c0_16 = arith.constant 0 : index
    %17 = vector.load %arg7[%16, %c0_16] : memref<128x512xf32, #tpu.memory_space<vmem>>, vector<16x512xf32>
    %cst_17 = arith.constant dense<0.000000e+00> : vector<16x512xf32>
    %18 = tpu.matmul %12, %11, %cst_17 {dimension_numbers = #tpu.dot_dimension_numbers<[1], [0], [0], [1], [0, 0, 1, 1], [], []>} : vector<16x128xbf16>, vector<128x512xbf16>, vector<16x512xf32> -> vector<16x512xf32>
    %19 = arith.addf %17, %18 : vector<16x512xf32>
    %20 = vector.extract_strided_slice %19 {offsets = [0, 0], sizes = [16, 128], strides = [1, 1]} : vector<16x512xf32> to vector<16x128xf32>
    %cst_18 = arith.constant 0.000000e+00 : f32
    %21 = vector.broadcast %cst_18 : f32 to vector<16x128xf32>
    %22 = arith.subf %21, %20 : vector<16x128xf32>
    %23 = math.exp %22 : vector<16x128xf32>
    %cst_19 = arith.constant 1.000000e+00 : f32
    %24 = vector.broadcast %cst_19 : f32 to vector<16x128xf32>
    %25 = arith.addf %24, %23 : vector<16x128xf32>
    %cst_20 = arith.constant 1.000000e+00 : f32
    %26 = vector.broadcast %cst_20 : f32 to vector<16x128xf32>
    %27 = arith.divf %26, %25 : vector<16x128xf32>
    %28 = vector.extract_strided_slice %19 {offsets = [0, 128], sizes = [16, 128], strides = [1, 1]} : vector<16x512xf32> to vector<16x128xf32>
    %cst_21 = arith.constant 0.000000e+00 : f32
    %29 = vector.broadcast %cst_21 : f32 to vector<16x128xf32>
    %30 = arith.subf %29, %28 : vector<16x128xf32>
    %31 = math.exp %30 : vector<16x128xf32>
    %cst_22 = arith.constant 1.000000e+00 : f32
    %32 = vector.broadcast %cst_22 : f32 to vector<16x128xf32>
    %33 = arith.addf %32, %31 : vector<16x128xf32>
    %cst_23 = arith.constant 1.000000e+00 : f32
    %34 = vector.broadcast %cst_23 : f32 to vector<16x128xf32>
    %35 = arith.divf %34, %33 : vector<16x128xf32>
    %36 = vector.extract_strided_slice %19 {offsets = [0, 256], sizes = [16, 128], strides = [1, 1]} : vector<16x512xf32> to vector<16x128xf32>
    %37 = math.tanh %36 : vector<16x128xf32>
    %38 = vector.extract_strided_slice %19 {offsets = [0, 384], sizes = [16, 128], strides = [1, 1]} : vector<16x512xf32> to vector<16x128xf32>
    %cst_24 = arith.constant 0.000000e+00 : f32
    %39 = vector.broadcast %cst_24 : f32 to vector<16x128xf32>
    %40 = arith.subf %39, %38 : vector<16x128xf32>
    %41 = math.exp %40 : vector<16x128xf32>
    %cst_25 = arith.constant 1.000000e+00 : f32
    %42 = vector.broadcast %cst_25 : f32 to vector<16x128xf32>
    %43 = arith.addf %42, %41 : vector<16x128xf32>
    %cst_26 = arith.constant 1.000000e+00 : f32
    %44 = vector.broadcast %cst_26 : f32 to vector<16x128xf32>
    %45 = arith.divf %44, %43 : vector<16x128xf32>
    %46 = arith.mulf %35, %13 : vector<16x128xf32>
    %47 = arith.mulf %27, %37 : vector<16x128xf32>
    %48 = arith.addf %46, %47 : vector<16x128xf32>
    %49 = math.tanh %48 : vector<16x128xf32>
    %50 = arith.mulf %45, %49 : vector<16x128xf32>
    %51 = arith.truncf %50 : vector<16x128xf32> to vector<16x128xbf16>
    %52 = arith.index_cast %c0_i32_15 : i32 to index
    %c0_27 = arith.constant 0 : index
    %c0_28 = arith.constant 0 : index
    %53 = vector.load %arg6[%52, %c0_27, %c0_28] : memref<8x16x128xbf16, #tpu.memory_space<vmem>>, vector<1x16x128xbf16>
    %54 = vector.shape_cast %53 : vector<1x16x128xbf16> to vector<16x128xbf16>
    %55 = vector.shape_cast %51 : vector<16x128xbf16> to vector<1x16x128xbf16>
    tpu.vector_store %arg6[%52, %c0_27, %c0_28], %55 {strides = array<i32>} : memref<8x16x128xbf16, #tpu.memory_space<vmem>>, vector<1x16x128xbf16>,
    %c1_i32 = arith.constant 1 : i32
    %c16_i32_29 = arith.constant 16 : i32
    %56 = arith.muli %c1_i32, %c16_i32_29 : i32
    %57 = tpu.assume_multiple %56, 8 : i32
    %58 = arith.index_cast %57 : i32 to index
    %c0_30 = arith.constant 0 : index
    %59 = vector.load %arg7[%58, %c0_30] : memref<128x512xf32, #tpu.memory_space<vmem>>, vector<16x512xf32>
    %cst_31 = arith.constant dense<0.000000e+00> : vector<16x512xf32>
    %60 = tpu.matmul %51, %11, %cst_31 {dimension_numbers = #tpu.dot_dimension_numbers<[1], [0], [0], [1], [0, 0, 1, 1], [], []>} : vector<16x128xbf16>, vector<128x512xbf16>, vector<16x512xf32> -> vector<16x512xf32>
    %61 = arith.addf %59, %60 : vector<16x512xf32>
    %62 = vector.extract_strided_slice %61 {offsets = [0, 0], sizes = [16, 128], strides = [1, 1]} : vector<16x512xf32> to vector<16x128xf32>
    %cst_32 = arith.constant 0.000000e+00 : f32
    %63 = vector.broadcast %cst_32 : f32 to vector<16x128xf32>
    %64 = arith.subf %63, %62 : vector<16x128xf32>
    %65 = math.exp %64 : vector<16x128xf32>
    %cst_33 = arith.constant 1.000000e+00 : f32
    %66 = vector.broadcast %cst_33 : f32 to vector<16x128xf32>
    %67 = arith.addf %66, %65 : vector<16x128xf32>
    %cst_34 = arith.constant 1.000000e+00 : f32
    %68 = vector.broadcast %cst_34 : f32 to vector<16x128xf32>
    %69 = arith.divf %68, %67 : vector<16x128xf32>
    %70 = vector.extract_strided_slice %61 {offsets = [0, 128], sizes = [16, 128], strides = [1, 1]} : vector<16x512xf32> to vector<16x128xf32>
    %cst_35 = arith.constant 0.000000e+00 : f32
    %71 = vector.broadcast %cst_35 : f32 to vector<16x128xf32>
    %72 = arith.subf %71, %70 : vector<16x128xf32>
    %73 = math.exp %72 : vector<16x128xf32>
    %cst_36 = arith.constant 1.000000e+00 : f32
    %74 = vector.broadcast %cst_36 : f32 to vector<16x128xf32>
    %75 = arith.addf %74, %73 : vector<16x128xf32>
    %cst_37 = arith.constant 1.000000e+00 : f32
    %76 = vector.broadcast %cst_37 : f32 to vector<16x128xf32>
    %77 = arith.divf %76, %75 : vector<16x128xf32>
    %78 = vector.extract_strided_slice %61 {offsets = [0, 256], sizes = [16, 128], strides = [1, 1]} : vector<16x512xf32> to vector<16x128xf32>
    %79 = math.tanh %78 : vector<16x128xf32>
    %80 = vector.extract_strided_slice %61 {offsets = [0, 384], sizes = [16, 128], strides = [1, 1]} : vector<16x512xf32> to vector<16x128xf32>
    %cst_38 = arith.constant 0.000000e+00 : f32
    %81 = vector.broadcast %cst_38 : f32 to vector<16x128xf32>
    %82 = arith.subf %81, %80 : vector<16x128xf32>
    %83 = math.exp %82 : vector<16x128xf32>
    %cst_39 = arith.constant 1.000000e+00 : f32
    %84 = vector.broadcast %cst_39 : f32 to vector<16x128xf32>
    %85 = arith.addf %84, %83 : vector<16x128xf32>
    %cst_40 = arith.constant 1.000000e+00 : f32
    %86 = vector.broadcast %cst_40 : f32 to vector<16x128xf32>
    %87 = arith.divf %86, %85 : vector<16x128xf32>
    %88 = arith.mulf %77, %48 : vector<16x128xf32>
    %89 = arith.mulf %69, %79 : vector<16x128xf32>
    %90 = arith.addf %88, %89 : vector<16x128xf32>
    %91 = math.tanh %90 : vector<16x128xf32>
    %92 = arith.mulf %87, %91 : vector<16x128xf32>
    %93 = arith.truncf %92 : vector<16x128xf32> to vector<16x128xbf16>
    %94 = arith.index_cast %c1_i32 : i32 to index
    %c0_41 = arith.constant 0 : index
    %c0_42 = arith.constant 0 : index
    %95 = vector.load %arg6[%94, %c0_41, %c0_42] : memref<8x16x128xbf16, #tpu.memory_space<vmem>>, vector<1x16x128xbf16>
    %96 = vector.shape_cast %95 : vector<1x16x128xbf16> to vector<16x128xbf16>
    %97 = vector.shape_cast %93 : vector<16x128xbf16> to vector<1x16x128xbf16>
    tpu.vector_store %arg6[%94, %c0_41, %c0_42], %97 {strides = array<i32>} : memref<8x16x128xbf16, #tpu.memory_space<vmem>>, vector<1x16x128xbf16>,
    %c2_i32 = arith.constant 2 : i32
    %c16_i32_43 = arith.constant 16 : i32
    %98 = arith.muli %c2_i32, %c16_i32_43 : i32
    %99 = tpu.assume_multiple %98, 8 : i32
    %100 = arith.index_cast %99 : i32 to index
    %c0_44 = arith.constant 0 : index
    %101 = vector.load %arg7[%100, %c0_44] : memref<128x512xf32, #tpu.memory_space<vmem>>, vector<16x512xf32>
    %cst_45 = arith.constant dense<0.000000e+00> : vector<16x512xf32>
    %102 = tpu.matmul %93, %11, %cst_45 {dimension_numbers = #tpu.dot_dimension_numbers<[1], [0], [0], [1], [0, 0, 1, 1], [], []>} : vector<16x128xbf16>, vector<128x512xbf16>, vector<16x512xf32> -> vector<16x512xf32>
    %103 = arith.addf %101, %102 : vector<16x512xf32>
    %104 = vector.extract_strided_slice %103 {offsets = [0, 0], sizes = [16, 128], strides = [1, 1]} : vector<16x512xf32> to vector<16x128xf32>
    %cst_46 = arith.constant 0.000000e+00 : f32
    %105 = vector.broadcast %cst_46 : f32 to vector<16x128xf32>
    %106 = arith.subf %105, %104 : vector<16x128xf32>
    %107 = math.exp %106 : vector<16x128xf32>
    %cst_47 = arith.constant 1.000000e+00 : f32
    %108 = vector.broadcast %cst_47 : f32 to vector<16x128xf32>
    %109 = arith.addf %108, %107 : vector<16x128xf32>
    %cst_48 = arith.constant 1.000000e+00 : f32
    %110 = vector.broadcast %cst_48 : f32 to vector<16x128xf32>
    %111 = arith.divf %110, %109 : vector<16x128xf32>
    %112 = vector.extract_strided_slice %103 {offsets = [0, 128], sizes = [16, 128], strides = [1, 1]} : vector<16x512xf32> to vector<16x128xf32>
    %cst_49 = arith.constant 0.000000e+00 : f32
    %113 = vector.broadcast %cst_49 : f32 to vector<16x128xf32>
    %114 = arith.subf %113, %112 : vector<16x128xf32>
    %115 = math.exp %114 : vector<16x128xf32>
    %cst_50 = arith.constant 1.000000e+00 : f32
    %116 = vector.broadcast %cst_50 : f32 to vector<16x128xf32>
    %117 = arith.addf %116, %115 : vector<16x128xf32>
    %cst_51 = arith.constant 1.000000e+00 : f32
    %118 = vector.broadcast %cst_51 : f32 to vector<16x128xf32>
    %119 = arith.divf %118, %117 : vector<16x128xf32>
    %120 = vector.extract_strided_slice %103 {offsets = [0, 256], sizes = [16, 128], strides = [1, 1]} : vector<16x512xf32> to vector<16x128xf32>
    %121 = math.tanh %120 : vector<16x128xf32>
    %122 = vector.extract_strided_slice %103 {offsets = [0, 384], sizes = [16, 128], strides = [1, 1]} : vector<16x512xf32> to vector<16x128xf32>
    %cst_52 = arith.constant 0.000000e+00 : f32
    %123 = vector.broadcast %cst_52 : f32 to vector<16x128xf32>
    %124 = arith.subf %123, %122 : vector<16x128xf32>
    %125 = math.exp %124 : vector<16x128xf32>
    %cst_53 = arith.constant 1.000000e+00 : f32
    %126 = vector.broadcast %cst_53 : f32 to vector<16x128xf32>
    %127 = arith.addf %126, %125 : vector<16x128xf32>
    %cst_54 = arith.constant 1.000000e+00 : f32
    %128 = vector.broadcast %cst_54 : f32 to vector<16x128xf32>
    %129 = arith.divf %128, %127 : vector<16x128xf32>
    %130 = arith.mulf %119, %90 : vector<16x128xf32>
    %131 = arith.mulf %111, %121 : vector<16x128xf32>
    %132 = arith.addf %130, %131 : vector<16x128xf32>
    %133 = math.tanh %132 : vector<16x128xf32>
    %134 = arith.mulf %129, %133 : vector<16x128xf32>
    %135 = arith.truncf %134 : vector<16x128xf32> to vector<16x128xbf16>
    %136 = arith.index_cast %c2_i32 : i32 to index
    %c0_55 = arith.constant 0 : index
    %c0_56 = arith.constant 0 : index
    %137 = vector.load %arg6[%136, %c0_55, %c0_56] : memref<8x16x128xbf16, #tpu.memory_space<vmem>>, vector<1x16x128xbf16>
    %138 = vector.shape_cast %137 : vector<1x16x128xbf16> to vector<16x128xbf16>
    %139 = vector.shape_cast %135 : vector<16x128xbf16> to vector<1x16x128xbf16>
    tpu.vector_store %arg6[%136, %c0_55, %c0_56], %139 {strides = array<i32>} : memref<8x16x128xbf16, #tpu.memory_space<vmem>>, vector<1x16x128xbf16>,
    %c3_i32 = arith.constant 3 : i32
    %c16_i32_57 = arith.constant 16 : i32
    %140 = arith.muli %c3_i32, %c16_i32_57 : i32
    %141 = tpu.assume_multiple %140, 8 : i32
    %142 = arith.index_cast %141 : i32 to index
    %c0_58 = arith.constant 0 : index
    %143 = vector.load %arg7[%142, %c0_58] : memref<128x512xf32, #tpu.memory_space<vmem>>, vector<16x512xf32>
    %cst_59 = arith.constant dense<0.000000e+00> : vector<16x512xf32>
    %144 = tpu.matmul %135, %11, %cst_59 {dimension_numbers = #tpu.dot_dimension_numbers<[1], [0], [0], [1], [0, 0, 1, 1], [], []>} : vector<16x128xbf16>, vector<128x512xbf16>, vector<16x512xf32> -> vector<16x512xf32>
    %145 = arith.addf %143, %144 : vector<16x512xf32>
    %146 = vector.extract_strided_slice %145 {offsets = [0, 0], sizes = [16, 128], strides = [1, 1]} : vector<16x512xf32> to vector<16x128xf32>
    %cst_60 = arith.constant 0.000000e+00 : f32
    %147 = vector.broadcast %cst_60 : f32 to vector<16x128xf32>
    %148 = arith.subf %147, %146 : vector<16x128xf32>
    %149 = math.exp %148 : vector<16x128xf32>
    %cst_61 = arith.constant 1.000000e+00 : f32
    %150 = vector.broadcast %cst_61 : f32 to vector<16x128xf32>
    %151 = arith.addf %150, %149 : vector<16x128xf32>
    %cst_62 = arith.constant 1.000000e+00 : f32
    %152 = vector.broadcast %cst_62 : f32 to vector<16x128xf32>
    %153 = arith.divf %152, %151 : vector<16x128xf32>
    %154 = vector.extract_strided_slice %145 {offsets = [0, 128], sizes = [16, 128], strides = [1, 1]} : vector<16x512xf32> to vector<16x128xf32>
    %cst_63 = arith.constant 0.000000e+00 : f32
    %155 = vector.broadcast %cst_63 : f32 to vector<16x128xf32>
    %156 = arith.subf %155, %154 : vector<16x128xf32>
    %157 = math.exp %156 : vector<16x128xf32>
    %cst_64 = arith.constant 1.000000e+00 : f32
    %158 = vector.broadcast %cst_64 : f32 to vector<16x128xf32>
    %159 = arith.addf %158, %157 : vector<16x128xf32>
    %cst_65 = arith.constant 1.000000e+00 : f32
    %160 = vector.broadcast %cst_65 : f32 to vector<16x128xf32>
    %161 = arith.divf %160, %159 : vector<16x128xf32>
    %162 = vector.extract_strided_slice %145 {offsets = [0, 256], sizes = [16, 128], strides = [1, 1]} : vector<16x512xf32> to vector<16x128xf32>
    %163 = math.tanh %162 : vector<16x128xf32>
    %164 = vector.extract_strided_slice %145 {offsets = [0, 384], sizes = [16, 128], strides = [1, 1]} : vector<16x512xf32> to vector<16x128xf32>
    %cst_66 = arith.constant 0.000000e+00 : f32
    %165 = vector.broadcast %cst_66 : f32 to vector<16x128xf32>
    %166 = arith.subf %165, %164 : vector<16x128xf32>
    %167 = math.exp %166 : vector<16x128xf32>
    %cst_67 = arith.constant 1.000000e+00 : f32
    %168 = vector.broadcast %cst_67 : f32 to vector<16x128xf32>
    %169 = arith.addf %168, %167 : vector<16x128xf32>
    %cst_68 = arith.constant 1.000000e+00 : f32
    %170 = vector.broadcast %cst_68 : f32 to vector<16x128xf32>
    %171 = arith.divf %170, %169 : vector<16x128xf32>
    %172 = arith.mulf %161, %132 : vector<16x128xf32>
    %173 = arith.mulf %153, %163 : vector<16x128xf32>
    %174 = arith.addf %172, %173 : vector<16x128xf32>
    %175 = math.tanh %174 : vector<16x128xf32>
    %176 = arith.mulf %171, %175 : vector<16x128xf32>
    %177 = arith.truncf %176 : vector<16x128xf32> to vector<16x128xbf16>
    %178 = arith.index_cast %c3_i32 : i32 to index
    %c0_69 = arith.constant 0 : index
    %c0_70 = arith.constant 0 : index
    %179 = vector.load %arg6[%178, %c0_69, %c0_70] : memref<8x16x128xbf16, #tpu.memory_space<vmem>>, vector<1x16x128xbf16>
    %180 = vector.shape_cast %179 : vector<1x16x128xbf16> to vector<16x128xbf16>
    %181 = vector.shape_cast %177 : vector<16x128xbf16> to vector<1x16x128xbf16>
    tpu.vector_store %arg6[%178, %c0_69, %c0_70], %181 {strides = array<i32>} : memref<8x16x128xbf16, #tpu.memory_space<vmem>>, vector<1x16x128xbf16>,
    %c4_i32 = arith.constant 4 : i32
    %c16_i32_71 = arith.constant 16 : i32
    %182 = arith.muli %c4_i32, %c16_i32_71 : i32
    %183 = tpu.assume_multiple %182, 8 : i32
    %184 = arith.index_cast %183 : i32 to index
    %c0_72 = arith.constant 0 : index
    %185 = vector.load %arg7[%184, %c0_72] : memref<128x512xf32, #tpu.memory_space<vmem>>, vector<16x512xf32>
    %cst_73 = arith.constant dense<0.000000e+00> : vector<16x512xf32>
    %186 = tpu.matmul %177, %11, %cst_73 {dimension_numbers = #tpu.dot_dimension_numbers<[1], [0], [0], [1], [0, 0, 1, 1], [], []>} : vector<16x128xbf16>, vector<128x512xbf16>, vector<16x512xf32> -> vector<16x512xf32>
    %187 = arith.addf %185, %186 : vector<16x512xf32>
    %188 = vector.extract_strided_slice %187 {offsets = [0, 0], sizes = [16, 128], strides = [1, 1]} : vector<16x512xf32> to vector<16x128xf32>
    %cst_74 = arith.constant 0.000000e+00 : f32
    %189 = vector.broadcast %cst_74 : f32 to vector<16x128xf32>
    %190 = arith.subf %189, %188 : vector<16x128xf32>
    %191 = math.exp %190 : vector<16x128xf32>
    %cst_75 = arith.constant 1.000000e+00 : f32
    %192 = vector.broadcast %cst_75 : f32 to vector<16x128xf32>
    %193 = arith.addf %192, %191 : vector<16x128xf32>
    %cst_76 = arith.constant 1.000000e+00 : f32
    %194 = vector.broadcast %cst_76 : f32 to vector<16x128xf32>
    %195 = arith.divf %194, %193 : vector<16x128xf32>
    %196 = vector.extract_strided_slice %187 {offsets = [0, 128], sizes = [16, 128], strides = [1, 1]} : vector<16x512xf32> to vector<16x128xf32>
    %cst_77 = arith.constant 0.000000e+00 : f32
    %197 = vector.broadcast %cst_77 : f32 to vector<16x128xf32>
    %198 = arith.subf %197, %196 : vector<16x128xf32>
    %199 = math.exp %198 : vector<16x128xf32>
    %cst_78 = arith.constant 1.000000e+00 : f32
    %200 = vector.broadcast %cst_78 : f32 to vector<16x128xf32>
    %201 = arith.addf %200, %199 : vector<16x128xf32>
    %cst_79 = arith.constant 1.000000e+00 : f32
    %202 = vector.broadcast %cst_79 : f32 to vector<16x128xf32>
    %203 = arith.divf %202, %201 : vector<16x128xf32>
    %204 = vector.extract_strided_slice %187 {offsets = [0, 256], sizes = [16, 128], strides = [1, 1]} : vector<16x512xf32> to vector<16x128xf32>
    %205 = math.tanh %204 : vector<16x128xf32>
    %206 = vector.extract_strided_slice %187 {offsets = [0, 384], sizes = [16, 128], strides = [1, 1]} : vector<16x512xf32> to vector<16x128xf32>
    %cst_80 = arith.constant 0.000000e+00 : f32
    %207 = vector.broadcast %cst_80 : f32 to vector<16x128xf32>
    %208 = arith.subf %207, %206 : vector<16x128xf32>
    %209 = math.exp %208 : vector<16x128xf32>
    %cst_81 = arith.constant 1.000000e+00 : f32
    %210 = vector.broadcast %cst_81 : f32 to vector<16x128xf32>
    %211 = arith.addf %210, %209 : vector<16x128xf32>
    %cst_82 = arith.constant 1.000000e+00 : f32
    %212 = vector.broadcast %cst_82 : f32 to vector<16x128xf32>
    %213 = arith.divf %212, %211 : vector<16x128xf32>
    %214 = arith.mulf %203, %174 : vector<16x128xf32>
    %215 = arith.mulf %195, %205 : vector<16x128xf32>
    %216 = arith.addf %214, %215 : vector<16x128xf32>
    %217 = math.tanh %216 : vector<16x128xf32>
    %218 = arith.mulf %213, %217 : vector<16x128xf32>
    %219 = arith.truncf %218 : vector<16x128xf32> to vector<16x128xbf16>
    %220 = arith.index_cast %c4_i32 : i32 to index
    %c0_83 = arith.constant 0 : index
    %c0_84 = arith.constant 0 : index
    %221 = vector.load %arg6[%220, %c0_83, %c0_84] : memref<8x16x128xbf16, #tpu.memory_space<vmem>>, vector<1x16x128xbf16>
    %222 = vector.shape_cast %221 : vector<1x16x128xbf16> to vector<16x128xbf16>
    %223 = vector.shape_cast %219 : vector<16x128xbf16> to vector<1x16x128xbf16>
    tpu.vector_store %arg6[%220, %c0_83, %c0_84], %223 {strides = array<i32>} : memref<8x16x128xbf16, #tpu.memory_space<vmem>>, vector<1x16x128xbf16>,
    %c5_i32 = arith.constant 5 : i32
    %c16_i32_85 = arith.constant 16 : i32
    %224 = arith.muli %c5_i32, %c16_i32_85 : i32
    %225 = tpu.assume_multiple %224, 8 : i32
    %226 = arith.index_cast %225 : i32 to index
    %c0_86 = arith.constant 0 : index
    %227 = vector.load %arg7[%226, %c0_86] : memref<128x512xf32, #tpu.memory_space<vmem>>, vector<16x512xf32>
    %cst_87 = arith.constant dense<0.000000e+00> : vector<16x512xf32>
    %228 = tpu.matmul %219, %11, %cst_87 {dimension_numbers = #tpu.dot_dimension_numbers<[1], [0], [0], [1], [0, 0, 1, 1], [], []>} : vector<16x128xbf16>, vector<128x512xbf16>, vector<16x512xf32> -> vector<16x512xf32>
    %229 = arith.addf %227, %228 : vector<16x512xf32>
    %230 = vector.extract_strided_slice %229 {offsets = [0, 0], sizes = [16, 128], strides = [1, 1]} : vector<16x512xf32> to vector<16x128xf32>
    %cst_88 = arith.constant 0.000000e+00 : f32
    %231 = vector.broadcast %cst_88 : f32 to vector<16x128xf32>
    %232 = arith.subf %231, %230 : vector<16x128xf32>
    %233 = math.exp %232 : vector<16x128xf32>
    %cst_89 = arith.constant 1.000000e+00 : f32
    %234 = vector.broadcast %cst_89 : f32 to vector<16x128xf32>
    %235 = arith.addf %234, %233 : vector<16x128xf32>
    %cst_90 = arith.constant 1.000000e+00 : f32
    %236 = vector.broadcast %cst_90 : f32 to vector<16x128xf32>
    %237 = arith.divf %236, %235 : vector<16x128xf32>
    %238 = vector.extract_strided_slice %229 {offsets = [0, 128], sizes = [16, 128], strides = [1, 1]} : vector<16x512xf32> to vector<16x128xf32>
    %cst_91 = arith.constant 0.000000e+00 : f32
    %239 = vector.broadcast %cst_91 : f32 to vector<16x128xf32>
    %240 = arith.subf %239, %238 : vector<16x128xf32>
    %241 = math.exp %240 : vector<16x128xf32>
    %cst_92 = arith.constant 1.000000e+00 : f32
    %242 = vector.broadcast %cst_92 : f32 to vector<16x128xf32>
    %243 = arith.addf %242, %241 : vector<16x128xf32>
    %cst_93 = arith.constant 1.000000e+00 : f32
    %244 = vector.broadcast %cst_93 : f32 to vector<16x128xf32>
    %245 = arith.divf %244, %243 : vector<16x128xf32>
    %246 = vector.extract_strided_slice %229 {offsets = [0, 256], sizes = [16, 128], strides = [1, 1]} : vector<16x512xf32> to vector<16x128xf32>
    %247 = math.tanh %246 : vector<16x128xf32>
    %248 = vector.extract_strided_slice %229 {offsets = [0, 384], sizes = [16, 128], strides = [1, 1]} : vector<16x512xf32> to vector<16x128xf32>
    %cst_94 = arith.constant 0.000000e+00 : f32
    %249 = vector.broadcast %cst_94 : f32 to vector<16x128xf32>
    %250 = arith.subf %249, %248 : vector<16x128xf32>
    %251 = math.exp %250 : vector<16x128xf32>
    %cst_95 = arith.constant 1.000000e+00 : f32
    %252 = vector.broadcast %cst_95 : f32 to vector<16x128xf32>
    %253 = arith.addf %252, %251 : vector<16x128xf32>
    %cst_96 = arith.constant 1.000000e+00 : f32
    %254 = vector.broadcast %cst_96 : f32 to vector<16x128xf32>
    %255 = arith.divf %254, %253 : vector<16x128xf32>
    %256 = arith.mulf %245, %216 : vector<16x128xf32>
    %257 = arith.mulf %237, %247 : vector<16x128xf32>
    %258 = arith.addf %256, %257 : vector<16x128xf32>
    %259 = math.tanh %258 : vector<16x128xf32>
    %260 = arith.mulf %255, %259 : vector<16x128xf32>
    %261 = arith.truncf %260 : vector<16x128xf32> to vector<16x128xbf16>
    %262 = arith.index_cast %c5_i32 : i32 to index
    %c0_97 = arith.constant 0 : index
    %c0_98 = arith.constant 0 : index
    %263 = vector.load %arg6[%262, %c0_97, %c0_98] : memref<8x16x128xbf16, #tpu.memory_space<vmem>>, vector<1x16x128xbf16>
    %264 = vector.shape_cast %263 : vector<1x16x128xbf16> to vector<16x128xbf16>
    %265 = vector.shape_cast %261 : vector<16x128xbf16> to vector<1x16x128xbf16>
    tpu.vector_store %arg6[%262, %c0_97, %c0_98], %265 {strides = array<i32>} : memref<8x16x128xbf16, #tpu.memory_space<vmem>>, vector<1x16x128xbf16>,
    %c6_i32 = arith.constant 6 : i32
    %c16_i32_99 = arith.constant 16 : i32
    %266 = arith.muli %c6_i32, %c16_i32_99 : i32
    %267 = tpu.assume_multiple %266, 8 : i32
    %268 = arith.index_cast %267 : i32 to index
    %c0_100 = arith.constant 0 : index
    %269 = vector.load %arg7[%268, %c0_100] : memref<128x512xf32, #tpu.memory_space<vmem>>, vector<16x512xf32>
    %cst_101 = arith.constant dense<0.000000e+00> : vector<16x512xf32>
    %270 = tpu.matmul %261, %11, %cst_101 {dimension_numbers = #tpu.dot_dimension_numbers<[1], [0], [0], [1], [0, 0, 1, 1], [], []>} : vector<16x128xbf16>, vector<128x512xbf16>, vector<16x512xf32> -> vector<16x512xf32>
    %271 = arith.addf %269, %270 : vector<16x512xf32>
    %272 = vector.extract_strided_slice %271 {offsets = [0, 0], sizes = [16, 128], strides = [1, 1]} : vector<16x512xf32> to vector<16x128xf32>
    %cst_102 = arith.constant 0.000000e+00 : f32
    %273 = vector.broadcast %cst_102 : f32 to vector<16x128xf32>
    %274 = arith.subf %273, %272 : vector<16x128xf32>
    %275 = math.exp %274 : vector<16x128xf32>
    %cst_103 = arith.constant 1.000000e+00 : f32
    %276 = vector.broadcast %cst_103 : f32 to vector<16x128xf32>
    %277 = arith.addf %276, %275 : vector<16x128xf32>
    %cst_104 = arith.constant 1.000000e+00 : f32
    %278 = vector.broadcast %cst_104 : f32 to vector<16x128xf32>
    %279 = arith.divf %278, %277 : vector<16x128xf32>
    %280 = vector.extract_strided_slice %271 {offsets = [0, 128], sizes = [16, 128], strides = [1, 1]} : vector<16x512xf32> to vector<16x128xf32>
    %cst_105 = arith.constant 0.000000e+00 : f32
    %281 = vector.broadcast %cst_105 : f32 to vector<16x128xf32>
    %282 = arith.subf %281, %280 : vector<16x128xf32>
    %283 = math.exp %282 : vector<16x128xf32>
    %cst_106 = arith.constant 1.000000e+00 : f32
    %284 = vector.broadcast %cst_106 : f32 to vector<16x128xf32>
    %285 = arith.addf %284, %283 : vector<16x128xf32>
    %cst_107 = arith.constant 1.000000e+00 : f32
    %286 = vector.broadcast %cst_107 : f32 to vector<16x128xf32>
    %287 = arith.divf %286, %285 : vector<16x128xf32>
    %288 = vector.extract_strided_slice %271 {offsets = [0, 256], sizes = [16, 128], strides = [1, 1]} : vector<16x512xf32> to vector<16x128xf32>
    %289 = math.tanh %288 : vector<16x128xf32>
    %290 = vector.extract_strided_slice %271 {offsets = [0, 384], sizes = [16, 128], strides = [1, 1]} : vector<16x512xf32> to vector<16x128xf32>
    %cst_108 = arith.constant 0.000000e+00 : f32
    %291 = vector.broadcast %cst_108 : f32 to vector<16x128xf32>
    %292 = arith.subf %291, %290 : vector<16x128xf32>
    %293 = math.exp %292 : vector<16x128xf32>
    %cst_109 = arith.constant 1.000000e+00 : f32
    %294 = vector.broadcast %cst_109 : f32 to vector<16x128xf32>
    %295 = arith.addf %294, %293 : vector<16x128xf32>
    %cst_110 = arith.constant 1.000000e+00 : f32
    %296 = vector.broadcast %cst_110 : f32 to vector<16x128xf32>
    %297 = arith.divf %296, %295 : vector<16x128xf32>
    %298 = arith.mulf %287, %258 : vector<16x128xf32>
    %299 = arith.mulf %279, %289 : vector<16x128xf32>
    %300 = arith.addf %298, %299 : vector<16x128xf32>
    %301 = math.tanh %300 : vector<16x128xf32>
    %302 = arith.mulf %297, %301 : vector<16x128xf32>
    %303 = arith.truncf %302 : vector<16x128xf32> to vector<16x128xbf16>
    %304 = arith.index_cast %c6_i32 : i32 to index
    %c0_111 = arith.constant 0 : index
    %c0_112 = arith.constant 0 : index
    %305 = vector.load %arg6[%304, %c0_111, %c0_112] : memref<8x16x128xbf16, #tpu.memory_space<vmem>>, vector<1x16x128xbf16>
    %306 = vector.shape_cast %305 : vector<1x16x128xbf16> to vector<16x128xbf16>
    %307 = vector.shape_cast %303 : vector<16x128xbf16> to vector<1x16x128xbf16>
    tpu.vector_store %arg6[%304, %c0_111, %c0_112], %307 {strides = array<i32>} : memref<8x16x128xbf16, #tpu.memory_space<vmem>>, vector<1x16x128xbf16>,
    %c7_i32 = arith.constant 7 : i32
    %c16_i32_113 = arith.constant 16 : i32
    %308 = arith.muli %c7_i32, %c16_i32_113 : i32
    %309 = tpu.assume_multiple %308, 8 : i32
    %310 = arith.index_cast %309 : i32 to index
    %c0_114 = arith.constant 0 : index
    %311 = vector.load %arg7[%310, %c0_114] : memref<128x512xf32, #tpu.memory_space<vmem>>, vector<16x512xf32>
    %cst_115 = arith.constant dense<0.000000e+00> : vector<16x512xf32>
    %312 = tpu.matmul %303, %11, %cst_115 {dimension_numbers = #tpu.dot_dimension_numbers<[1], [0], [0], [1], [0, 0, 1, 1], [], []>} : vector<16x128xbf16>, vector<128x512xbf16>, vector<16x512xf32> -> vector<16x512xf32>
    %313 = arith.addf %311, %312 : vector<16x512xf32>
    %314 = vector.extract_strided_slice %313 {offsets = [0, 0], sizes = [16, 128], strides = [1, 1]} : vector<16x512xf32> to vector<16x128xf32>
    %cst_116 = arith.constant 0.000000e+00 : f32
    %315 = vector.broadcast %cst_116 : f32 to vector<16x128xf32>
    %316 = arith.subf %315, %314 : vector<16x128xf32>
    %317 = math.exp %316 : vector<16x128xf32>
    %cst_117 = arith.constant 1.000000e+00 : f32
    %318 = vector.broadcast %cst_117 : f32 to vector<16x128xf32>
    %319 = arith.addf %318, %317 : vector<16x128xf32>
    %cst_118 = arith.constant 1.000000e+00 : f32
    %320 = vector.broadcast %cst_118 : f32 to vector<16x128xf32>
    %321 = arith.divf %320, %319 : vector<16x128xf32>
    %322 = vector.extract_strided_slice %313 {offsets = [0, 128], sizes = [16, 128], strides = [1, 1]} : vector<16x512xf32> to vector<16x128xf32>
    %cst_119 = arith.constant 0.000000e+00 : f32
    %323 = vector.broadcast %cst_119 : f32 to vector<16x128xf32>
    %324 = arith.subf %323, %322 : vector<16x128xf32>
    %325 = math.exp %324 : vector<16x128xf32>
    %cst_120 = arith.constant 1.000000e+00 : f32
    %326 = vector.broadcast %cst_120 : f32 to vector<16x128xf32>
    %327 = arith.addf %326, %325 : vector<16x128xf32>
    %cst_121 = arith.constant 1.000000e+00 : f32
    %328 = vector.broadcast %cst_121 : f32 to vector<16x128xf32>
    %329 = arith.divf %328, %327 : vector<16x128xf32>
    %330 = vector.extract_strided_slice %313 {offsets = [0, 256], sizes = [16, 128], strides = [1, 1]} : vector<16x512xf32> to vector<16x128xf32>
    %331 = math.tanh %330 : vector<16x128xf32>
    %332 = vector.extract_strided_slice %313 {offsets = [0, 384], sizes = [16, 128], strides = [1, 1]} : vector<16x512xf32> to vector<16x128xf32>
    %cst_122 = arith.constant 0.000000e+00 : f32
    %333 = vector.broadcast %cst_122 : f32 to vector<16x128xf32>
    %334 = arith.subf %333, %332 : vector<16x128xf32>
    %335 = math.exp %334 : vector<16x128xf32>
    %cst_123 = arith.constant 1.000000e+00 : f32
    %336 = vector.broadcast %cst_123 : f32 to vector<16x128xf32>
    %337 = arith.addf %336, %335 : vector<16x128xf32>
    %cst_124 = arith.constant 1.000000e+00 : f32
    %338 = vector.broadcast %cst_124 : f32 to vector<16x128xf32>
    %339 = arith.divf %338, %337 : vector<16x128xf32>
    %340 = arith.mulf %329, %300 : vector<16x128xf32>
    %341 = arith.mulf %321, %331 : vector<16x128xf32>
    %342 = arith.addf %340, %341 : vector<16x128xf32>
    %343 = math.tanh %342 : vector<16x128xf32>
    %344 = arith.mulf %339, %343 : vector<16x128xf32>
    %345 = arith.truncf %344 : vector<16x128xf32> to vector<16x128xbf16>
    %346 = arith.index_cast %c7_i32 : i32 to index
    %c0_125 = arith.constant 0 : index
    %c0_126 = arith.constant 0 : index
    %347 = vector.load %arg6[%346, %c0_125, %c0_126] : memref<8x16x128xbf16, #tpu.memory_space<vmem>>, vector<1x16x128xbf16>
    %348 = vector.shape_cast %347 : vector<1x16x128xbf16> to vector<16x128xbf16>
    %349 = vector.shape_cast %345 : vector<16x128xbf16> to vector<1x16x128xbf16>
    tpu.vector_store %arg6[%346, %c0_125, %c0_126], %349 {strides = array<i32>} : memref<8x16x128xbf16, #tpu.memory_space<vmem>>, vector<1x16x128xbf16>,
    %c8_i32 = arith.constant 8 : i32
    %c0_127 = arith.constant 0 : index
    %c0_128 = arith.constant 0 : index
    %350 = vector.load %arg8[%c0_127, %c0_128] : memref<16x128xbf16, #tpu.memory_space<vmem>>, vector<16x128xbf16>
    tpu.vector_store %arg8[%c0_127, %c0_128], %345 {strides = array<i32>} : memref<16x128xbf16, #tpu.memory_space<vmem>>, vector<16x128xbf16>,
    %c0_129 = arith.constant 0 : index
    %c0_130 = arith.constant 0 : index
    %351 = vector.load %arg9[%c0_129, %c0_130] : memref<16x128xf32, #tpu.memory_space<vmem>>, vector<16x128xf32>
    tpu.vector_store %arg9[%c0_129, %c0_130], %342 {strides = array<i32>} : memref<16x128xf32, #tpu.memory_space<vmem>>, vector<16x128xf32>,
    return
  }
  func.func @transform_0(%arg0: i32, %arg1: i32) -> (i32, i32, i32) {
    %c0_i32 = arith.constant 0 : i32
    %c0_i32_0 = arith.constant 0 : i32
    return %arg1, %arg0, %c0_i32 : i32, i32, i32
  }
  func.func @transform_1(%arg0: i32, %arg1: i32) -> (i32, i32) {
    %c0_i32 = arith.constant 0 : i32
    %c0_i32_0 = arith.constant 0 : i32
    %c0_i32_1 = arith.constant 0 : i32
    return %c0_i32, %c0_i32_0 : i32, i32
  }
  func.func @transform_2(%arg0: i32, %arg1: i32) -> (i32, i32) {
    %c0_i32 = arith.constant 0 : i32
    %c0_i32_0 = arith.constant 0 : i32
    %c0_i32_1 = arith.constant 0 : i32
    return %c0_i32, %c0_i32_0 : i32, i32
  }
  func.func @transform_3(%arg0: i32, %arg1: i32) -> (i32, i32) {
    %c0_i32 = arith.constant 0 : i32
    %c0_i32_0 = arith.constant 0 : i32
    %c0_i32_1 = arith.constant 0 : i32
    return %c0_i32, %c0_i32_0 : i32, i32
  }
  func.func @transform_4(%arg0: i32, %arg1: i32) -> (i32, i32, i32) {
    %c0_i32 = arith.constant 0 : i32
    %c0_i32_0 = arith.constant 0 : i32
    return %arg1, %arg0, %c0_i32 : i32, i32, i32
  }
}

</mosaic_0001>

<bundles_post_ra>
// kernel: tpu_custom_call.1
= control target key start
LH: loop header
LB: loop body
LE: loop exit
PB: predicated region body
PF: predicated region fallthrough
CT: control target
= control target key end

     0   :  { %7 = vsyncpa [#allocation3], 0  ;;  %s649_s0 = inlined_call_operand.hbm [shape: f32[16,128], index: 0, kind: input, shape index: {}]   ;;  %s650_s1 = inlined_call_operand.hbm [shape: f32[8,128], index: 1, kind: input, shape index: {}]   ;;  %s651_s2 = inlined_call_operand.hbm [shape: f32[16,128], index: 2, kind: output, shape index: {}]  }
   0x1   :  { %9 = vsyncpa [#allocation3 + $0x1], 0 }
   0x2   :  { %10 = vsyncpa [#allocation6], 0 }
   0x3   :  { %11 = vsyncpa [#allocation4], 0 }
   0x4   :  { %13 = vsyncpa [#allocation4 + $0x1], 0  ;;  %s483_s9 = smov 0   ;;  %s485_s10 = smov 0  }
   0x5   :  { %s487_s11 = smov 0   ;;  %s489_s12 = smov 0  }
   0x6 LB: > { %s504_s13 = sadd.s32 4294967295, %s463_s12   ;;  %s270_s14 = sadd.s32 4294967294, %s463_s12   ;;  %s463_s12 = sphi %s489_s12, %s674_s12   ;;  %s459_s11 = sphi %s487_s11, %s673_s11   ;;  %s455_s10 = sphi %s485_s10, %s672_s10   ;;  %s451_s9 = sphi %s483_s9, %s671_s9  }
   0x7   : > { %p39_p0 = scmp.ne.s32.totalorder %s455_s10, %s451_s9  ;;  %p652_p1 = scmp.eq.s32.totalorder %s504_s13, 0 }
   0x8   : > { %p90_p3 = scmp.eq.s32.totalorder %s270_s14, 1  ;;  %p271_p5 = scmp.ge.s32.totalorder %s463_s12, 1 }
   0x9   : > { %p513_p4 = por %p652_p1, %p39_p0  ;;  %p97_p7 = scmp.lt.s32.totalorder %s463_s12, 3 }
   0xa   : > { %p518_p6 = por %p90_p3, %p39_p0  ;;  %s465_s18 = smov [#allocation5]  }
   0xb   : > { %s656_s15 = scalar_select %p513_p4, 1, 0 }
   0xc   : > { %s657_s16 = scalar_select %p518_p6, 1, 0 }
   0xd   : > { %p523_p8 = pnand %p271_p5, %p97_p7  ;;  %s110_s19 = sshll.u32 %s465_s18, 4  ;;  %s111_s19 = int_to_ptr.vmem [resolvable:$true] %s110_s19 }
   0xe   : > { %s531_s20 = sadd.s32 1, %s463_s12   ;;  %s26_s24 = sadd.s32 1, %s459_s11 }
   0xf   : > { %s658_s17 = scalar_select %p523_p8, 1, 0 }
  0x10   : > { %p292_p10 = pneg %p523_p8  ;;  %s23_s22 = ssub.s32 %s463_s12, %s531_s20 }
  0x11   : > { %p541_p12 = scmp.eq.s32.totalorder %s23_s22, 0  ;;  %p33_p13 = scmp.ne.s32.totalorder %s459_s11, %s455_s10 }
  0x12   : > { %p535_p11 = pnand %p292_p10, %p652_p1  ;;  %s352_s25 = scalar_lea.vmem %s111_s19, 128 }
  0x13   : > { %p353_p3 = scmp.ne.s32.totalorder %s111_s19, %s352_s25  ;;  %p360_p9 = scmp.lt.s32.totalorder %s111_s19, %s111_s19 }
  0x14   : > { %p343_p0 = pneg %p535_p11  ;;  %p361_p2 = scmp.lt.s32.totalorder %s352_s25, %s352_s25 }
  0x16   : > { %p355_p5 = pnand %p353_p3, %p343_p0  ;;  %p362_p10 = por %p361_p2, %p360_p9 }
  0x18   : > { %p356_p7 = pneg %p355_p5 }
  0x1a   : > { %p363_p1 = pnand %p362_p10, %p356_p7 }
  0x1c   : > { %366 = shalt.err (!%p363_p1)
}
  0x1d   : > { %295 = dma.hbm_to_vmem [thread:$0]  (!%p535_p11), %s650_s1, 128, %s111_s19, [#allocation6]  }
  0x1e   : > { %s558_s28 = scalar_select %p541_p12, %s459_s11, %s26_s24  }
  0x1f   : > { %p34_p1 = scmp.eq.s32.totalorder %s463_s12, 0  ;;  %p661_p2 = scmp.eq.s32.totalorder %s504_s13, 1 }
  0x20   : > { %p305_p0 = scmp.lt.s32.totalorder %s463_s12, 2  ;;  %s121_s30 = sand.u32 1, %s459_s11  }
  0x21   : > { %p566_p9 = por %p661_p2, %p33_p13  ;;  %p35_p3 = por %p34_p1, %p33_p13 }
  0x22   : > { %s274_s3 = sshll.u32 %s121_s30, 3  ;;  %s275_s4 = sshll.u32 %s463_s12, 7 }
  0x23   : > { %s662_s29 = scalar_select %p566_p9, 1, 0 }
  0x24   : > { %s579_s7 = scalar_lea.hbm %s649_s0, %s275_s4  ;;  %s125_s8 = scalar_lea.vmem [#allocation2], %s274_s3 }
  0x25   : > { %s132_s14 = sshll.u32 %s125_s8, 4  ;;  %p581_p11 = pnand %p305_p0, %p35_p3  ;;  %s133_s14 = int_to_ptr.vmem [resolvable:$true] %s132_s14 }
  0x26   : > { %s122_s19 = scalar_lea.sflag [#allocation3], %s121_s30  ;;  %s367_s21 = scalar_lea.hbm %s579_s7, 128 }
  0x27   : > { %p368_p12 = scmp.ne.s32.totalorder %s579_s7, %s367_s21  ;;  %p369_p13 = pneg %p581_p11 }
  0x28   : > { %s372_s24 = scalar_lea.hbm %s649_s0, 256  ;;  %p373_p10 = scmp.lt.s32.totalorder %s579_s7, %s649_s0 }
  0x29   : > { %p370_p5 = pnand %p369_p13, %p368_p12  ;;  %p374_p1 = scmp.lt.s32.totalorder %s372_s24, %s367_s21 }
  0x2b   : > { %p371_p7 = pneg %p370_p5  ;;  %p375_p2 = por %p374_p1, %p373_p10 }
  0x2d   : > { %p376_p0 = pnand %p375_p2, %p371_p7 }
  0x2f   : > { %379 = shalt.err (!%p376_p0)
}
  0x30   : > { %s380_s27 = scalar_lea.vmem %s133_s14, 128  ;;  %s466_s30 = smov [#allocation2]  }
  0x31   : > { %p381_p3 = scmp.ne.s32.totalorder %s133_s14, %s380_s27  ;;  %s385_s3 = sshll.u32 %s466_s30, 4  ;;  %s386_s3 = int_to_ptr.vmem [resolvable:$false] %s385_s3 }
  0x32   : > { %s387_s4 = scalar_lea.vmem %s386_s3, 256  ;;  %p388_p12 = scmp.lt.s32.totalorder %s133_s14, %s386_s3 }
  0x33   : > { %p383_p6 = pnand %p381_p3, %p369_p13  ;;  %p389_p5 = scmp.lt.s32.totalorder %s387_s4, %s380_s27 }
  0x35   : > { %p384_p9 = pneg %p383_p6  ;;  %p390_p4 = por %p389_p5, %p388_p12 }
  0x37   : > { %p391_p8 = pnand %p390_p4, %p384_p9 }
  0x39   : > { %394 = shalt.err (!%p391_p8)
}
  0x3a   : > { %299 = dma.hbm_to_vmem [thread:$0]  (!%p581_p11), %s579_s7, 128, %s133_s14, %s122_s19  }
  0x3b   : > { %p664_p7 = scmp.ne.s32.totalorder %s658_s17, 0 }
  0x3c   : > { %s602_s5 = sand.u32 (!%p664_p7), 1, %s455_s10   ;;  %p665_p6 = scmp.ne.s32.totalorder (!%p664_p7), %s656_s15, 0 }
  0x3d   : > { %141 = sbr.rel (%p664_p7) target bundleno = 95 (0x5f), region = 28  ;;  %s277_s6 = sshll.u32 (!%p664_p7), %s602_s5, 3 }
  0x3e   : > { %s144_s8 = scalar_lea.sflag (!%p664_p7), [#allocation3], %s602_s5  ;;  %s147_s21 = scalar_lea.vmem (!%p664_p7), [#allocation2], %s277_s6 }
  0x42   : > { %438 = dma.done.wait (%p665_p6), %s144_s8, 128  }
  0x43   : > { %440 = vsyncadd (%p665_p6), %s144_s8, 4294967168  ;;  %p666_p4 = scmp.eq.s32.totalorder %s504_s13, 0 }
  0x45   : > { %442 = dma.done.wait (%p666_p4), [#allocation6], 128   ;;  %p667_p8 = pmov %p666_p4 }
  0x46   : > { %s171_s17 = scalar_lea.vmem [#allocation7], %s277_s6  ;;  %s281_s14 = sshll.u32 %s504_s13, 7  ;;  %v172_v0 = vld [vmem:[%s147_s21] sm:$0xff]  ;;  %v173_v1 = vld [vmem:[#allocation5] sm:$0xff] }
  0x47   : > { %444 = vsyncadd (%p667_p8), [#allocation6], 4294967168  ;;  %s190_s7 = sshll.u32 %s171_s17, 4  ;;  %v174_v2 = vadd.f32 %v173_v1, %v172_v0  ;;  %s188_s15 = scalar_lea.hbm %s651_s2, %s281_s14  ;;  %s191_s7 = int_to_ptr.vmem [resolvable:$true] %s190_s7 }
  0x48   : > { %s177_s22 = scalar_lea.sflag [#allocation4], %s602_s5  ;;  %s395_s23 = scalar_lea.vmem %s191_s7, 128 }
  0x49   : > { %175 = vst [vmem:[%s171_s17] sm:$0xff] %v174_v2  ;;  %p396_p9 = scmp.ne.s32.totalorder %s191_s7, %s395_s23  ;;  %p668_p11 = scmp.ne.s32.totalorder %s662_s29, 0 }
  0x4a   : > { %s467_s24 = smov [#allocation7]  }
  0x4b   : > { %p397_p13 = pnand %p396_p9, %p668_p11  ;;  %s399_s25 = sshll.u32 %s467_s24, 4  ;;  %s400_s25 = int_to_ptr.vmem [resolvable:$false] %s399_s25 }
  0x4c   : > { %s401_s26 = scalar_lea.vmem %s400_s25, 256  ;;  %p402_p1 = scmp.lt.s32.totalorder %s191_s7, %s400_s25 }
  0x4d   : > { %p398_p10 = pneg %p397_p13  ;;  %p403_p2 = scmp.lt.s32.totalorder %s401_s26, %s395_s23 }
  0x4f   : > { %p404_p0 = por %p403_p2, %p402_p1 }
  0x51   : > { %p405_p3 = pnand %p404_p0, %p398_p10 }
  0x53   : > { %408 = shalt.err (!%p405_p3)
}
  0x54   : > { %s409_s13 = scalar_lea.hbm %s188_s15, 128  ;;  %s413_s3 = scalar_lea.hbm %s651_s2, 256 }
  0x55   : > { %p410_p12 = scmp.ne.s32.totalorder %s188_s15, %s409_s13  ;;  %p414_p6 = scmp.lt.s32.totalorder %s188_s15, %s651_s2 }
  0x56   : > { %p415_p4 = scmp.lt.s32.totalorder %s413_s3, %s409_s13 }
  0x57   : > { %p411_p5 = pnand %p410_p12, %p668_p11 }
  0x58   : > { %p416_p8 = por %p415_p4, %p414_p6 }
  0x59   : > { %p412_p7 = pneg %p411_p5 }
  0x5b   : > { %p417_p9 = pnand %p416_p8, %p412_p7 }
  0x5d   : > { %420 = shalt.err (!%p417_p9)
}
  0x5e   : > { %290 = dma.vmem_to_hbm [thread:$0]  (%p668_p11), %s191_s7, 128, %s188_s15, %s177_s22  }
  0x5f PF: > { %s202_s6 = sand.u32 1, %s451_s9   ;;  %p669_p13 = scmp.ne.s32.totalorder %s657_s16, 0 }
  0x60   : > { %p670_p10 = scmp.ge.s32.totalorder %s463_s12, 2  ;;  %s203_s8 = scalar_lea.sflag [#allocation4], %s202_s6 }
  0x62   : > { %p301_p1 = pnand %p670_p10, %p669_p13 }
  0x64   : > { %p302_p2 = pneg %p301_p1 }
  0x66   : > { %446 = dma.done.wait (%p302_p2), %s203_s8, 128  }
  0x67   : > { %448 = vsyncadd (%p302_p2), %s203_s8, 4294967168  ;;  %p16_p0 = scmp.ge.s32.totalorder %s531_s20, 4   ;;  %s671_s9 = smov %s455_s10 }
  0x68   : > { %s672_s10 = smov %s459_s11  ;;  %s673_s11 = smov %s558_s28 }
  0x69   : > { %s674_s12 = smov %s531_s20  ;;  %18 = sbr.rel (!%p16_p0) target bundleno = 6 (0x6), region = 77 }
  0x6e   :  { %208 = vsyncpa [#allocation3], 1 }
  0x6f   :  { %210 = vsyncpa [#allocation3 + $0x1], 1 }
  0x70   :  { %211 = vsyncpa [#allocation6], 1 }
  0x71   :  { %212 = vsyncpa [#allocation4], 1 }
  0x72   :  { %214 = vsyncpa [#allocation4 + $0x1], 1 }

// kernel: lstm_model_pallas.5
= control target key start
LH: loop header
LB: loop body
LE: loop exit
PB: predicated region body
PF: predicated region fallthrough
CT: control target
= control target key end

     0   :  { %s483_s1 = inlined_call_operand.vmem [shape: bf16[128,128], index: 1, kind: input, shape index: {}]   ;;  %s484_s0 = inlined_call_operand.vmem [shape: bf16[128,128], index: 0, kind: input, shape index: {}]   ;;  %s485_s2 = inlined_call_operand.vmem [shape: f32[1,128], index: 2, kind: input, shape index: {}]   ;;  %s486_s3 = inlined_call_operand.vmem [shape: f32[128,128], index: 3, kind: output, shape index: {}]  }
   0x1   :  { %v348_v0 = vld [vmem:[%s483_s1 + $0x38] sm:$0xff]   ;;  %v349_v1 = vld [vmem:[%s483_s1 + $0x30] sm:$0xff]   ;;  %v350_v2 = vld [vmem:[%s483_s1 + $0x28] sm:$0xff]  }
   0x2   :  { %300 = vmatprep.subr.bf16.mxu0 %v348_v0  ;;  %332 = vmatprep.subr.bf16.mxu1 %v348_v0  ;;  %v351_v3 = vld [vmem:[%s483_s1 + $0x20] sm:$0xff]   ;;  %v352_v6 = vld [vmem:[%s483_s1 + $0x18] sm:$0xff]   ;;  %v353_v7 = vld [vmem:[%s483_s1 + $0x10] sm:$0xff]  }
   0x3   :  { %301 = vmatpush3.bf16.msra.mxu0 %v348_v0  ;;  %340 = vmatpush3.bf16.msra.mxu1 %v348_v0  ;;  %v356_v4 = vld [vmem:[%s484_s0] sm:$0xff]   ;;  %v354_v8 = vld [vmem:[%s483_s1 + $0x8] sm:$0xff]   ;;  %v360_v12 = vld [vmem:[%s484_s0 + $0x10] sm:$0xff]  }
   0x4   :  { %302 = vmatprep.subr.bf16.mxu0 %v349_v1  ;;  %333 = vmatprep.subr.bf16.mxu1 %v349_v1  ;;  %v357_v5 = vld [vmem:[%s484_s0 + $0x20] sm:$0xff]   ;;  %v358_v10 = vld [vmem:[%s484_s0 + $0x8] sm:$0xff]   ;;  %v361_v13 = vld [vmem:[%s484_s0 + $0x30] sm:$0xff]  }
   0x5   :  { %316 = vmatprep.mubr.bf16.mxu0 %v356_v4  ;;  %324 = vmatprep.mubr.bf16.mxu1 %v357_v5  ;;  %v355_v9 = vld [vmem:[%s483_s1] sm:$0xff]   ;;  %v359_v11 = vld [vmem:[%s484_s0 + $0x28] sm:$0xff]   ;;  %v362_v14 = vld [vmem:[%s484_s0 + $0x18] sm:$0xff]  }
   0x6   :  { %v363_v15 = vld [vmem:[%s484_s0 + $0x38] sm:$0xff]   ;;  %v267_v16 = vld [vmem:[%s485_s2] ss:$0 sm:$0xff] }
   0x7   :  { %303 = vmatpush3.bf16.msra.mxu0 %v349_v1  ;;  %341 = vmatpush3.bf16.msra.mxu1 %v349_v1 }
   0x8   :  { %304 = vmatprep.subr.bf16.mxu0 %v350_v2  ;;  %334 = vmatprep.subr.bf16.mxu1 %v350_v2 }
   0xb   :  { %305 = vmatpush3.bf16.msra.mxu0 %v350_v2  ;;  %342 = vmatpush3.bf16.msra.mxu1 %v350_v2 }
   0xc   :  { %306 = vmatprep.subr.bf16.mxu0 %v351_v3  ;;  %335 = vmatprep.subr.bf16.mxu1 %v351_v3 }
   0xf   :  { %307 = vmatpush3.bf16.msra.mxu0 %v351_v3  ;;  %343 = vmatpush3.bf16.msra.mxu1 %v351_v3 }
  0x10   :  { %308 = vmatprep.subr.bf16.mxu0 %v352_v6  ;;  %336 = vmatprep.subr.bf16.mxu1 %v352_v6 }
  0x13   :  { %309 = vmatpush3.bf16.msra.mxu0 %v352_v6  ;;  %344 = vmatpush3.bf16.msra.mxu1 %v352_v6 }
  0x14   :  { %310 = vmatprep.subr.bf16.mxu0 %v353_v7  ;;  %337 = vmatprep.subr.bf16.mxu1 %v353_v7 }
  0x17   :  { %311 = vmatpush3.bf16.msra.mxu0 %v353_v7  ;;  %345 = vmatpush3.bf16.msra.mxu1 %v353_v7 }
  0x18   :  { %312 = vmatprep.subr.bf16.mxu0 %v354_v8  ;;  %338 = vmatprep.subr.bf16.mxu1 %v354_v8 }
  0x1b   :  { %313 = vmatpush3.bf16.msra.mxu0 %v354_v8  ;;  %346 = vmatpush3.bf16.msra.mxu1 %v354_v8 }
  0x1c   :  { %314 = vmatprep.subr.bf16.mxu0 %v355_v9  ;;  %339 = vmatprep.subr.bf16.mxu1 %v355_v9 }
  0x1f   :  { %315 = vmatpush3.bf16.msra.mxu0 %v355_v9  ;;  %347 = vmatpush3.bf16.msra.mxu1 %v355_v9 }
  0x22   :  { %317 = vmatmul.mubr.bf16.vlgmr.msra.gmra.mxu0 %v358_v10  ;;  %325 = vmatmul.mubr.bf16.vlgmr.msra.gmra.mxu1 %v359_v11 }
  0x23   :  { %320 = vmatprep.mubr.bf16.mxu0 %v360_v12  ;;  %328 = vmatprep.mubr.bf16.mxu1 %v361_v13 }
  0x2a   :  { %321 = vmatmul.mubr.bf16.gmra.mxu0 %v362_v14  ;;  %329 = vmatmul.mubr.bf16.gmra.mxu1 %v363_v15 }
  0xe2   :  { %v318_v17 = vpop.f32.mrf.mxu0  ;;  %v326_v18 = vpop.f32.mrf.mxu1 }
  0xe3   :  { %v193_v19 = vadd.f32 %v318_v17, %v267_v16  ;;  %v225_v20 = vadd.f32 %v326_v18, %v267_v16 }
  0xe4   :  { %v184_v21 = vpop.f32.mrf.mxu0  ;;  %v216_v22 = vpop.f32.mrf.mxu1 }
  0xe5   :  { %249 = vst [vmem:[%s486_s3 + $0x10] sm:$0xff] %v193_v19  ;;  %257 = vst [vmem:[%s486_s3 + $0x50] sm:$0xff] %v225_v20  ;;  %v185_v23 = vadd.f32 %v267_v16, %v184_v21  ;;  %v217_v24 = vadd.f32 %v267_v16, %v216_v22 }
  0xe6   :  { %v319_v25 = vpop.f32.mrf.mxu0  ;;  %v327_v26 = vpop.f32.mrf.mxu1 }
  0xe7   :  { %247 = vst [vmem:[%s486_s3] sm:$0xff] %v185_v23  ;;  %255 = vst [vmem:[%s486_s3 + $0x40] sm:$0xff] %v217_v24  ;;  %v196_v27 = vadd.f32 %v319_v25, %v267_v16  ;;  %v228_v28 = vadd.f32 %v327_v26, %v267_v16 }
  0xe8   :  { %v187_v29 = vpop.f32.mrf.mxu0  ;;  %v219_v30 = vpop.f32.mrf.mxu1 }
  0xe9   :  { %250 = vst [vmem:[%s486_s3 + $0x18] sm:$0xff] %v196_v27  ;;  %258 = vst [vmem:[%s486_s3 + $0x58] sm:$0xff] %v228_v28  ;;  %v188_v31 = vadd.f32 %v267_v16, %v187_v29  ;;  %v220_v32 = vadd.f32 %v267_v16, %v219_v30 }
  0xea   :  { %v322_v33 = vpop.f32.mrf.mxu0  ;;  %v330_v34 = vpop.f32.mrf.mxu1 }
  0xeb   :  { %248 = vst [vmem:[%s486_s3 + $0x8] sm:$0xff] %v188_v31  ;;  %256 = vst [vmem:[%s486_s3 + $0x48] sm:$0xff] %v220_v32  ;;  %v209_v35 = vadd.f32 %v322_v33, %v267_v16  ;;  %v241_v36 = vadd.f32 %v330_v34, %v267_v16 }
  0xec   :  { %v200_v37 = vpop.f32.mrf.mxu0  ;;  %v232_v38 = vpop.f32.mrf.mxu1 }
  0xed   :  { %253 = vst [vmem:[%s486_s3 + $0x30] sm:$0xff] %v209_v35  ;;  %261 = vst [vmem:[%s486_s3 + $0x70] sm:$0xff] %v241_v36  ;;  %v201_v39 = vadd.f32 %v267_v16, %v200_v37  ;;  %v233_v40 = vadd.f32 %v267_v16, %v232_v38 }
  0xee   :  { %v323_v41 = vpop.f32.mrf.mxu0  ;;  %v331_v42 = vpop.f32.mrf.mxu1 }
  0xef   :  { %251 = vst [vmem:[%s486_s3 + $0x20] sm:$0xff] %v201_v39  ;;  %259 = vst [vmem:[%s486_s3 + $0x60] sm:$0xff] %v233_v40  ;;  %v212_v43 = vadd.f32 %v323_v41, %v267_v16  ;;  %v244_v44 = vadd.f32 %v331_v42, %v267_v16 }
  0xf0   :  { %v203_v45 = vpop.f32.mrf.mxu0  ;;  %v235_v46 = vpop.f32.mrf.mxu1 }
  0xf1   :  { %254 = vst [vmem:[%s486_s3 + $0x38] sm:$0xff] %v212_v43  ;;  %262 = vst [vmem:[%s486_s3 + $0x78] sm:$0xff] %v244_v44  ;;  %v204_v47 = vadd.f32 %v267_v16, %v203_v45  ;;  %v236_v48 = vadd.f32 %v267_v16, %v235_v46 }
  0xf3   :  { %252 = vst [vmem:[%s486_s3 + $0x28] sm:$0xff] %v204_v47  ;;  %260 = vst [vmem:[%s486_s3 + $0x68] sm:$0xff] %v236_v48 }

// kernel: lstm_model_pallas.4
= control target key start
LH: loop header
LB: loop body
LE: loop exit
PB: predicated region body
PF: predicated region fallthrough
CT: control target
= control target key end

     0   :  { %v3795_v1 = vmov 0   ;;  %s3790_s1 = inlined_call_operand.vmem [shape: bf16[128,512], index: 1, kind: input, shape index: {}]   ;;  %s3791_s0 = inlined_call_operand.vmem [shape: bf16[8,16,128], index: 0, kind: input, shape index: {}]   ;;  %s3792_s2 = inlined_call_operand.vmem [shape: bf16[128,512], index: 2, kind: input, shape index: {}]   ;;  %s3793_s3 = inlined_call_operand.vmem [shape: f32[1,512], index: 3, kind: input, shape index: {}]   ;;  %s3794_s4 = inlined_call_operand.vmem [shape: bf16[8,16,128], index: 4, kind: output, shape index: {}]  }
   0x1   :  { %v2294_v0 = vld [vmem:[%s3790_s1 + $0xe4] ss:$16 sps:$4 sm:$0xff]   ;;  %336 = vmatprep.mubr.bf16.mxu0 %v3795_v1  ;;  %22 = vst [vmem:[#allocation3] sm:$0xf] %v3795_v1  ;;  %23 = vst [vmem:[#allocation3 + $0x4] sm:$0xf] %v3795_v1  ;;  %449 = vmatprep.mubr.bf16.mxu1 %v3795_v1 }
   0x2   :  { %v2296_v2 = vld [vmem:[%s3790_s1 + $0xec] ss:$16 sps:$4 sm:$0xff]   ;;  %304 = vmatprep.subr.bf16.mxu0 %v2294_v0  ;;  %v2298_v3 = vld [vmem:[%s3790_s1 + $0xe0] ss:$16 sps:$4 sm:$0xff]   ;;  %v2299_v4 = vld [vmem:[%s3790_s1 + $0xe8] ss:$16 sps:$4 sm:$0xff]  }
   0x3   :  { %417 = vmatprep.subr.bf16.mxu1 %v2296_v2  ;;  %v2300_v5 = vld [vmem:[%s3790_s1 + $0xc4] ss:$16 sps:$4 sm:$0xff]   ;;  %305 = vmatpush1.bf16.msra.mxu0 %v2298_v3  ;;  %v2302_v6 = vld [vmem:[%s3790_s1 + $0xcc] ss:$16 sps:$4 sm:$0xff]   ;;  %v2304_v7 = vld [vmem:[%s3790_s1 + $0xc0] ss:$16 sps:$4 sm:$0xff]  }
   0x4   :  { %418 = vmatpush1.bf16.msra.mxu1 %v2299_v4  ;;  %306 = vmatprep.subr.bf16.mxu0 %v2300_v5  ;;  %v2305_v8 = vld [vmem:[%s3790_s1 + $0xc8] ss:$16 sps:$4 sm:$0xff]   ;;  %v2306_v9 = vld [vmem:[%s3790_s1 + $0xa4] ss:$16 sps:$4 sm:$0xff]   ;;  %v2308_v10 = vld [vmem:[%s3790_s1 + $0xac] ss:$16 sps:$4 sm:$0xff]  }
   0x5   :  { %419 = vmatprep.subr.bf16.mxu1 %v2302_v6  ;;  %v2310_v11 = vld [vmem:[%s3790_s1 + $0xa0] ss:$16 sps:$4 sm:$0xff]   ;;  %v2311_v12 = vld [vmem:[%s3790_s1 + $0xa8] ss:$16 sps:$4 sm:$0xff]   ;;  %v2312_v13 = vld [vmem:[%s3790_s1 + $0x84] ss:$16 sps:$4 sm:$0xff]  }
   0x6   :  { %v2314_v14 = vld [vmem:[%s3790_s1 + $0x8c] ss:$16 sps:$4 sm:$0xff]   ;;  %v2316_v15 = vld [vmem:[%s3790_s1 + $0x80] ss:$16 sps:$4 sm:$0xff]   ;;  %v2317_v16 = vld [vmem:[%s3790_s1 + $0x88] ss:$16 sps:$4 sm:$0xff]  }
   0x7   :  { %307 = vmatpush1.bf16.msra.mxu0 %v2304_v7  ;;  %v2318_v17 = vld [vmem:[%s3790_s1 + $0x64] ss:$16 sps:$4 sm:$0xff]   ;;  %v2320_v18 = vld [vmem:[%s3790_s1 + $0x6c] ss:$16 sps:$4 sm:$0xff]   ;;  %v2322_v19 = vld [vmem:[%s3790_s1 + $0x60] ss:$16 sps:$4 sm:$0xff]  }
   0x8   :  { %420 = vmatpush1.bf16.msra.mxu1 %v2305_v8  ;;  %308 = vmatprep.subr.bf16.mxu0 %v2306_v9  ;;  %v2323_v20 = vld [vmem:[%s3790_s1 + $0x68] ss:$16 sps:$4 sm:$0xff]   ;;  %v2324_v21 = vld [vmem:[%s3790_s1 + $0x44] ss:$16 sps:$4 sm:$0xff]   ;;  %v2326_v22 = vld [vmem:[%s3790_s1 + $0x4c] ss:$16 sps:$4 sm:$0xff]  }
   0x9   :  { %421 = vmatprep.subr.bf16.mxu1 %v2308_v10  ;;  %v2328_v23 = vld [vmem:[%s3790_s1 + $0x40] ss:$16 sps:$4 sm:$0xff]   ;;  %v2329_v24 = vld [vmem:[%s3790_s1 + $0x48] ss:$16 sps:$4 sm:$0xff]   ;;  %v2330_v25 = vld [vmem:[%s3790_s1 + $0x24] ss:$16 sps:$4 sm:$0xff]  }
   0xa   :  { %v2332_v26 = vld [vmem:[%s3790_s1 + $0x2c] ss:$16 sps:$4 sm:$0xff]   ;;  %v2334_v27 = vld [vmem:[%s3790_s1 + $0x20] ss:$16 sps:$4 sm:$0xff]   ;;  %v2335_v28 = vld [vmem:[%s3790_s1 + $0x28] ss:$16 sps:$4 sm:$0xff]  }
   0xb   :  { %309 = vmatpush1.bf16.msra.mxu0 %v2310_v11  ;;  %v2336_v29 = vld [vmem:[%s3790_s1 + $0x4] ss:$16 sps:$4 sm:$0xff]   ;;  %v2338_v30 = vld [vmem:[%s3790_s1 + $0xc] ss:$16 sps:$4 sm:$0xff]   ;;  %v2340_v31 = vld [vmem:[%s3790_s1] ss:$16 sps:$4 sm:$0xff]   ;;  %v76_v11 = vlaneseq }
   0xc   :  { %422 = vmatpush1.bf16.msra.mxu1 %v2311_v12  ;;  %310 = vmatprep.subr.bf16.mxu0 %v2312_v13  ;;  %v2341_v32 = vld [vmem:[%s3790_s1 + $0x8] ss:$16 sps:$4 sm:$0xff]   ;;  %v2816_v33 = vld [vmem:[%s3792_s2 + $0xe4] ss:$16 sps:$4 sm:$0xff]   ;;  %v2821_v34 = vld [vmem:[%s3792_s2 + $0xec] ss:$16 sps:$4 sm:$0xff]  }
   0xd   :  { %423 = vmatprep.subr.bf16.mxu1 %v2314_v14  ;;  %v2342_v35 = vld [vmem:[%s3791_s0] sm:$0xff]   ;;  %v2841_v38 = vld [vmem:[%s3792_s2 + $0xe8] ss:$16 sps:$4 sm:$0xff]   ;;  %v2846_v39 = vld [vmem:[%s3792_s2 + $0xcc] ss:$16 sps:$4 sm:$0xff]   ;;  %v77_v12 = vshrl.u32 %v76_v11, 7 }
   0xe   :  { %v2829_v36 = vld [vmem:[%s3792_s2 + $0xe0] ss:$16 sps:$4 sm:$0xff]   ;;  %v2835_v37 = vld [vmem:[%s3792_s2 + $0xc4] ss:$16 sps:$4 sm:$0xff]   ;;  %v2866_v42 = vld [vmem:[%s3792_s2 + $0xc8] ss:$16 sps:$4 sm:$0xff]  }
   0xf   :  { %311 = vmatpush1.bf16.msra.mxu0 %v2316_v15  ;;  %v2853_v40 = vld [vmem:[%s3792_s2 + $0xc0] ss:$16 sps:$4 sm:$0xff]   ;;  %v2860_v41 = vld [vmem:[%s3792_s2 + $0xa4] ss:$16 sps:$4 sm:$0xff]   ;;  %v2346_v43 = vld [vmem:[%s3791_s0 + $0x8] sm:$0xff]  }
  0x10   :  { %424 = vmatpush1.bf16.msra.mxu1 %v2317_v16  ;;  %312 = vmatprep.subr.bf16.mxu0 %v2318_v17  ;;  %v2876_v44 = vld [vmem:[%s3792_s2 + $0xa0] ss:$16 sps:$4 sm:$0xff]   ;;  %v2881_v45 = vld [vmem:[%s3792_s2 + $0x84] ss:$16 sps:$4 sm:$0xff]   ;;  %v2887_v46 = vld [vmem:[%s3792_s2 + $0xac] ss:$16 sps:$4 sm:$0xff]  }
  0x11   :  { %425 = vmatprep.subr.bf16.mxu1 %v2320_v18  ;;  %v2893_v47 = vld [vmem:[%s3792_s2 + $0xa8] ss:$16 sps:$4 sm:$0xff]   ;;  %v2898_v48 = vld [vmem:[%s3792_s2 + $0x8c] ss:$16 sps:$4 sm:$0xff]   ;;  %v2906_v49 = vld [vmem:[%s3792_s2 + $0x80] ss:$16 sps:$4 sm:$0xff]  }
  0x12   :  { %v2911_v50 = vld [vmem:[%s3792_s2 + $0x64] ss:$16 sps:$4 sm:$0xff]   ;;  %v2919_v51 = vld [vmem:[%s3792_s2 + $0x88] ss:$16 sps:$4 sm:$0xff]   ;;  %v2928_v53 = vld [vmem:[%s3792_s2 + $0x60] ss:$16 sps:$4 sm:$0xff]  }
  0x13   :  { %313 = vmatpush1.bf16.msra.mxu0 %v2322_v19  ;;  %v2350_v52 = vld [vmem:[%s3791_s0 + $0x10] sm:$0xff]   ;;  %v2934_v54 = vld [vmem:[%s3792_s2 + $0x6c] ss:$16 sps:$4 sm:$0xff]   ;;  %v2946_v56 = vld [vmem:[%s3792_s2 + $0x68] ss:$16 sps:$4 sm:$0xff]   ;;  %v78_v17 = vsub.s32 0, %v77_v12 }
  0x14   :  { %426 = vmatpush1.bf16.msra.mxu1 %v2323_v20  ;;  %314 = vmatprep.subr.bf16.mxu0 %v2324_v21  ;;  %v2940_v55 = vld [vmem:[%s3792_s2 + $0x44] ss:$16 sps:$4 sm:$0xff]   ;;  %v2951_v57 = vld [vmem:[%s3792_s2 + $0x4c] ss:$16 sps:$4 sm:$0xff]   ;;  %v2959_v58 = vld [vmem:[%s3792_s2 + $0x40] ss:$16 sps:$4 sm:$0xff]  }
  0x15   :  { %427 = vmatprep.subr.bf16.mxu1 %v2326_v22  ;;  %v2966_v59 = vld [vmem:[%s3792_s2 + $0x24] ss:$16 sps:$4 sm:$0xff]   ;;  %v2972_v60 = vld [vmem:[%s3792_s2 + $0x48] ss:$16 sps:$4 sm:$0xff]   ;;  %v2982_v62 = vld [vmem:[%s3792_s2 + $0x20] ss:$16 sps:$4 sm:$0xff]  }
  0x16   :  { %v2357_v61 = vld [vmem:[%s3791_s0 + $0x18] sm:$0xff]   ;;  %v2994_v0 = vld [vmem:[%s3792_s2 + $0x4] ss:$16 sps:$4 sm:$0xff]   ;;  %v3013_v4 = vld [vmem:[%s3792_s2] ss:$16 sps:$4 sm:$0xff]   ;;  %v86_v18 = vsub.s32 2, %v77_v12 }
  0x17   :  { %315 = vmatpush1.bf16.msra.mxu0 %v2328_v23  ;;  %v2987_v63 = vld [vmem:[%s3792_s2 + $0x2c] ss:$16 sps:$4 sm:$0xff]   ;;  %v2999_v2 = vld [vmem:[%s3792_s2 + $0x28] ss:$16 sps:$4 sm:$0xff]   ;;  %v2364_v6 = vld [vmem:[%s3791_s0 + $0x20] sm:$0xff]   ;;  %v82_v22 = vsub.s32 1, %v77_v12 }
  0x18   :  { %428 = vmatpush1.bf16.msra.mxu1 %v2329_v24  ;;  %316 = vmatprep.subr.bf16.mxu0 %v2330_v25  ;;  %v3004_v3 = vld [vmem:[%s3792_s2 + $0xc] ss:$16 sps:$4 sm:$0xff]   ;;  %v3020_v5 = vld [vmem:[%s3792_s2 + $0x8] ss:$16 sps:$4 sm:$0xff]   ;;  %v2378_v8 = vld [vmem:[%s3791_s0 + $0x30] sm:$0xff]   ;;  %v90_v23 = vsub.s32 3, %v77_v12 }
  0x19   :  { %429 = vmatprep.subr.bf16.mxu1 %v2332_v26  ;;  %v2371_v7 = vld [vmem:[%s3791_s0 + $0x28] sm:$0xff]   ;;  %v2388_v9 = vld [vmem:[%s3791_s0 + $0x38] sm:$0xff]   ;;  %v2398_v10 = vld [vmem:[#allocation3] sm:$0xff]  }
  0x1a   :  { %v74_v19 = vld [vmem:[%s3793_s3] sm:$0xf] }
  0x1b   :  { %317 = vmatpush1.bf16.msra.mxu0 %v2334_v27  ;;  %v3100_v26 = vrot.slane %v74_v19, %v78_v17  ;;  %v3102_v27 = vrot.slane %v74_v19, %v86_v18 }
  0x1c   :  { %430 = vmatpush1.bf16.msra.mxu1 %v2335_v28  ;;  %318 = vmatprep.subr.bf16.mxu0 %v2336_v29 }
  0x1d   :  { %431 = vmatprep.subr.bf16.mxu1 %v2338_v30  ;;  %v3104_v30 = vrot.slane %v74_v19, %v82_v22 }
  0x1f   :  { %319 = vmatpush1.bf16.msra.mxu0 %v2340_v31  ;;  %v3106_v31 = vrot.slane %v74_v19, %v90_v23 }
  0x20   :  { %432 = vmatpush1.bf16.msra.mxu1 %v2341_v32  ;;  %807 = vmatprep.subr.bf16.mxu0 %v2816_v33 }
  0x21   :  { %850 = vmatprep.subr.bf16.mxu1 %v2821_v34 }
  0x22   :  { %337 = vmatmul.mubr.bf16.vlgmr.msra.gmra.mxu0 %v2342_v35 }
  0x23   :  { %450 = vmatmul.mubr.bf16.vlgmr.msra.gmra.mxu1 %v2342_v35  ;;  %808 = vmatpush1.bf16.msra.mxu0 %v2829_v36 }
  0x24   :  { %346 = vmatprep.mubr.bf16.mxu0 %v3795_v1  ;;  %459 = vmatprep.mubr.bf16.mxu1 %v3795_v1 }
  0x25   :  { %809 = vmatprep.subr.bf16.mxu0 %v2835_v37  ;;  %851 = vmatpush1.bf16.msra.mxu1 %v2841_v38 }
  0x26   :  { %852 = vmatprep.subr.bf16.mxu1 %v2846_v39 }
  0x27   :  { %810 = vmatpush1.bf16.msra.mxu0 %v2853_v40 }
  0x28   :  { %811 = vmatprep.subr.bf16.mxu0 %v2860_v41 }
  0x29   :  { %853 = vmatpush1.bf16.msra.mxu1 %v2866_v42 }
  0x2a   :  { %347 = vmatmul.mubr.bf16.gmra.mxu0 %v2346_v43  ;;  %854 = vmatprep.subr.bf16.mxu1 %v2887_v46 }
  0x2b   :  { %460 = vmatmul.mubr.bf16.gmra.mxu1 %v2346_v43  ;;  %356 = vmatprep.mubr.bf16.mxu0 %v3795_v1 }
  0x2c   :  { %469 = vmatprep.mubr.bf16.mxu1 %v3795_v1  ;;  %812 = vmatpush1.bf16.msra.mxu0 %v2876_v44 }
  0x2d   :  { %813 = vmatprep.subr.bf16.mxu0 %v2881_v45  ;;  %855 = vmatpush1.bf16.msra.mxu1 %v2893_v47 }
  0x2e   :  { %856 = vmatprep.subr.bf16.mxu1 %v2898_v48 }
  0x30   :  { %814 = vmatpush1.bf16.msra.mxu0 %v2906_v49 }
  0x31   :  { %815 = vmatprep.subr.bf16.mxu0 %v2911_v50  ;;  %857 = vmatpush1.bf16.msra.mxu1 %v2919_v51 }
  0x32   :  { %357 = vmatmul.mubr.bf16.gmra.mxu0 %v2350_v52  ;;  %858 = vmatprep.subr.bf16.mxu1 %v2934_v54 }
  0x33   :  { %470 = vmatmul.mubr.bf16.gmra.mxu1 %v2350_v52  ;;  %366 = vmatprep.mubr.bf16.mxu0 %v3795_v1 }
  0x34   :  { %479 = vmatprep.mubr.bf16.mxu1 %v3795_v1  ;;  %816 = vmatpush1.bf16.msra.mxu0 %v2928_v53 }
  0x35   :  { %817 = vmatprep.subr.bf16.mxu0 %v2940_v55  ;;  %859 = vmatpush1.bf16.msra.mxu1 %v2946_v56 }
  0x36   :  { %860 = vmatprep.subr.bf16.mxu1 %v2951_v57 }
  0x38   :  { %818 = vmatpush1.bf16.msra.mxu0 %v2959_v58 }
  0x39   :  { %819 = vmatprep.subr.bf16.mxu0 %v2966_v59  ;;  %861 = vmatpush1.bf16.msra.mxu1 %v2972_v60 }
  0x3a   :  { %367 = vmatmul.mubr.bf16.gmra.mxu0 %v2357_v61  ;;  %862 = vmatprep.subr.bf16.mxu1 %v2987_v63 }
  0x3b   :  { %480 = vmatmul.mubr.bf16.gmra.mxu1 %v2357_v61  ;;  %376 = vmatprep.mubr.bf16.mxu0 %v3795_v1 }
  0x3c   :  { %489 = vmatprep.mubr.bf16.mxu1 %v3795_v1  ;;  %820 = vmatpush1.bf16.msra.mxu0 %v2982_v62 }
  0x3d   :  { %821 = vmatprep.subr.bf16.mxu0 %v2994_v0  ;;  %863 = vmatpush1.bf16.msra.mxu1 %v2999_v2 }
  0x3e   :  { %864 = vmatprep.subr.bf16.mxu1 %v3004_v3 }
  0x40   :  { %822 = vmatpush1.bf16.msra.mxu0 %v3013_v4 }
  0x41   :  { %865 = vmatpush1.bf16.msra.mxu1 %v3020_v5  ;;  %970 = vmatprep.subr.bf16.mxu0 %v2816_v33 }
  0x42   :  { %377 = vmatmul.mubr.bf16.gmra.mxu0 %v2364_v6  ;;  %1013 = vmatprep.subr.bf16.mxu1 %v2821_v34 }
  0x43   :  { %490 = vmatmul.mubr.bf16.gmra.mxu1 %v2364_v6  ;;  %386 = vmatprep.mubr.bf16.mxu0 %v3795_v1 }
  0x44   :  { %499 = vmatprep.mubr.bf16.mxu1 %v3795_v1 }
  0x4a   :  { %387 = vmatmul.mubr.bf16.gmra.mxu0 %v2371_v7 }
  0x4b   :  { %500 = vmatmul.mubr.bf16.gmra.mxu1 %v2371_v7  ;;  %396 = vmatprep.mubr.bf16.mxu0 %v3795_v1 }
  0x4c   :  { %509 = vmatprep.mubr.bf16.mxu1 %v3795_v1 }
  0x52   :  { %397 = vmatmul.mubr.bf16.gmra.mxu0 %v2378_v8 }
  0x53   :  { %510 = vmatmul.mubr.bf16.gmra.mxu1 %v2378_v8  ;;  %406 = vmatprep.mubr.bf16.mxu0 %v3795_v1 }
  0x54   :  { %519 = vmatprep.mubr.bf16.mxu1 %v3795_v1 }
  0x5a   :  { %407 = vmatmul.mubr.bf16.gmra.mxu0 %v2388_v9 }
  0x5b   :  { %520 = vmatmul.mubr.bf16.gmra.mxu1 %v2388_v9  ;;  %839 = vmatprep.mubr.bf16.mxu0 %v3795_v1 }
  0x5c   :  { %882 = vmatprep.mubr.bf16.mxu1 %v3795_v1 }
  0x62   :  { %840 = vmatmul.mubr.bf16.vlgmr.msra.gmra.mxu0 %v2398_v10 }
  0x63   :  { %883 = vmatmul.mubr.bf16.vlgmr.msra.gmra.mxu1 %v2398_v10  ;;  %971 = vmatpush1.bf16.msra.mxu0 %v2829_v36 }
  0x64   :  { %1014 = vmatpush1.bf16.msra.mxu1 %v2841_v38  ;;  %972 = vmatprep.subr.bf16.mxu0 %v2835_v37 }
  0x65   :  { %1015 = vmatprep.subr.bf16.mxu1 %v2846_v39  ;;  %1002 = vmatprep.mubr.bf16.mxu0 %v3795_v1 }
  0x66   :  { %1045 = vmatprep.mubr.bf16.mxu1 %v3795_v1 }
  0x67   :  { %973 = vmatpush1.bf16.msra.mxu0 %v2853_v40 }
  0x68   :  { %1016 = vmatpush1.bf16.msra.mxu1 %v2866_v42  ;;  %974 = vmatprep.subr.bf16.mxu0 %v2860_v41 }
  0x69   :  { %1017 = vmatprep.subr.bf16.mxu1 %v2887_v46 }
  0x6b   :  { %975 = vmatpush1.bf16.msra.mxu0 %v2876_v44 }
  0x6c   :  { %1018 = vmatpush1.bf16.msra.mxu1 %v2893_v47  ;;  %976 = vmatprep.subr.bf16.mxu0 %v2881_v45 }
  0x6d   :  { %1019 = vmatprep.subr.bf16.mxu1 %v2898_v48 }
  0x6f   :  { %977 = vmatpush1.bf16.msra.mxu0 %v2906_v49 }
  0x70   :  { %1020 = vmatpush1.bf16.msra.mxu1 %v2919_v51  ;;  %978 = vmatprep.subr.bf16.mxu0 %v2911_v50 }
  0x71   :  { %1021 = vmatprep.subr.bf16.mxu1 %v2934_v54 }
  0x73   :  { %979 = vmatpush1.bf16.msra.mxu0 %v2928_v53 }
  0x74   :  { %1022 = vmatpush1.bf16.msra.mxu1 %v2946_v56  ;;  %980 = vmatprep.subr.bf16.mxu0 %v2940_v55 }
  0x75   :  { %1023 = vmatprep.subr.bf16.mxu1 %v2951_v57 }
  0x77   :  { %981 = vmatpush1.bf16.msra.mxu0 %v2959_v58 }
  0x78   :  { %1024 = vmatpush1.bf16.msra.mxu1 %v2972_v60  ;;  %982 = vmatprep.subr.bf16.mxu0 %v2966_v59 }
  0x79   :  { %1025 = vmatprep.subr.bf16.mxu1 %v2987_v63 }
  0x7b   :  { %983 = vmatpush1.bf16.msra.mxu0 %v2982_v62 }
  0x7c   :  { %1026 = vmatpush1.bf16.msra.mxu1 %v2999_v2  ;;  %984 = vmatprep.subr.bf16.mxu0 %v2994_v0 }
  0x7d   :  { %1027 = vmatprep.subr.bf16.mxu1 %v3004_v3 }
  0x7f   :  { %985 = vmatpush1.bf16.msra.mxu0 %v3013_v4 }
  0x80   :  { %1028 = vmatpush1.bf16.msra.mxu1 %v3020_v5  ;;  %1134 = vmatprep.subr.bf16.mxu0 %v2816_v33 }
  0x81   :  { %1177 = vmatprep.subr.bf16.mxu1 %v2821_v34 }
  0xe2   :  { %v3081_v13 = vpop.f32.mrf.mxu0 }
  0xe3   :  { %v3083_v14 = vpop.f32.mrf.mxu1 }
  0xe4   :  { %v3085_v15 = vpop.f32.mrf.mxu0 }
  0xe5   :  { %v3087_v16 = vpop.f32.mrf.mxu1 }
  0xe6   :  { %v3092_v20 = vpop.f32.mrf.mxu0 }
  0xe7   :  { %v3094_v21 = vpop.f32.mrf.mxu1 }
  0xe8   :  { %v3096_v24 = vpop.f32.mrf.mxu0 }
  0xe9   :  { %v3098_v25 = vpop.f32.mrf.mxu1 }
  0xea   :  { %v348_v28 = vpop.f32.mrf.mxu0 }
  0xeb   :  { %v461_v29 = vpop.f32.mrf.mxu1  ;;  %v3109_v32 = vadd.f32 %v348_v28, %v3100_v26 }
  0xec   :  { %v3112_v35 = vadd.f32 %v461_v29, %v3102_v27  ;;  %v350_v43 = vpop.f32.mrf.mxu0 }
  0xed   :  { %v463_v52 = vpop.f32.mrf.mxu1  ;;  %v3115_v61 = vadd.f32 %v350_v43, %v3104_v30 }
  0xee   :  { %3797 = vst [vmem:[#allocation5_spill] sm:$0xff] %v3112_v35  ;;  %v3118_v6 = vadd.f32 %v463_v52, %v3106_v31  ;;  %v352_v7 = vpop.f32.mrf.mxu0 }
  0xef   :  { %v465_v8 = vpop.f32.mrf.mxu1  ;;  %v3121_v9 = vadd.f32 %v352_v7, %v3100_v26 }
  0xf0   :  { %3798 = vst [vmem:[#allocation6_spill] sm:$0xff] %v3118_v6  ;;  %v3124_v10 = vadd.f32 %v465_v8, %v3102_v27  ;;  %v354_v11 = vpop.f32.mrf.mxu0 }
  0xf1   :  { %v467_v12 = vpop.f32.mrf.mxu1  ;;  %v3127_v17 = vadd.f32 %v354_v11, %v3104_v30 }
  0xf2   :  { %3799 = vst [vmem:[#allocation7_spill] sm:$0xff] %v3124_v10  ;;  %v3130_v18 = vadd.f32 %v467_v12, %v3106_v31  ;;  %v358_v19 = vpop.f32.mrf.mxu0 }
  0xf3   :  { %3800 = vst [vmem:[#allocation8_spill] sm:$0xff] %v3127_v17  ;;  %v471_v22 = vpop.f32.mrf.mxu1  ;;  %v3133_v23 = vadd.f32 %v358_v19, %v3100_v26 }
  0xf4   :  { %3801 = vst [vmem:[#allocation9_spill] sm:$0xff] %v3130_v18  ;;  %v3136_v28 = vadd.f32 %v471_v22, %v3102_v27  ;;  %v360_v29 = vpop.f32.mrf.mxu0 }
  0xf5   :  { %3802 = vst [vmem:[#allocation10_spill] sm:$0xff] %v3133_v23  ;;  %v473_v43 = vpop.f32.mrf.mxu1  ;;  %v3139_v52 = vadd.f32 %v360_v29, %v3104_v30 }
  0xf6   :  { %3803 = vst [vmem:[#allocation11_spill] sm:$0xff] %v3136_v28  ;;  %v3142_v7 = vadd.f32 %v473_v43, %v3106_v31  ;;  %v362_v8 = vpop.f32.mrf.mxu0 }
  0xf7   :  { %3804 = vst [vmem:[#allocation12_spill] sm:$0xff] %v3139_v52  ;;  %v475_v11 = vpop.f32.mrf.mxu1  ;;  %v3145_v12 = vadd.f32 %v362_v8, %v3100_v26 }
  0xf8   :  { %3805 = vst [vmem:[#allocation13_spill] sm:$0xff] %v3142_v7  ;;  %v3148_v1 = vadd.f32 %v475_v11, %v3102_v27  ;;  %v364_v19 = vpop.f32.mrf.mxu0 }
  0xf9   :  { %3806 = vst [vmem:[#allocation14_spill] sm:$0xff] %v3145_v12  ;;  %v477_v23 = vpop.f32.mrf.mxu1  ;;  %v3151_v22 = vadd.f32 %v364_v19, %v3104_v30 }
  0xfa   :  { %3807 = vst [vmem:[#allocation15_spill] sm:$0xff] %v3148_v1  ;;  %v3154_v28 = vadd.f32 %v477_v23, %v3106_v31  ;;  %v368_v29 = vpop.f32.mrf.mxu0 }
  0xfb   :  { %3808 = vst [vmem:[#allocation16_spill] sm:$0xff] %v3151_v22  ;;  %v481_v52 = vpop.f32.mrf.mxu1  ;;  %v3157_v43 = vadd.f32 %v368_v29, %v3100_v26 }
  0xfc   :  { %3809 = vst [vmem:[#allocation17_spill] sm:$0xff] %v3154_v28  ;;  %v3160_v7 = vadd.f32 %v481_v52, %v3102_v27  ;;  %v370_v8 = vpop.f32.mrf.mxu0 }
  0xfd   :  { %3810 = vst [vmem:[#allocation18_spill] sm:$0xff] %v3157_v43  ;;  %v483_v12 = vpop.f32.mrf.mxu1  ;;  %v3163_v11 = vadd.f32 %v370_v8, %v3104_v30 }
  0xfe   :  { %3811 = vst [vmem:[#allocation19_spill] sm:$0xff] %v3160_v7  ;;  %v3166_v1 = vadd.f32 %v483_v12, %v3106_v31  ;;  %v372_v19 = vpop.f32.mrf.mxu0 }
  0xff   :  { %3812 = vst [vmem:[#allocation20_spill] sm:$0xff] %v3163_v11  ;;  %v485_v22 = vpop.f32.mrf.mxu1  ;;  %v3169_v23 = vadd.f32 %v372_v19, %v3100_v26 }
 0x100   :  { %3813 = vst [vmem:[#allocation21_spill] sm:$0xff] %v3166_v1  ;;  %v3172_v28 = vadd.f32 %v485_v22, %v3102_v27  ;;  %v374_v29 = vpop.f32.mrf.mxu0 }
 0x101   :  { %3814 = vst [vmem:[#allocation22_spill] sm:$0xff] %v3169_v23  ;;  %v487_v43 = vpop.f32.mrf.mxu1  ;;  %v3175_v52 = vadd.f32 %v374_v29, %v3104_v30 }
 0x102   :  { %3815 = vst [vmem:[#allocation23_spill] sm:$0xff] %v3172_v28  ;;  %v3178_v7 = vadd.f32 %v487_v43, %v3106_v31  ;;  %v378_v8 = vpop.f32.mrf.mxu0 }
 0x103   :  { %3816 = vst [vmem:[#allocation24_spill] sm:$0xff] %v3175_v52  ;;  %v491_v11 = vpop.f32.mrf.mxu1  ;;  %v3181_v12 = vadd.f32 %v378_v8, %v3100_v26 }
 0x104   :  { %3817 = vst [vmem:[#allocation25_spill] sm:$0xff] %v3178_v7  ;;  %v3184_v1 = vadd.f32 %v491_v11, %v3102_v27  ;;  %v380_v19 = vpop.f32.mrf.mxu0 }
 0x105   :  { %3818 = vst [vmem:[#allocation26_spill] sm:$0xff] %v3181_v12  ;;  %v493_v23 = vpop.f32.mrf.mxu1  ;;  %v3187_v22 = vadd.f32 %v380_v19, %v3104_v30 }
 0x106   :  { %3819 = vst [vmem:[#allocation27_spill] sm:$0xff] %v3184_v1  ;;  %v3190_v28 = vadd.f32 %v493_v23, %v3106_v31  ;;  %v382_v29 = vpop.f32.mrf.mxu0 }
 0x107   :  { %3820 = vst [vmem:[#allocation28_spill] sm:$0xff] %v3187_v22  ;;  %v495_v52 = vpop.f32.mrf.mxu1  ;;  %v3193_v43 = vadd.f32 %v382_v29, %v3100_v26 }
 0x108   :  { %3821 = vst [vmem:[#allocation29_spill] sm:$0xff] %v3190_v28  ;;  %v3196_v7 = vadd.f32 %v495_v52, %v3102_v27  ;;  %v384_v8 = vpop.f32.mrf.mxu0 }
 0x109   :  { %3822 = vst [vmem:[#allocation30_spill] sm:$0xff] %v3193_v43  ;;  %v497_v12 = vpop.f32.mrf.mxu1  ;;  %v3199_v11 = vadd.f32 %v384_v8, %v3104_v30 }
 0x10a   :  { %3823 = vst [vmem:[#allocation31_spill] sm:$0xff] %v3196_v7  ;;  %v3202_v1 = vadd.f32 %v497_v12, %v3106_v31  ;;  %v388_v19 = vpop.f32.mrf.mxu0 }
 0x10b   :  { %3824 = vst [vmem:[#allocation32_spill] sm:$0xff] %v3199_v11  ;;  %v501_v22 = vpop.f32.mrf.mxu1  ;;  %v3205_v23 = vadd.f32 %v388_v19, %v3100_v26 }
 0x10c   :  { %3825 = vst [vmem:[#allocation33_spill] sm:$0xff] %v3202_v1  ;;  %v3208_v28 = vadd.f32 %v501_v22, %v3102_v27  ;;  %v390_v29 = vpop.f32.mrf.mxu0 }
 0x10d   :  { %3826 = vst [vmem:[#allocation34_spill] sm:$0xff] %v3205_v23  ;;  %v503_v43 = vpop.f32.mrf.mxu1  ;;  %v3211_v52 = vadd.f32 %v390_v29, %v3104_v30 }
 0x10e   :  { %3827 = vst [vmem:[#allocation35_spill] sm:$0xff] %v3208_v28  ;;  %v3214_v7 = vadd.f32 %v503_v43, %v3106_v31  ;;  %v392_v8 = vpop.f32.mrf.mxu0 }
 0x10f   :  { %3828 = vst [vmem:[#allocation36_spill] sm:$0xff] %v3211_v52  ;;  %v505_v11 = vpop.f32.mrf.mxu1  ;;  %v3217_v12 = vadd.f32 %v392_v8, %v3100_v26 }
 0x110   :  { %3829 = vst [vmem:[#allocation37_spill] sm:$0xff] %v3214_v7  ;;  %v3220_v1 = vadd.f32 %v505_v11, %v3102_v27  ;;  %v394_v19 = vpop.f32.mrf.mxu0 }
 0x111   :  { %3830 = vst [vmem:[#allocation38_spill] sm:$0xff] %v3217_v12  ;;  %v507_v23 = vpop.f32.mrf.mxu1  ;;  %v3223_v22 = vadd.f32 %v394_v19, %v3104_v30 }
 0x112   :  { %3831 = vst [vmem:[#allocation39_spill] sm:$0xff] %v3220_v1  ;;  %v3226_v28 = vadd.f32 %v507_v23, %v3106_v31  ;;  %v398_v29 = vpop.f32.mrf.mxu0 }
 0x113   :  { %3832 = vst [vmem:[#allocation40_spill] sm:$0xff] %v3223_v22  ;;  %v511_v52 = vpop.f32.mrf.mxu1  ;;  %v3229_v43 = vadd.f32 %v398_v29, %v3100_v26 }
 0x114   :  { %3833 = vst [vmem:[#allocation41_spill] sm:$0xff] %v3226_v28  ;;  %v3232_v7 = vadd.f32 %v511_v52, %v3102_v27  ;;  %v400_v8 = vpop.f32.mrf.mxu0 }
 0x115   :  { %3834 = vst [vmem:[#allocation42_spill] sm:$0xff] %v3229_v43  ;;  %v513_v12 = vpop.f32.mrf.mxu1  ;;  %v3235_v11 = vadd.f32 %v400_v8, %v3104_v30 }
 0x116   :  { %3835 = vst [vmem:[#allocation43_spill] sm:$0xff] %v3232_v7  ;;  %v3238_v1 = vadd.f32 %v513_v12, %v3106_v31  ;;  %v402_v19 = vpop.f32.mrf.mxu0 }
 0x117   :  { %3836 = vst [vmem:[#allocation44_spill] sm:$0xff] %v3235_v11  ;;  %v515_v22 = vpop.f32.mrf.mxu1  ;;  %v3241_v23 = vadd.f32 %v402_v19, %v3100_v26 }
 0x118   :  { %3837 = vst [vmem:[#allocation45_spill] sm:$0xff] %v3238_v1  ;;  %v3244_v28 = vadd.f32 %v515_v22, %v3102_v27  ;;  %v404_v29 = vpop.f32.mrf.mxu0 }
 0x119   :  { %3838 = vst [vmem:[#allocation46_spill] sm:$0xff] %v3241_v23  ;;  %v517_v43 = vpop.f32.mrf.mxu1  ;;  %v3247_v52 = vadd.f32 %v404_v29, %v3104_v30 }
 0x11a   :  { %3839 = vst [vmem:[#allocation47_spill] sm:$0xff] %v3244_v28  ;;  %v3250_v7 = vadd.f32 %v517_v43, %v3106_v31  ;;  %v408_v8 = vpop.f32.mrf.mxu0 }
 0x11b   :  { %3840 = vst [vmem:[#allocation48_spill] sm:$0xff] %v3247_v52  ;;  %v521_v11 = vpop.f32.mrf.mxu1  ;;  %v3253_v12 = vadd.f32 %v408_v8, %v3100_v26 }
 0x11c   :  { %3841 = vst [vmem:[#allocation49_spill] sm:$0xff] %v3250_v7  ;;  %v3256_v1 = vadd.f32 %v521_v11, %v3102_v27  ;;  %v410_v19 = vpop.f32.mrf.mxu0  ;;  %v339_v11 = vadd.f32 %v3081_v13, %v3100_v26 }
 0x11d   :  { %3842 = vst [vmem:[#allocation50_spill] sm:$0xff] %v3253_v12  ;;  %v523_v23 = vpop.f32.mrf.mxu1  ;;  %v3259_v22 = vadd.f32 %v410_v19, %v3104_v30 }
 0x11e   :  { %3843 = vst [vmem:[#allocation51_spill] sm:$0xff] %v3256_v1  ;;  %v3262_v28 = vadd.f32 %v523_v23, %v3106_v31  ;;  %v412_v29 = vpop.f32.mrf.mxu0 }
 0x11f   :  { %3844 = vst [vmem:[#allocation52_spill] sm:$0xff] %v3259_v22  ;;  %v525_v52 = vpop.f32.mrf.mxu1  ;;  %v3265_v43 = vadd.f32 %v412_v29, %v3100_v26  ;;  %v341_v29 = vadd.f32 %v3085_v15, %v3104_v30 }
 0x120   :  { %3845 = vst [vmem:[#allocation53_spill] sm:$0xff] %v3262_v28  ;;  %v3268_v7 = vadd.f32 %v525_v52, %v3102_v27  ;;  %v414_v8 = vpop.f32.mrf.mxu0  ;;  %v343_v52 = vadd.f32 %v3092_v20, %v3100_v26  ;;  %v454_v20 = vadd.f32 %v3087_v16, %v3106_v31 }
 0x121   :  { %3846 = vst [vmem:[#allocation54_spill] sm:$0xff] %v3265_v43  ;;  %v527_v12 = vpop.f32.mrf.mxu1  ;;  %v3273_v1 = vadd.f32 %v414_v8, %v3104_v30 }
 0x122   :  { %3847 = vst [vmem:[#allocation55_spill] sm:$0xff] %v3268_v7  ;;  %v3276_v19 = vadd.f32 %v527_v12, %v3106_v31  ;;  %v841_v23 = vpop.f32.mrf.mxu0  ;;  %v345_v12 = vadd.f32 %v3096_v24, %v3104_v30  ;;  %v456_v30 = vadd.f32 %v3094_v21, %v3102_v27 }
 0x123   :  { %3848 = vst [vmem:[#allocation56_spill] sm:$0xff] %v3273_v1  ;;  %v884_v28 = vpop.f32.mrf.mxu1  ;;  %v893_v43 = vadd.f32 %v841_v23, %v339_v11 }
 0x124   :  { %3849 = vst [vmem:[#allocation57_spill] sm:$0xff] %v3276_v19  ;;  %v843_v22 = vpop.f32.mrf.mxu0 }
 0x125   :  { %v901_v7 = vsub.f32 0.0, %v893_v43  ;;  %v894_v10 = vadd.f32 %v843_v22, %v341_v29  ;;  %v886_v35 = vpop.f32.mrf.mxu1 }
 0x126   :  { %v845_v13 = vpop.f32.mrf.mxu0 }
 0x127   :  { %v903_v18 = vmul.f32 1.442695, %v901_v7  ;;  %v913_v8 = vsub.f32 0.0, %v894_v10  ;;  %v897_v1 = vadd.f32 %v845_v13, %v343_v52  ;;  %v888_v15 = vpop.f32.mrf.mxu1  ;;  %v458_v10 = vadd.f32 %v3098_v25, %v3106_v31 }
 0x128   :  { %v847_v19 = vpop.f32.mrf.mxu0  ;;  %v896_v7 = vadd.f32 %v886_v35, %v454_v20 }
 0x129   :  { %2399 = vpow2.f32 %v903_v18  ;;  %v915_v6 = vmul.f32 1.442695, %v913_v8  ;;  %v902_v17 = vsub.f32 0.0, %v897_v1  ;;  %v898_v11 = vadd.f32 %v847_v19, %v345_v12  ;;  %v890_v22 = vpop.f32.mrf.mxu1 }
 0x12a   :  { %v900_v24 = vadd.f32 %v890_v22, %v458_v10  ;;  %v452_v1 = vadd.f32 %v3083_v14, %v3102_v27  ;;  %v899_v18 = vadd.f32 %v888_v15, %v456_v30 }
 0x12b   :  { %2401 = vpow2.f32 %v915_v6  ;;  %v905_v23 = vmul.f32 1.442695, %v902_v17  ;;  %v914_v26 = vsub.f32 0.0, %v898_v11  ;;  %v927_v6 = vsub.f32 0.0, %v896_v7 }
 0x12c   :  { %v895_v17 = vadd.f32 %v884_v28, %v452_v1  ;;  %v928_v16 = vsub.f32 0.0, %v900_v24 }
 0x12d   :  { %2403 = vpow2.f32 %v905_v23  ;;  %v917_v43 = vmul.f32 1.442695, %v914_v26  ;;  %v929_v29 = vmul.f32 1.442695, %v927_v6 }
 0x12e   :  { %v931_v25 = vmul.f32 1.442695, %v928_v16 }
 0x12f   :  { %2405 = vpow2.f32 %v917_v43 }
 0x130   :  { %2407 = vtanh.f32 %v895_v17 }
 0x131   :  { %2409 = vtanh.f32 %v899_v18 }
 0x136   :  { %v2400_v19 = vpop.eup %2399 }
 0x137   :  { %v907_v52 = vadd.f32 1.0, %v2400_v19 }
 0x138   :  { %v2402_v13 = vpop.eup %2401 }
 0x139   :  { %2411 = vrcp.f32 %v907_v52  ;;  %v919_v31 = vadd.f32 1.0, %v2402_v13 }
 0x13a   :  { %v2404_v35 = vpop.eup %2403  ;;  %2413 = vpow2.f32 %v929_v29 }
 0x13b   :  { %2415 = vrcp.f32 %v919_v31  ;;  %v908_v14 = vadd.f32 1.0, %v2404_v35 }
 0x13c   :  { %2417 = vpow2.f32 %v931_v25  ;;  %v2406_v8 = vpop.eup %2405  ;;  %v3850_v25 = vmov 0  }
 0x13d   :  { %2419 = vrcp.f32 %v908_v14  ;;  %v920_v21 = vadd.f32 1.0, %v2406_v8  ;;  %v2408_v27 = vpop.eup %2407 }
 0x13e   :  { %v2410_v28 = vpop.eup %2409 }
 0x13f   :  { %2421 = vrcp.f32 %v920_v21 }
 0x146   :  { %v2412_v12 = vpop.eup %2411 }
 0x147   :  { %v2414_v15 = vpop.eup %2413  ;;  %v941_v11 = vmul.f32 %v2412_v12, %v2408_v27 }
 0x148   :  { %v2416_v23 = vpop.eup %2415  ;;  %v933_v7 = vadd.f32 1.0, %v2414_v15 }
 0x149   :  { %v2418_v20 = vpop.eup %2417  ;;  %v939_v26 = vmul.f32 0.0, %v2416_v23 }
 0x14a   :  { %v2420_v22 = vpop.eup %2419  ;;  %v934_v1 = vadd.f32 1.0, %v2418_v20  ;;  %2423 = vrcp.f32 %v933_v7 }
 0x14b   :  { %v3292_v10 = vadd.f32 %v941_v11, %v939_v26  ;;  %v942_v43 = vmul.f32 %v2420_v22, %v2410_v28 }
 0x14c   :  { %v2422_v24 = vpop.eup %2421 }
 0x14d   :  { %v940_v30 = vmul.f32 0.0, %v2422_v24  ;;  %2425 = vtanh.f32 %v3292_v10 }
 0x14e   :  { %2427 = vrcp.f32 %v934_v1  ;;  %v3852_v1 = vld [vmem:[#allocation6_spill] sm:$0xff] }
 0x14f   :  { %v3295_v6 = vadd.f32 %v942_v43, %v940_v30 }
 0x151   :  { %2429 = vtanh.f32 %v3295_v6 }
 0x157   :  { %v2424_v17 = vpop.eup %2423 }
 0x15a   :  { %v2426_v18 = vpop.eup %2425 }
 0x15b   :  { %v2428_v16 = vpop.eup %2427  ;;  %v947_v29 = vmul.f32 %v2426_v18, %v2424_v17  ;;  %v3853_v17 = vld [vmem:[#allocation9_spill] sm:$0xff] }
 0x15e   :  { %v2430_v19 = vpop.eup %2429 }
 0x15f   :  { %v948_v52 = vmul.f32 %v2430_v19, %v2428_v16 }
 0x161   :  { %v949_v13 = vpack.c.bf16 %v948_v52, %v947_v29  ;;  %v3855_v29 = vld [vmem:[#allocation7_spill] sm:$0xff] }
 0x163   :  { %2245 = vst [vmem:[%s3794_s4] sm:$0xff] %v949_v13   ;;  %1003 = vmatmul.mubr.bf16.vlgmr.msra.gmra.mxu0 %v949_v13  ;;  %1046 = vmatmul.mubr.bf16.vlgmr.msra.gmra.mxu1 %v949_v13 }
 0x164   :  { %1135 = vmatpush1.bf16.msra.mxu0 %v2829_v36  ;;  %1178 = vmatpush1.bf16.msra.mxu1 %v2841_v38 }
 0x165   :  { %1136 = vmatprep.subr.bf16.mxu0 %v2835_v37  ;;  %1179 = vmatprep.subr.bf16.mxu1 %v2846_v39 }
 0x166   :  { %1166 = vmatprep.mubr.bf16.mxu0 %v3850_v25  ;;  %1209 = vmatprep.mubr.bf16.mxu1 %v3850_v25 }
 0x168   :  { %1137 = vmatpush1.bf16.msra.mxu0 %v2853_v40  ;;  %1180 = vmatpush1.bf16.msra.mxu1 %v2866_v42 }
 0x169   :  { %1138 = vmatprep.subr.bf16.mxu0 %v2860_v41  ;;  %1181 = vmatprep.subr.bf16.mxu1 %v2887_v46 }
 0x16c   :  { %1139 = vmatpush1.bf16.msra.mxu0 %v2876_v44  ;;  %1182 = vmatpush1.bf16.msra.mxu1 %v2893_v47 }
 0x16d   :  { %1140 = vmatprep.subr.bf16.mxu0 %v2881_v45  ;;  %1183 = vmatprep.subr.bf16.mxu1 %v2898_v48 }
 0x170   :  { %1141 = vmatpush1.bf16.msra.mxu0 %v2906_v49  ;;  %1184 = vmatpush1.bf16.msra.mxu1 %v2919_v51 }
 0x171   :  { %1142 = vmatprep.subr.bf16.mxu0 %v2911_v50  ;;  %1185 = vmatprep.subr.bf16.mxu1 %v2934_v54 }
 0x174   :  { %1143 = vmatpush1.bf16.msra.mxu0 %v2928_v53  ;;  %1186 = vmatpush1.bf16.msra.mxu1 %v2946_v56 }
 0x175   :  { %1144 = vmatprep.subr.bf16.mxu0 %v2940_v55  ;;  %1187 = vmatprep.subr.bf16.mxu1 %v2951_v57 }
 0x178   :  { %1145 = vmatpush1.bf16.msra.mxu0 %v2959_v58  ;;  %1188 = vmatpush1.bf16.msra.mxu1 %v2972_v60 }
 0x179   :  { %1146 = vmatprep.subr.bf16.mxu0 %v2966_v59  ;;  %1189 = vmatprep.subr.bf16.mxu1 %v2987_v63 }
 0x17c   :  { %1147 = vmatpush1.bf16.msra.mxu0 %v2982_v62  ;;  %1190 = vmatpush1.bf16.msra.mxu1 %v2999_v2 }
 0x17d   :  { %1148 = vmatprep.subr.bf16.mxu0 %v2994_v0  ;;  %1191 = vmatprep.subr.bf16.mxu1 %v3004_v3 }
 0x180   :  { %1149 = vmatpush1.bf16.msra.mxu0 %v3013_v4  ;;  %1192 = vmatpush1.bf16.msra.mxu1 %v3020_v5 }
 0x181   :  { %1298 = vmatprep.subr.bf16.mxu0 %v2816_v33  ;;  %1341 = vmatprep.subr.bf16.mxu1 %v2821_v34  ;;  %v3851_v34 = vld [vmem:[#allocation8_spill] sm:$0xff] }
 0x223   :  { %v1004_v31 = vpop.f32.mrf.mxu0  ;;  %v1047_v35 = vpop.f32.mrf.mxu1 }
 0x224   :  { %v1056_v14 = vadd.f32 %v1004_v31, %v3109_v32 }
 0x225   :  { %v1006_v8 = vpop.f32.mrf.mxu0  ;;  %v1049_v28 = vpop.f32.mrf.mxu1 }
 0x226   :  { %v1064_v21 = vsub.f32 0.0, %v1056_v14  ;;  %v1057_v27 = vadd.f32 %v1006_v8, %v3115_v61  ;;  %v1059_v61 = vadd.f32 %v1049_v28, %v3852_v1 }
 0x227   :  { %v1008_v12 = vpop.f32.mrf.mxu0  ;;  %v1051_v22 = vpop.f32.mrf.mxu1 }
 0x228   :  { %v1066_v15 = vmul.f32 1.442695, %v1064_v21  ;;  %v1076_v11 = vsub.f32 0.0, %v1057_v27  ;;  %v1060_v23 = vadd.f32 %v1008_v12, %v3121_v9  ;;  %v1090_v16 = vsub.f32 0.0, %v1059_v61  ;;  %v3854_v9 = vld [vmem:[#allocation5_spill] sm:$0xff] }
 0x229   :  { %v1010_v20 = vpop.f32.mrf.mxu0  ;;  %v1053_v24 = vpop.f32.mrf.mxu1  ;;  %v1058_v19 = vadd.f32 %v1047_v35, %v3854_v9  ;;  %v1062_v52 = vadd.f32 %v1051_v22, %v3855_v29 }
 0x22a   :  { %2431 = vpow2.f32 %v1066_v15  ;;  %v1078_v26 = vmul.f32 1.442695, %v1076_v11  ;;  %v1065_v33 = vsub.f32 0.0, %v1060_v23  ;;  %v1061_v7 = vadd.f32 %v1010_v20, %v3851_v34 }
 0x22b   :  { %v1063_v18 = vadd.f32 %v1053_v24, %v3853_v17  ;;  %v1092_v14 = vmul.f32 1.442695, %v1090_v16 }
 0x22c   :  { %2433 = vpow2.f32 %v1078_v26  ;;  %v1068_v43 = vmul.f32 1.442695, %v1065_v33  ;;  %v1077_v32 = vsub.f32 0.0, %v1061_v7 }
 0x22d   :  { %v1091_v13 = vsub.f32 0.0, %v1063_v18 }
 0x22e   :  { %2435 = vpow2.f32 %v1068_v43  ;;  %v1080_v30 = vmul.f32 1.442695, %v1077_v32 }
 0x22f   :  { %v1094_v27 = vmul.f32 1.442695, %v1091_v13 }
 0x230   :  { %2437 = vpow2.f32 %v1080_v30 }
 0x231   :  { %2439 = vtanh.f32 %v1058_v19 }
 0x232   :  { %2441 = vtanh.f32 %v1062_v52 }
 0x237   :  { %v2432_v31 = vpop.eup %2431 }
 0x238   :  { %v1070_v8 = vadd.f32 1.0, %v2432_v31 }
 0x239   :  { %v2434_v21 = vpop.eup %2433 }
 0x23a   :  { %2443 = vrcp.f32 %v1070_v8  ;;  %v1082_v12 = vadd.f32 1.0, %v2434_v21  ;;  %v3863_v21 = vld [vmem:[#allocation15_spill] sm:$0xff] }
 0x23b   :  { %v2436_v28 = vpop.eup %2435  ;;  %2445 = vpow2.f32 %v1092_v14  ;;  %v3862_v14 = vld [vmem:[#allocation11_spill] sm:$0xff] }
 0x23c   :  { %2447 = vrcp.f32 %v1082_v12  ;;  %v1071_v15 = vadd.f32 1.0, %v2436_v28 }
 0x23d   :  { %2449 = vpow2.f32 %v1094_v27  ;;  %v2438_v11 = vpop.eup %2437 }
 0x23e   :  { %2451 = vrcp.f32 %v1071_v15  ;;  %v1083_v35 = vadd.f32 1.0, %v2438_v11  ;;  %v2440_v23 = vpop.eup %2439 }
 0x23f   :  { %v2442_v20 = vpop.eup %2441 }
 0x240   :  { %2453 = vrcp.f32 %v1083_v35 }
 0x247   :  { %v2444_v26 = vpop.eup %2443 }
 0x248   :  { %v2446_v33 = vpop.eup %2445  ;;  %v1104_v22 = vmul.f32 %v2444_v26, %v2440_v23 }
 0x249   :  { %v2448_v34 = vpop.eup %2447  ;;  %v1096_v1 = vadd.f32 1.0, %v2446_v33 }
 0x24a   :  { %v2450_v7 = vpop.eup %2449  ;;  %v1102_v43 = vmul.f32 %v2448_v34, %v3292_v10 }
 0x24b   :  { %v2452_v32 = vpop.eup %2451  ;;  %v1097_v17 = vadd.f32 1.0, %v2450_v7  ;;  %2455 = vrcp.f32 %v1096_v1 }
 0x24c   :  { %v3344_v24 = vadd.f32 %v1104_v22, %v1102_v43  ;;  %v1105_v61 = vmul.f32 %v2452_v32, %v2442_v20 }
 0x24d   :  { %v2454_v30 = vpop.eup %2453 }
 0x24e   :  { %v1103_v18 = vmul.f32 %v2454_v30, %v3295_v6  ;;  %2457 = vtanh.f32 %v3344_v24 }
 0x24f   :  { %2459 = vrcp.f32 %v1097_v17 }
 0x250   :  { %v3347_v16 = vadd.f32 %v1105_v61, %v1103_v18 }
 0x252   :  { %2461 = vtanh.f32 %v3347_v16 }
 0x258   :  { %v2456_v9 = vpop.eup %2455 }
 0x25b   :  { %v2458_v19 = vpop.eup %2457 }
 0x25c   :  { %v2460_v10 = vpop.eup %2459  ;;  %v1110_v52 = vmul.f32 %v2458_v19, %v2456_v9 }
 0x25f   :  { %v2462_v29 = vpop.eup %2461 }
 0x260   :  { %v1111_v13 = vmul.f32 %v2462_v29, %v2460_v10 }
 0x262   :  { %v1112_v31 = vpack.c.bf16 %v1111_v13, %v1110_v52 }
 0x264   :  { %2286 = vst [vmem:[%s3794_s4 + $0x8] sm:$0xff] %v1112_v31   ;;  %1167 = vmatmul.mubr.bf16.vlgmr.msra.gmra.mxu0 %v1112_v31  ;;  %1210 = vmatmul.mubr.bf16.vlgmr.msra.gmra.mxu1 %v1112_v31 }
 0x265   :  { %1299 = vmatpush1.bf16.msra.mxu0 %v2829_v36  ;;  %1342 = vmatpush1.bf16.msra.mxu1 %v2841_v38  ;;  %v3389_v36 = vld [vmem:[%s3792_s2 + $0xe4] ss:$16 sps:$4 sm:$0xff]  }
 0x266   :  { %1300 = vmatprep.subr.bf16.mxu0 %v2835_v37  ;;  %1343 = vmatprep.subr.bf16.mxu1 %v2846_v39  ;;  %v3395_v37 = vld [vmem:[%s3792_s2 + $0xec] ss:$16 sps:$4 sm:$0xff]  }
 0x267   :  { %1330 = vmatprep.mubr.bf16.mxu0 %v3850_v25  ;;  %1373 = vmatprep.mubr.bf16.mxu1 %v3850_v25 }
 0x269   :  { %1301 = vmatpush1.bf16.msra.mxu0 %v2853_v40  ;;  %1344 = vmatpush1.bf16.msra.mxu1 %v2866_v42  ;;  %v3856_v40 = vld [vmem:[#allocation10_spill] sm:$0xff] }
 0x26a   :  { %1302 = vmatprep.subr.bf16.mxu0 %v2860_v41  ;;  %1345 = vmatprep.subr.bf16.mxu1 %v2887_v46 }
 0x26d   :  { %1303 = vmatpush1.bf16.msra.mxu0 %v2876_v44  ;;  %1346 = vmatpush1.bf16.msra.mxu1 %v2893_v47 }
 0x26e   :  { %1304 = vmatprep.subr.bf16.mxu0 %v2881_v45  ;;  %1347 = vmatprep.subr.bf16.mxu1 %v2898_v48  ;;  %v3857_v45 = vld [vmem:[#allocation12_spill] sm:$0xff] }
 0x271   :  { %1305 = vmatpush1.bf16.msra.mxu0 %v2906_v49  ;;  %1348 = vmatpush1.bf16.msra.mxu1 %v2919_v51  ;;  %v3858_v51 = vld [vmem:[#allocation14_spill] sm:$0xff] }
 0x272   :  { %1306 = vmatprep.subr.bf16.mxu0 %v2911_v50  ;;  %1349 = vmatprep.subr.bf16.mxu1 %v2934_v54 }
 0x275   :  { %1307 = vmatpush1.bf16.msra.mxu0 %v2928_v53  ;;  %1350 = vmatpush1.bf16.msra.mxu1 %v2946_v56 }
 0x276   :  { %1308 = vmatprep.subr.bf16.mxu0 %v2940_v55  ;;  %1351 = vmatprep.subr.bf16.mxu1 %v2951_v57 }
 0x279   :  { %1309 = vmatpush1.bf16.msra.mxu0 %v2959_v58  ;;  %1352 = vmatpush1.bf16.msra.mxu1 %v2972_v60  ;;  %v3859_v58 = vld [vmem:[#allocation16_spill] sm:$0xff] }
 0x27a   :  { %1310 = vmatprep.subr.bf16.mxu0 %v2966_v59  ;;  %1353 = vmatprep.subr.bf16.mxu1 %v2987_v63 }
 0x27d   :  { %1311 = vmatpush1.bf16.msra.mxu0 %v2982_v62  ;;  %1354 = vmatpush1.bf16.msra.mxu1 %v2999_v2 }
 0x27e   :  { %1312 = vmatprep.subr.bf16.mxu0 %v2994_v0  ;;  %1355 = vmatprep.subr.bf16.mxu1 %v3004_v3  ;;  %v3860_v0 = vld [vmem:[#allocation13_spill] sm:$0xff] }
 0x281   :  { %1313 = vmatpush1.bf16.msra.mxu0 %v3013_v4  ;;  %1356 = vmatpush1.bf16.msra.mxu1 %v3020_v5  ;;  %v3861_v4 = vld [vmem:[#allocation17_spill] sm:$0xff] }
 0x282   :  { %1462 = vmatprep.subr.bf16.mxu0 %v3389_v36  ;;  %1505 = vmatprep.subr.bf16.mxu1 %v3395_v37 }
 0x324   :  { %v1168_v38 = vpop.f32.mrf.mxu0  ;;  %v1211_v39 = vpop.f32.mrf.mxu1 }
 0x325   :  { %v1220_v41 = vadd.f32 %v1168_v38, %v3856_v40  ;;  %v1222_v8 = vadd.f32 %v1211_v39, %v3862_v14  ;;  %v3560_v14 = vld [vmem:[%s3792_s2 + $0x2c] ss:$16 sps:$4 sm:$0xff]  }
 0x326   :  { %v1170_v42 = vpop.f32.mrf.mxu0  ;;  %v1213_v47 = vpop.f32.mrf.mxu1 }
 0x327   :  { %v1228_v44 = vsub.f32 0.0, %v1220_v41  ;;  %v1221_v46 = vadd.f32 %v1170_v42, %v3857_v45  ;;  %v1223_v2 = vadd.f32 %v1213_v47, %v3860_v0  ;;  %v3432_v47 = vld [vmem:[%s3792_s2 + $0xc4] ss:$16 sps:$4 sm:$0xff]   ;;  %v3524_v0 = vld [vmem:[%s3792_s2 + $0x68] ss:$16 sps:$4 sm:$0xff]  }
 0x328   :  { %v1172_v48 = vpop.f32.mrf.mxu0  ;;  %v1215_v57 = vpop.f32.mrf.mxu1 }
 0x329   :  { %v1230_v49 = vmul.f32 1.442695, %v1228_v44  ;;  %v1240_v50 = vsub.f32 0.0, %v1221_v46  ;;  %v1224_v53 = vadd.f32 %v1172_v48, %v3858_v51  ;;  %v1254_v6 = vsub.f32 0.0, %v1223_v2  ;;  %v3426_v46 = vld [vmem:[%s3792_s2 + $0xe8] ss:$16 sps:$4 sm:$0xff]  }
 0x32a   :  { %v1174_v54 = vpop.f32.mrf.mxu0  ;;  %v1217_v63 = vpop.f32.mrf.mxu1  ;;  %v1226_v27 = vadd.f32 %v1215_v57, %v3863_v21  ;;  %v3438_v48 = vld [vmem:[%s3792_s2 + $0xcc] ss:$16 sps:$4 sm:$0xff]   ;;  %v3458_v51 = vld [vmem:[%s3792_s2 + $0xa4] ss:$16 sps:$4 sm:$0xff]   ;;  %v3572_v21 = vld [vmem:[%s3792_s2 + $0x28] ss:$16 sps:$4 sm:$0xff]  }
 0x32b   :  { %2463 = vpow2.f32 %v1230_v49  ;;  %v1242_v55 = vmul.f32 1.442695, %v1240_v50  ;;  %v1229_v56 = vsub.f32 0.0, %v1224_v53  ;;  %v1225_v59 = vadd.f32 %v1174_v54, %v3859_v58  ;;  %v3446_v49 = vld [vmem:[%s3792_s2 + $0xc0] ss:$16 sps:$4 sm:$0xff]  }
 0x32c   :  { %v1227_v5 = vadd.f32 %v1217_v63, %v3861_v4  ;;  %v1256_v15 = vmul.f32 1.442695, %v1254_v6  ;;  %v3452_v50 = vld [vmem:[%s3792_s2 + $0xc8] ss:$16 sps:$4 sm:$0xff]   ;;  %v3464_v53 = vld [vmem:[%s3792_s2 + $0xac] ss:$16 sps:$4 sm:$0xff]  }
 0x32d   :  { %2465 = vpow2.f32 %v1242_v55  ;;  %v1232_v60 = vmul.f32 1.442695, %v1229_v56  ;;  %v1241_v62 = vsub.f32 0.0, %v1225_v59  ;;  %v3470_v54 = vld [vmem:[%s3792_s2 + $0xa0] ss:$16 sps:$4 sm:$0xff]  }
 0x32e   :  { %v1255_v12 = vsub.f32 0.0, %v1227_v5  ;;  %v3476_v55 = vld [vmem:[%s3792_s2 + $0xa8] ss:$16 sps:$4 sm:$0xff]   ;;  %v3482_v56 = vld [vmem:[%s3792_s2 + $0x84] ss:$16 sps:$4 sm:$0xff]  }
 0x32f   :  { %2467 = vpow2.f32 %v1232_v60  ;;  %v1244_v3 = vmul.f32 1.442695, %v1241_v62  ;;  %v3488_v57 = vld [vmem:[%s3792_s2 + $0x8c] ss:$16 sps:$4 sm:$0xff]   ;;  %v3494_v58 = vld [vmem:[%s3792_s2 + $0x80] ss:$16 sps:$4 sm:$0xff]  }
 0x330   :  { %v1258_v23 = vmul.f32 1.442695, %v1255_v12  ;;  %v3500_v59 = vld [vmem:[%s3792_s2 + $0x88] ss:$16 sps:$4 sm:$0xff]   ;;  %v3506_v60 = vld [vmem:[%s3792_s2 + $0x64] ss:$16 sps:$4 sm:$0xff]  }
 0x331   :  { %2469 = vpow2.f32 %v1244_v3  ;;  %v3512_v62 = vld [vmem:[%s3792_s2 + $0x6c] ss:$16 sps:$4 sm:$0xff]   ;;  %v3518_v63 = vld [vmem:[%s3792_s2 + $0x60] ss:$16 sps:$4 sm:$0xff]   ;;  %v3530_v2 = vld [vmem:[%s3792_s2 + $0x44] ss:$16 sps:$4 sm:$0xff]  }
 0x332   :  { %2471 = vtanh.f32 %v1222_v8  ;;  %v3536_v3 = vld [vmem:[%s3792_s2 + $0x4c] ss:$16 sps:$4 sm:$0xff]   ;;  %v3542_v4 = vld [vmem:[%s3792_s2 + $0x40] ss:$16 sps:$4 sm:$0xff]   ;;  %v3548_v5 = vld [vmem:[%s3792_s2 + $0x48] ss:$16 sps:$4 sm:$0xff]  }
 0x333   :  { %2473 = vtanh.f32 %v1226_v27  ;;  %v3554_v6 = vld [vmem:[%s3792_s2 + $0x24] ss:$16 sps:$4 sm:$0xff]   ;;  %v3566_v8 = vld [vmem:[%s3792_s2 + $0x20] ss:$16 sps:$4 sm:$0xff]   ;;  %v3584_v12 = vld [vmem:[%s3792_s2 + $0xc] ss:$16 sps:$4 sm:$0xff]  }
 0x334   :  { %v3578_v27 = vld [vmem:[%s3792_s2 + $0x4] ss:$16 sps:$4 sm:$0xff]  }
 0x338   :  { %v2464_v28 = vpop.eup %2463 }
 0x339   :  { %v1234_v11 = vadd.f32 1.0, %v2464_v28  ;;  %v3590_v28 = vld [vmem:[%s3792_s2] ss:$16 sps:$4 sm:$0xff]  }
 0x33a   :  { %v2466_v35 = vpop.eup %2465 }
 0x33b   :  { %2475 = vrcp.f32 %v1234_v11  ;;  %v1246_v20 = vadd.f32 1.0, %v2466_v35 }
 0x33c   :  { %v2468_v26 = vpop.eup %2467  ;;  %2477 = vpow2.f32 %v1256_v15  ;;  %v3596_v15 = vld [vmem:[%s3792_s2 + $0x8] ss:$16 sps:$4 sm:$0xff]  }
 0x33d   :  { %2479 = vrcp.f32 %v1246_v20  ;;  %v1235_v33 = vadd.f32 1.0, %v2468_v26 }
 0x33e   :  { %2481 = vpow2.f32 %v1258_v23  ;;  %v2470_v22 = vpop.eup %2469  ;;  %v3864_v23 = vld [vmem:[#allocation18_spill] sm:$0xff] }
 0x33f   :  { %2483 = vrcp.f32 %v1235_v33  ;;  %v1247_v34 = vadd.f32 1.0, %v2470_v22  ;;  %v2472_v7 = vpop.eup %2471  ;;  %v3865_v22 = vld [vmem:[#allocation20_spill] sm:$0xff] }
 0x340   :  { %v2474_v43 = vpop.eup %2473 }
 0x341   :  { %2485 = vrcp.f32 %v1247_v34 }
 0x348   :  { %v2476_v32 = vpop.eup %2475 }
 0x349   :  { %v2478_v1 = vpop.eup %2477  ;;  %v1268_v61 = vmul.f32 %v2476_v32, %v2472_v7 }
 0x34a   :  { %v2480_v30 = vpop.eup %2479  ;;  %v1260_v10 = vadd.f32 1.0, %v2478_v1 }
 0x34b   :  { %v2482_v17 = vpop.eup %2481  ;;  %v1266_v18 = vmul.f32 %v2480_v30, %v3344_v24 }
 0x34c   :  { %v2484_v9 = vpop.eup %2483  ;;  %v1261_v13 = vadd.f32 1.0, %v2482_v17  ;;  %2487 = vrcp.f32 %v1260_v10 }
 0x34d   :  { %v3407_v19 = vadd.f32 %v1268_v61, %v1266_v18  ;;  %v1269_v29 = vmul.f32 %v2484_v9, %v2474_v43  ;;  %v3866_v61 = vld [vmem:[#allocation22_spill] sm:$0xff] }
 0x34e   :  { %v2486_v52 = vpop.eup %2485 }
 0x34f   :  { %v1267_v31 = vmul.f32 %v2486_v52, %v3347_v16  ;;  %2489 = vtanh.f32 %v3407_v19  ;;  %v3420_v16 = vld [vmem:[%s3792_s2 + $0xe0] ss:$16 sps:$4 sm:$0xff]  }
 0x350   :  { %2491 = vrcp.f32 %v1261_v13 }
 0x351   :  { %v3410_v38 = vadd.f32 %v1269_v29, %v1267_v31  ;;  %v3867_v29 = vld [vmem:[#allocation24_spill] sm:$0xff] }
 0x353   :  { %2493 = vtanh.f32 %v3410_v38 }
 0x359   :  { %v2488_v39 = vpop.eup %2487 }
 0x35c   :  { %v2490_v40 = vpop.eup %2489 }
 0x35d   :  { %v2492_v24 = vpop.eup %2491  ;;  %v1274_v42 = vmul.f32 %v2490_v40, %v2488_v39  ;;  %v3868_v40 = vld [vmem:[#allocation21_spill] sm:$0xff] }
 0x360   :  { %v2494_v41 = vpop.eup %2493 }
 0x361   :  { %v1275_v44 = vmul.f32 %v2494_v41, %v2492_v24 }
 0x363   :  { %v1276_v45 = vpack.c.bf16 %v1275_v44, %v1274_v42  ;;  %v3869_v42 = vld [vmem:[#allocation25_spill] sm:$0xff] }
 0x365   :  { %2287 = vst [vmem:[%s3794_s4 + $0x10] sm:$0xff] %v1276_v45   ;;  %1331 = vmatmul.mubr.bf16.vlgmr.msra.gmra.mxu0 %v1276_v45  ;;  %1374 = vmatmul.mubr.bf16.vlgmr.msra.gmra.mxu1 %v1276_v45 }
 0x366   :  { %1463 = vmatpush1.bf16.msra.mxu0 %v3420_v16  ;;  %1506 = vmatpush1.bf16.msra.mxu1 %v3426_v46 }
 0x367   :  { %1464 = vmatprep.subr.bf16.mxu0 %v3432_v47  ;;  %1507 = vmatprep.subr.bf16.mxu1 %v3438_v48 }
 0x368   :  { %1494 = vmatprep.mubr.bf16.mxu0 %v3850_v25  ;;  %1537 = vmatprep.mubr.bf16.mxu1 %v3850_v25 }
 0x36a   :  { %1465 = vmatpush1.bf16.msra.mxu0 %v3446_v49  ;;  %1508 = vmatpush1.bf16.msra.mxu1 %v3452_v50 }
 0x36b   :  { %1466 = vmatprep.subr.bf16.mxu0 %v3458_v51  ;;  %1509 = vmatprep.subr.bf16.mxu1 %v3464_v53 }
 0x36e   :  { %1467 = vmatpush1.bf16.msra.mxu0 %v3470_v54  ;;  %1510 = vmatpush1.bf16.msra.mxu1 %v3476_v55 }
 0x36f   :  { %1468 = vmatprep.subr.bf16.mxu0 %v3482_v56  ;;  %1511 = vmatprep.subr.bf16.mxu1 %v3488_v57 }
 0x372   :  { %1469 = vmatpush1.bf16.msra.mxu0 %v3494_v58  ;;  %1512 = vmatpush1.bf16.msra.mxu1 %v3500_v59 }
 0x373   :  { %1470 = vmatprep.subr.bf16.mxu0 %v3506_v60  ;;  %1513 = vmatprep.subr.bf16.mxu1 %v3512_v62 }
 0x376   :  { %1471 = vmatpush1.bf16.msra.mxu0 %v3518_v63  ;;  %1514 = vmatpush1.bf16.msra.mxu1 %v3524_v0 }
 0x377   :  { %1472 = vmatprep.subr.bf16.mxu0 %v3530_v2  ;;  %1515 = vmatprep.subr.bf16.mxu1 %v3536_v3 }
 0x37a   :  { %1473 = vmatpush1.bf16.msra.mxu0 %v3542_v4  ;;  %1516 = vmatpush1.bf16.msra.mxu1 %v3548_v5 }
 0x37b   :  { %1474 = vmatprep.subr.bf16.mxu0 %v3554_v6  ;;  %1517 = vmatprep.subr.bf16.mxu1 %v3560_v14 }
 0x37e   :  { %1475 = vmatpush1.bf16.msra.mxu0 %v3566_v8  ;;  %1518 = vmatpush1.bf16.msra.mxu1 %v3572_v21 }
 0x37f   :  { %1476 = vmatprep.subr.bf16.mxu0 %v3578_v27  ;;  %1519 = vmatprep.subr.bf16.mxu1 %v3584_v12 }
 0x382   :  { %1477 = vmatpush1.bf16.msra.mxu0 %v3590_v28  ;;  %1520 = vmatpush1.bf16.msra.mxu1 %v3596_v15 }
 0x383   :  { %1626 = vmatprep.subr.bf16.mxu0 %v3389_v36  ;;  %1669 = vmatprep.subr.bf16.mxu1 %v3395_v37 }
 0x425   :  { %v1332_v11 = vpop.f32.mrf.mxu0  ;;  %v1375_v35 = vpop.f32.mrf.mxu1 }
 0x426   :  { %v1384_v20 = vadd.f32 %v1332_v11, %v3864_v23  ;;  %v3870_v11 = vld [vmem:[#allocation19_spill] sm:$0xff] }
 0x427   :  { %v1334_v26 = vpop.f32.mrf.mxu0  ;;  %v1377_v7 = vpop.f32.mrf.mxu1  ;;  %v1386_v23 = vadd.f32 %v1375_v35, %v3870_v11 }
 0x428   :  { %v1392_v33 = vsub.f32 0.0, %v1384_v20  ;;  %v1385_v34 = vadd.f32 %v1334_v26, %v3865_v22  ;;  %v1387_v24 = vadd.f32 %v1377_v7, %v3868_v40  ;;  %v3871_v20 = vld [vmem:[#allocation23_spill] sm:$0xff] }
 0x429   :  { %v1336_v43 = vpop.f32.mrf.mxu0  ;;  %v1379_v10 = vpop.f32.mrf.mxu1 }
 0x42a   :  { %v1394_v32 = vmul.f32 1.442695, %v1392_v33  ;;  %v1404_v1 = vsub.f32 0.0, %v1385_v34  ;;  %v1388_v30 = vadd.f32 %v1336_v43, %v3866_v61  ;;  %v1418_v45 = vsub.f32 0.0, %v1387_v24 }
 0x42b   :  { %v1338_v17 = vpop.f32.mrf.mxu0  ;;  %v1381_v39 = vpop.f32.mrf.mxu1  ;;  %v1390_v26 = vadd.f32 %v1379_v10, %v3871_v20 }
 0x42c   :  { %2495 = vpow2.f32 %v1394_v32  ;;  %v1406_v18 = vmul.f32 1.442695, %v1404_v1  ;;  %v1393_v9 = vsub.f32 0.0, %v1388_v30  ;;  %v1389_v52 = vadd.f32 %v1338_v17, %v3867_v29 }
 0x42d   :  { %v1391_v44 = vadd.f32 %v1381_v39, %v3869_v42  ;;  %v1420_v34 = vmul.f32 1.442695, %v1418_v45 }
 0x42e   :  { %2497 = vpow2.f32 %v1406_v18  ;;  %v1396_v13 = vmul.f32 1.442695, %v1393_v9  ;;  %v1405_v31 = vsub.f32 0.0, %v1389_v52 }
 0x42f   :  { %v1419_v33 = vsub.f32 0.0, %v1391_v44 }
 0x430   :  { %2499 = vpow2.f32 %v1396_v13  ;;  %v1408_v41 = vmul.f32 1.442695, %v1405_v31 }
 0x431   :  { %v1422_v1 = vmul.f32 1.442695, %v1419_v33 }
 0x432   :  { %2501 = vpow2.f32 %v1408_v41 }
 0x433   :  { %2503 = vtanh.f32 %v1386_v23 }
 0x434   :  { %2505 = vtanh.f32 %v1390_v26 }
 0x439   :  { %v2496_v22 = vpop.eup %2495 }
 0x43a   :  { %v1398_v43 = vadd.f32 1.0, %v2496_v22 }
 0x43b   :  { %v2498_v32 = vpop.eup %2497 }
 0x43c   :  { %2507 = vrcp.f32 %v1398_v43  ;;  %v1410_v61 = vadd.f32 1.0, %v2498_v32 }
 0x43d   :  { %v2500_v7 = vpop.eup %2499  ;;  %2509 = vpow2.f32 %v1420_v34 }
 0x43e   :  { %2511 = vrcp.f32 %v1410_v61  ;;  %v1399_v30 = vadd.f32 1.0, %v2500_v7 }
 0x43f   :  { %2513 = vpow2.f32 %v1422_v1  ;;  %v2502_v17 = vpop.eup %2501  ;;  %v3872_v1 = vld [vmem:[#allocation26_spill] sm:$0xff] }
 0x440   :  { %2515 = vrcp.f32 %v1399_v30  ;;  %v1411_v35 = vadd.f32 1.0, %v2502_v17  ;;  %v2504_v18 = vpop.eup %2503  ;;  %v3873_v17 = vld [vmem:[#allocation28_spill] sm:$0xff] }
 0x441   :  { %v2506_v9 = vpop.eup %2505 }
 0x442   :  { %2517 = vrcp.f32 %v1411_v35 }
 0x449   :  { %v2508_v10 = vpop.eup %2507 }
 0x44a   :  { %v2510_v29 = vpop.eup %2509  ;;  %v1432_v52 = vmul.f32 %v2508_v10, %v2504_v18 }
 0x44b   :  { %v2512_v13 = vpop.eup %2511  ;;  %v1424_v41 = vadd.f32 1.0, %v2510_v29 }
 0x44c   :  { %v2514_v31 = vpop.eup %2513  ;;  %v1430_v39 = vmul.f32 %v2512_v13, %v3407_v19 }
 0x44d   :  { %v2516_v40 = vpop.eup %2515  ;;  %v1425_v45 = vadd.f32 1.0, %v2514_v31  ;;  %2519 = vrcp.f32 %v1424_v41 }
 0x44e   :  { %v3610_v24 = vadd.f32 %v1432_v52, %v1430_v39  ;;  %v1433_v42 = vmul.f32 %v2516_v40, %v2506_v9  ;;  %v3874_v52 = vld [vmem:[#allocation30_spill] sm:$0xff] }
 0x44f   :  { %v2518_v44 = vpop.eup %2517 }
 0x450   :  { %v1431_v11 = vmul.f32 %v2518_v44, %v3410_v38  ;;  %2521 = vtanh.f32 %v3610_v24 }
 0x451   :  { %2523 = vrcp.f32 %v1425_v45 }
 0x452   :  { %v3613_v23 = vadd.f32 %v1433_v42, %v1431_v11  ;;  %v3875_v42 = vld [vmem:[#allocation32_spill] sm:$0xff] }
 0x454   :  { %2525 = vtanh.f32 %v3613_v23 }
 0x45a   :  { %v2520_v20 = vpop.eup %2519 }
 0x45d   :  { %v2522_v26 = vpop.eup %2521 }
 0x45e   :  { %v2524_v19 = vpop.eup %2523  ;;  %v1438_v22 = vmul.f32 %v2522_v26, %v2520_v20  ;;  %v3876_v26 = vld [vmem:[#allocation29_spill] sm:$0xff] }
 0x461   :  { %v2526_v33 = vpop.eup %2525 }
 0x462   :  { %v1439_v34 = vmul.f32 %v2526_v33, %v2524_v19 }
 0x464   :  { %v1440_v43 = vpack.c.bf16 %v1439_v34, %v1438_v22  ;;  %v3877_v22 = vld [vmem:[#allocation33_spill] sm:$0xff] }
 0x466   :  { %2288 = vst [vmem:[%s3794_s4 + $0x18] sm:$0xff] %v1440_v43   ;;  %1495 = vmatmul.mubr.bf16.vlgmr.msra.gmra.mxu0 %v1440_v43  ;;  %1538 = vmatmul.mubr.bf16.vlgmr.msra.gmra.mxu1 %v1440_v43 }
 0x467   :  { %1627 = vmatpush1.bf16.msra.mxu0 %v3420_v16  ;;  %1670 = vmatpush1.bf16.msra.mxu1 %v3426_v46 }
 0x468   :  { %1628 = vmatprep.subr.bf16.mxu0 %v3432_v47  ;;  %1671 = vmatprep.subr.bf16.mxu1 %v3438_v48 }
 0x469   :  { %1658 = vmatprep.mubr.bf16.mxu0 %v3850_v25  ;;  %1701 = vmatprep.mubr.bf16.mxu1 %v3850_v25 }
 0x46b   :  { %1629 = vmatpush1.bf16.msra.mxu0 %v3446_v49  ;;  %1672 = vmatpush1.bf16.msra.mxu1 %v3452_v50 }
 0x46c   :  { %1630 = vmatprep.subr.bf16.mxu0 %v3458_v51  ;;  %1673 = vmatprep.subr.bf16.mxu1 %v3464_v53 }
 0x46f   :  { %1631 = vmatpush1.bf16.msra.mxu0 %v3470_v54  ;;  %1674 = vmatpush1.bf16.msra.mxu1 %v3476_v55 }
 0x470   :  { %1632 = vmatprep.subr.bf16.mxu0 %v3482_v56  ;;  %1675 = vmatprep.subr.bf16.mxu1 %v3488_v57 }
 0x473   :  { %1633 = vmatpush1.bf16.msra.mxu0 %v3494_v58  ;;  %1676 = vmatpush1.bf16.msra.mxu1 %v3500_v59 }
 0x474   :  { %1634 = vmatprep.subr.bf16.mxu0 %v3506_v60  ;;  %1677 = vmatprep.subr.bf16.mxu1 %v3512_v62 }
 0x477   :  { %1635 = vmatpush1.bf16.msra.mxu0 %v3518_v63  ;;  %1678 = vmatpush1.bf16.msra.mxu1 %v3524_v0 }
 0x478   :  { %1636 = vmatprep.subr.bf16.mxu0 %v3530_v2  ;;  %1679 = vmatprep.subr.bf16.mxu1 %v3536_v3 }
 0x47b   :  { %1637 = vmatpush1.bf16.msra.mxu0 %v3542_v4  ;;  %1680 = vmatpush1.bf16.msra.mxu1 %v3548_v5 }
 0x47c   :  { %1638 = vmatprep.subr.bf16.mxu0 %v3554_v6  ;;  %1681 = vmatprep.subr.bf16.mxu1 %v3560_v14 }
 0x47f   :  { %1639 = vmatpush1.bf16.msra.mxu0 %v3566_v8  ;;  %1682 = vmatpush1.bf16.msra.mxu1 %v3572_v21 }
 0x480   :  { %1640 = vmatprep.subr.bf16.mxu0 %v3578_v27  ;;  %1683 = vmatprep.subr.bf16.mxu1 %v3584_v12 }
 0x483   :  { %1641 = vmatpush1.bf16.msra.mxu0 %v3590_v28  ;;  %1684 = vmatpush1.bf16.msra.mxu1 %v3596_v15 }
 0x484   :  { %1790 = vmatprep.subr.bf16.mxu0 %v3389_v36  ;;  %1833 = vmatprep.subr.bf16.mxu1 %v3395_v37 }
 0x526   :  { %v1496_v38 = vpop.f32.mrf.mxu0  ;;  %v1539_v32 = vpop.f32.mrf.mxu1 }
 0x527   :  { %v1548_v61 = vadd.f32 %v1496_v38, %v3872_v1  ;;  %v3878_v38 = vld [vmem:[#allocation27_spill] sm:$0xff] }
 0x528   :  { %v1498_v7 = vpop.f32.mrf.mxu0  ;;  %v1541_v18 = vpop.f32.mrf.mxu1  ;;  %v1550_v1 = vadd.f32 %v1539_v32, %v3878_v38 }
 0x529   :  { %v1556_v30 = vsub.f32 0.0, %v1548_v61  ;;  %v1549_v35 = vadd.f32 %v1498_v7, %v3873_v17  ;;  %v1551_v19 = vadd.f32 %v1541_v18, %v3876_v26  ;;  %v3879_v61 = vld [vmem:[#allocation31_spill] sm:$0xff] }
 0x52a   :  { %v1500_v9 = vpop.f32.mrf.mxu0  ;;  %v1543_v41 = vpop.f32.mrf.mxu1 }
 0x52b   :  { %v1558_v10 = vmul.f32 1.442695, %v1556_v30  ;;  %v1568_v29 = vsub.f32 0.0, %v1549_v35  ;;  %v1552_v13 = vadd.f32 %v1500_v9, %v3874_v52  ;;  %v1582_v43 = vsub.f32 0.0, %v1551_v19 }
 0x52c   :  { %v1502_v31 = vpop.f32.mrf.mxu0  ;;  %v1545_v20 = vpop.f32.mrf.mxu1  ;;  %v1554_v7 = vadd.f32 %v1543_v41, %v3879_v61 }
 0x52d   :  { %2527 = vpow2.f32 %v1558_v10  ;;  %v1570_v39 = vmul.f32 1.442695, %v1568_v29  ;;  %v1557_v40 = vsub.f32 0.0, %v1552_v13  ;;  %v1553_v44 = vadd.f32 %v1502_v31, %v3875_v42 }
 0x52e   :  { %v1555_v34 = vadd.f32 %v1545_v20, %v3877_v22  ;;  %v1584_v35 = vmul.f32 1.442695, %v1582_v43 }
 0x52f   :  { %2529 = vpow2.f32 %v1570_v39  ;;  %v1560_v45 = vmul.f32 1.442695, %v1557_v40  ;;  %v1569_v11 = vsub.f32 0.0, %v1553_v44 }
 0x530   :  { %v1583_v30 = vsub.f32 0.0, %v1555_v34 }
 0x531   :  { %2531 = vpow2.f32 %v1560_v45  ;;  %v1572_v33 = vmul.f32 1.442695, %v1569_v11 }
 0x532   :  { %v1586_v29 = vmul.f32 1.442695, %v1583_v30 }
 0x533   :  { %2533 = vpow2.f32 %v1572_v33 }
 0x534   :  { %2535 = vtanh.f32 %v1550_v1 }
 0x535   :  { %2537 = vtanh.f32 %v1554_v7 }
 0x53a   :  { %v2528_v17 = vpop.eup %2527 }
 0x53b   :  { %v1562_v9 = vadd.f32 1.0, %v2528_v17 }
 0x53c   :  { %v2530_v10 = vpop.eup %2529 }
 0x53d   :  { %2539 = vrcp.f32 %v1562_v9  ;;  %v1574_v52 = vadd.f32 1.0, %v2530_v10 }
 0x53e   :  { %v2532_v18 = vpop.eup %2531  ;;  %2541 = vpow2.f32 %v1584_v35 }
 0x53f   :  { %2543 = vrcp.f32 %v1574_v52  ;;  %v1563_v13 = vadd.f32 1.0, %v2532_v18 }
 0x540   :  { %2545 = vpow2.f32 %v1586_v29  ;;  %v2534_v31 = vpop.eup %2533  ;;  %v3880_v29 = vld [vmem:[#allocation34_spill] sm:$0xff] }
 0x541   :  { %2547 = vrcp.f32 %v1563_v13  ;;  %v1575_v32 = vadd.f32 1.0, %v2534_v31  ;;  %v2536_v39 = vpop.eup %2535  ;;  %v3881_v31 = vld [vmem:[#allocation36_spill] sm:$0xff] }
 0x542   :  { %v2538_v40 = vpop.eup %2537 }
 0x543   :  { %2549 = vrcp.f32 %v1575_v32 }
 0x54a   :  { %v2540_v41 = vpop.eup %2539 }
 0x54b   :  { %v2542_v42 = vpop.eup %2541  ;;  %v1596_v44 = vmul.f32 %v2540_v41, %v2536_v39 }
 0x54c   :  { %v2544_v45 = vpop.eup %2543  ;;  %v1588_v33 = vadd.f32 1.0, %v2542_v42 }
 0x54d   :  { %v2546_v11 = vpop.eup %2545  ;;  %v1594_v20 = vmul.f32 %v2544_v45, %v3610_v24 }
 0x54e   :  { %v2548_v26 = vpop.eup %2547  ;;  %v1589_v43 = vadd.f32 1.0, %v2546_v11  ;;  %2551 = vrcp.f32 %v1588_v33 }
 0x54f   :  { %v3663_v19 = vadd.f32 %v1596_v44, %v1594_v20  ;;  %v1597_v22 = vmul.f32 %v2548_v26, %v2538_v40  ;;  %v3882_v44 = vld [vmem:[#allocation38_spill] sm:$0xff] }
 0x550   :  { %v2550_v34 = vpop.eup %2549 }
 0x551   :  { %v1595_v38 = vmul.f32 %v2550_v34, %v3613_v23  ;;  %2553 = vtanh.f32 %v3663_v19 }
 0x552   :  { %2555 = vrcp.f32 %v1589_v43 }
 0x553   :  { %v3666_v1 = vadd.f32 %v1597_v22, %v1595_v38  ;;  %v3884_v38 = vld [vmem:[#allocation37_spill] sm:$0xff] }
 0x555   :  { %2557 = vtanh.f32 %v3666_v1 }
 0x55b   :  { %v2552_v61 = vpop.eup %2551 }
 0x55e   :  { %v2554_v7 = vpop.eup %2553 }
 0x55f   :  { %v2556_v24 = vpop.eup %2555  ;;  %v1602_v17 = vmul.f32 %v2554_v7, %v2552_v61 }
 0x562   :  { %v2558_v30 = vpop.eup %2557 }
 0x563   :  { %v1603_v35 = vmul.f32 %v2558_v30, %v2556_v24  ;;  %v3885_v24 = vld [vmem:[#allocation41_spill] sm:$0xff] }
 0x565   :  { %v1604_v9 = vpack.c.bf16 %v1603_v35, %v1602_v17  ;;  %v3886_v35 = vld [vmem:[#allocation35_spill] sm:$0xff] }
 0x567   :  { %2289 = vst [vmem:[%s3794_s4 + $0x20] sm:$0xff] %v1604_v9   ;;  %1659 = vmatmul.mubr.bf16.vlgmr.msra.gmra.mxu0 %v1604_v9  ;;  %1702 = vmatmul.mubr.bf16.vlgmr.msra.gmra.mxu1 %v1604_v9 }
 0x568   :  { %1791 = vmatpush1.bf16.msra.mxu0 %v3420_v16  ;;  %1834 = vmatpush1.bf16.msra.mxu1 %v3426_v46 }
 0x569   :  { %1792 = vmatprep.subr.bf16.mxu0 %v3432_v47  ;;  %1835 = vmatprep.subr.bf16.mxu1 %v3438_v48 }
 0x56a   :  { %1822 = vmatprep.mubr.bf16.mxu0 %v3850_v25  ;;  %1865 = vmatprep.mubr.bf16.mxu1 %v3850_v25 }
 0x56c   :  { %1793 = vmatpush1.bf16.msra.mxu0 %v3446_v49  ;;  %1836 = vmatpush1.bf16.msra.mxu1 %v3452_v50 }
 0x56d   :  { %1794 = vmatprep.subr.bf16.mxu0 %v3458_v51  ;;  %1837 = vmatprep.subr.bf16.mxu1 %v3464_v53 }
 0x570   :  { %1795 = vmatpush1.bf16.msra.mxu0 %v3470_v54  ;;  %1838 = vmatpush1.bf16.msra.mxu1 %v3476_v55 }
 0x571   :  { %1796 = vmatprep.subr.bf16.mxu0 %v3482_v56  ;;  %1839 = vmatprep.subr.bf16.mxu1 %v3488_v57 }
 0x574   :  { %1797 = vmatpush1.bf16.msra.mxu0 %v3494_v58  ;;  %1840 = vmatpush1.bf16.msra.mxu1 %v3500_v59 }
 0x575   :  { %1798 = vmatprep.subr.bf16.mxu0 %v3506_v60  ;;  %1841 = vmatprep.subr.bf16.mxu1 %v3512_v62 }
 0x578   :  { %1799 = vmatpush1.bf16.msra.mxu0 %v3518_v63  ;;  %1842 = vmatpush1.bf16.msra.mxu1 %v3524_v0 }
 0x579   :  { %1800 = vmatprep.subr.bf16.mxu0 %v3530_v2  ;;  %1843 = vmatprep.subr.bf16.mxu1 %v3536_v3 }
 0x57c   :  { %1801 = vmatpush1.bf16.msra.mxu0 %v3542_v4  ;;  %1844 = vmatpush1.bf16.msra.mxu1 %v3548_v5 }
 0x57d   :  { %1802 = vmatprep.subr.bf16.mxu0 %v3554_v6  ;;  %1845 = vmatprep.subr.bf16.mxu1 %v3560_v14 }
 0x580   :  { %1803 = vmatpush1.bf16.msra.mxu0 %v3566_v8  ;;  %1846 = vmatpush1.bf16.msra.mxu1 %v3572_v21 }
 0x581   :  { %1804 = vmatprep.subr.bf16.mxu0 %v3578_v27  ;;  %1847 = vmatprep.subr.bf16.mxu1 %v3584_v12 }
 0x584   :  { %1805 = vmatpush1.bf16.msra.mxu0 %v3590_v28  ;;  %1848 = vmatpush1.bf16.msra.mxu1 %v3596_v15 }
 0x585   :  { %1954 = vmatprep.subr.bf16.mxu0 %v3389_v36  ;;  %1997 = vmatprep.subr.bf16.mxu1 %v3395_v37  ;;  %v3883_v37 = vld [vmem:[#allocation40_spill] sm:$0xff] }
 0x627   :  { %v1660_v23 = vpop.f32.mrf.mxu0  ;;  %v1703_v10 = vpop.f32.mrf.mxu1 }
 0x628   :  { %v1712_v52 = vadd.f32 %v1660_v23, %v3880_v29  ;;  %v1714_v9 = vadd.f32 %v1703_v10, %v3886_v35  ;;  %v3887_v23 = vld [vmem:[#allocation39_spill] sm:$0xff] }
 0x629   :  { %v1662_v18 = vpop.f32.mrf.mxu0  ;;  %v1705_v39 = vpop.f32.mrf.mxu1 }
 0x62a   :  { %v1720_v13 = vsub.f32 0.0, %v1712_v52  ;;  %v1713_v32 = vadd.f32 %v1662_v18, %v3881_v31  ;;  %v1715_v61 = vadd.f32 %v1705_v39, %v3884_v38 }
 0x62b   :  { %v1664_v40 = vpop.f32.mrf.mxu0  ;;  %v1707_v26 = vpop.f32.mrf.mxu1 }
 0x62c   :  { %v1722_v41 = vmul.f32 1.442695, %v1720_v13  ;;  %v1732_v42 = vsub.f32 0.0, %v1713_v32  ;;  %v1716_v45 = vadd.f32 %v1664_v40, %v3882_v44  ;;  %v1746_v17 = vsub.f32 0.0, %v1715_v61 }
 0x62d   :  { %v1666_v11 = vpop.f32.mrf.mxu0  ;;  %v1709_v43 = vpop.f32.mrf.mxu1  ;;  %v1718_v29 = vadd.f32 %v1707_v26, %v3887_v23 }
 0x62e   :  { %2559 = vpow2.f32 %v1722_v41  ;;  %v1734_v20 = vmul.f32 1.442695, %v1732_v42  ;;  %v1721_v36 = vsub.f32 0.0, %v1716_v45  ;;  %v1717_v33 = vadd.f32 %v1666_v11, %v3883_v37 }
 0x62f   :  { %v1719_v30 = vadd.f32 %v1709_v43, %v3885_v24  ;;  %v1748_v13 = vmul.f32 1.442695, %v1746_v17 }
 0x630   :  { %2561 = vpow2.f32 %v1734_v20  ;;  %v1724_v22 = vmul.f32 1.442695, %v1721_v36  ;;  %v1733_v34 = vsub.f32 0.0, %v1717_v33 }
 0x631   :  { %v1747_v52 = vsub.f32 0.0, %v1719_v30 }
 0x632   :  { %2563 = vpow2.f32 %v1724_v22  ;;  %v1736_v7 = vmul.f32 1.442695, %v1733_v34 }
 0x633   :  { %v1750_v40 = vmul.f32 1.442695, %v1747_v52 }
 0x634   :  { %2565 = vpow2.f32 %v1736_v7 }
 0x635   :  { %2567 = vtanh.f32 %v1714_v9 }
 0x636   :  { %2569 = vtanh.f32 %v1718_v29 }
 0x63b   :  { %v2560_v18 = vpop.eup %2559 }
 0x63c   :  { %v1726_v31 = vadd.f32 1.0, %v2560_v18 }
 0x63d   :  { %v2562_v32 = vpop.eup %2561 }
 0x63e   :  { %2571 = vrcp.f32 %v1726_v31  ;;  %v1738_v41 = vadd.f32 1.0, %v2562_v32 }
 0x63f   :  { %v2564_v39 = vpop.eup %2563  ;;  %2573 = vpow2.f32 %v1748_v13 }
 0x640   :  { %2575 = vrcp.f32 %v1738_v41  ;;  %v1727_v42 = vadd.f32 1.0, %v2564_v39 }
 0x641   :  { %2577 = vpow2.f32 %v1750_v40  ;;  %v2566_v44 = vpop.eup %2565 }
 0x642   :  { %2579 = vrcp.f32 %v1727_v42  ;;  %v1739_v10 = vadd.f32 1.0, %v2566_v44  ;;  %v2568_v45 = vpop.eup %2567 }
 0x643   :  { %v2570_v11 = vpop.eup %2569 }
 0x644   :  { %2581 = vrcp.f32 %v1739_v10 }
 0x64b   :  { %v2572_v20 = vpop.eup %2571 }
 0x64c   :  { %v2574_v36 = vpop.eup %2573  ;;  %v1760_v26 = vmul.f32 %v2572_v20, %v2568_v45 }
 0x64d   :  { %v2576_v37 = vpop.eup %2575  ;;  %v1752_v38 = vadd.f32 1.0, %v2574_v36 }
 0x64e   :  { %v2578_v33 = vpop.eup %2577  ;;  %v1758_v22 = vmul.f32 %v2576_v37, %v3663_v19 }
 0x64f   :  { %v2580_v34 = vpop.eup %2579  ;;  %v1753_v24 = vadd.f32 1.0, %v2578_v33  ;;  %2583 = vrcp.f32 %v1752_v38 }
 0x650   :  { %v3716_v43 = vadd.f32 %v1760_v26, %v1758_v22  ;;  %v1761_v61 = vmul.f32 %v2580_v34, %v2570_v11 }
 0x651   :  { %v2582_v7 = vpop.eup %2581 }
 0x652   :  { %v1759_v30 = vmul.f32 %v2582_v7, %v3666_v1  ;;  %2585 = vtanh.f32 %v3716_v43  ;;  %v3895_v1 = vld [vmem:[#allocation47_spill] sm:$0xff] }
 0x653   :  { %2587 = vrcp.f32 %v1753_v24 }
 0x654   :  { %v3719_v17 = vadd.f32 %v1761_v61, %v1759_v30 }
 0x656   :  { %2589 = vtanh.f32 %v3719_v17 }
 0x65c   :  { %v2584_v35 = vpop.eup %2583 }
 0x65f   :  { %v2586_v9 = vpop.eup %2585 }
 0x660   :  { %v2588_v19 = vpop.eup %2587  ;;  %v1766_v29 = vmul.f32 %v2586_v9, %v2584_v35 }
 0x663   :  { %v2590_v23 = vpop.eup %2589 }
 0x664   :  { %v1767_v52 = vmul.f32 %v2590_v23, %v2588_v19 }
 0x666   :  { %v1768_v18 = vpack.c.bf16 %v1767_v52, %v1766_v29 }
 0x668   :  { %2290 = vst [vmem:[%s3794_s4 + $0x28] sm:$0xff] %v1768_v18   ;;  %1823 = vmatmul.mubr.bf16.vlgmr.msra.gmra.mxu0 %v1768_v18  ;;  %1866 = vmatmul.mubr.bf16.vlgmr.msra.gmra.mxu1 %v1768_v18 }
 0x669   :  { %1955 = vmatpush1.bf16.msra.mxu0 %v3420_v16  ;;  %1998 = vmatpush1.bf16.msra.mxu1 %v3426_v46  ;;  %v3888_v46 = vld [vmem:[#allocation42_spill] sm:$0xff] }
 0x66a   :  { %1956 = vmatprep.subr.bf16.mxu0 %v3432_v47  ;;  %1999 = vmatprep.subr.bf16.mxu1 %v3438_v48 }
 0x66b   :  { %1986 = vmatprep.mubr.bf16.mxu0 %v3850_v25  ;;  %2029 = vmatprep.mubr.bf16.mxu1 %v3850_v25 }
 0x66d   :  { %1957 = vmatpush1.bf16.msra.mxu0 %v3446_v49  ;;  %2000 = vmatpush1.bf16.msra.mxu1 %v3452_v50  ;;  %v3889_v50 = vld [vmem:[#allocation44_spill] sm:$0xff] }
 0x66e   :  { %1958 = vmatprep.subr.bf16.mxu0 %v3458_v51  ;;  %2001 = vmatprep.subr.bf16.mxu1 %v3464_v53 }
 0x671   :  { %1959 = vmatpush1.bf16.msra.mxu0 %v3470_v54  ;;  %2002 = vmatpush1.bf16.msra.mxu1 %v3476_v55 }
 0x672   :  { %1960 = vmatprep.subr.bf16.mxu0 %v3482_v56  ;;  %2003 = vmatprep.subr.bf16.mxu1 %v3488_v57  ;;  %v3890_v57 = vld [vmem:[#allocation46_spill] sm:$0xff] }
 0x675   :  { %1961 = vmatpush1.bf16.msra.mxu0 %v3494_v58  ;;  %2004 = vmatpush1.bf16.msra.mxu1 %v3500_v59 }
 0x676   :  { %1962 = vmatprep.subr.bf16.mxu0 %v3506_v60  ;;  %2005 = vmatprep.subr.bf16.mxu1 %v3512_v62 }
 0x679   :  { %1963 = vmatpush1.bf16.msra.mxu0 %v3518_v63  ;;  %2006 = vmatpush1.bf16.msra.mxu1 %v3524_v0  ;;  %v3891_v0 = vld [vmem:[#allocation48_spill] sm:$0xff] }
 0x67a   :  { %1964 = vmatprep.subr.bf16.mxu0 %v3530_v2  ;;  %2007 = vmatprep.subr.bf16.mxu1 %v3536_v3 }
 0x67d   :  { %1965 = vmatpush1.bf16.msra.mxu0 %v3542_v4  ;;  %2008 = vmatpush1.bf16.msra.mxu1 %v3548_v5 }
 0x67e   :  { %1966 = vmatprep.subr.bf16.mxu0 %v3554_v6  ;;  %2009 = vmatprep.subr.bf16.mxu1 %v3560_v14  ;;  %v3892_v6 = vld [vmem:[#allocation45_spill] sm:$0xff] }
 0x681   :  { %1967 = vmatpush1.bf16.msra.mxu0 %v3566_v8  ;;  %2010 = vmatpush1.bf16.msra.mxu1 %v3572_v21  ;;  %v3893_v21 = vld [vmem:[#allocation49_spill] sm:$0xff] }
 0x682   :  { %1968 = vmatprep.subr.bf16.mxu0 %v3578_v27  ;;  %2011 = vmatprep.subr.bf16.mxu1 %v3584_v12 }
 0x685   :  { %1969 = vmatpush1.bf16.msra.mxu0 %v3590_v28  ;;  %2012 = vmatpush1.bf16.msra.mxu1 %v3596_v15  ;;  %v3894_v28 = vld [vmem:[#allocation43_spill] sm:$0xff] }
 0x728   :  { %v1824_v25 = vpop.f32.mrf.mxu0  ;;  %v1867_v16 = vpop.f32.mrf.mxu1 }
 0x729   :  { %v1876_v47 = vadd.f32 %v1824_v25, %v3888_v46  ;;  %v1878_v15 = vadd.f32 %v1867_v16, %v3894_v28 }
 0x72a   :  { %v1826_v48 = vpop.f32.mrf.mxu0  ;;  %v1869_v53 = vpop.f32.mrf.mxu1 }
 0x72b   :  { %v1884_v49 = vsub.f32 0.0, %v1876_v47  ;;  %v1877_v51 = vadd.f32 %v1826_v48, %v3889_v50  ;;  %v1879_v14 = vadd.f32 %v1869_v53, %v3892_v6 }
 0x72c   :  { %v1828_v54 = vpop.f32.mrf.mxu0  ;;  %v1871_v63 = vpop.f32.mrf.mxu1 }
 0x72d   :  { %v1886_v55 = vmul.f32 1.442695, %v1884_v49  ;;  %v1896_v56 = vsub.f32 0.0, %v1877_v51  ;;  %v1880_v58 = vadd.f32 %v1828_v54, %v3890_v57  ;;  %v1910_v12 = vsub.f32 0.0, %v1879_v14  ;;  %v3896_v49 = vld [vmem:[#allocation50_spill] sm:$0xff]  ;;  %v3897_v54 = vld [vmem:[#allocation52_spill] sm:$0xff] }
 0x72e   :  { %v1830_v59 = vpop.f32.mrf.mxu0  ;;  %v1873_v5 = vpop.f32.mrf.mxu1  ;;  %v1882_v13 = vadd.f32 %v1871_v63, %v3895_v1  ;;  %v3900_v14 = vld [vmem:[#allocation53_spill] sm:$0xff] }
 0x72f   :  { %2591 = vpow2.f32 %v1886_v55  ;;  %v1898_v60 = vmul.f32 1.442695, %v1896_v56  ;;  %v1885_v62 = vsub.f32 0.0, %v1880_v58  ;;  %v1881_v2 = vadd.f32 %v1830_v59, %v3891_v0 }
 0x730   :  { %v1883_v27 = vadd.f32 %v1873_v5, %v3893_v21  ;;  %v1912_v40 = vmul.f32 1.442695, %v1910_v12 }
 0x731   :  { %2593 = vpow2.f32 %v1898_v60  ;;  %v1888_v3 = vmul.f32 1.442695, %v1885_v62  ;;  %v1897_v4 = vsub.f32 0.0, %v1881_v2  ;;  %v3898_v60 = vld [vmem:[#allocation54_spill] sm:$0xff] }
 0x732   :  { %v1911_v31 = vsub.f32 0.0, %v1883_v27 }
 0x733   :  { %2595 = vpow2.f32 %v1888_v3  ;;  %v1900_v8 = vmul.f32 1.442695, %v1897_v4  ;;  %v3899_v4 = vld [vmem:[#allocation56_spill] sm:$0xff] }
 0x734   :  { %v1914_v42 = vmul.f32 1.442695, %v1911_v31 }
 0x735   :  { %2597 = vpow2.f32 %v1900_v8 }
 0x736   :  { %2599 = vtanh.f32 %v1878_v15  ;;  %v3901_v15 = vld [vmem:[#allocation57_spill] sm:$0xff] }
 0x737   :  { %2601 = vtanh.f32 %v1882_v13  ;;  %v3902_v13 = vld [vmem:[#allocation51_spill] sm:$0xff] }
 0x73c   :  { %v2592_v32 = vpop.eup %2591 }
 0x73d   :  { %v1890_v41 = vadd.f32 1.0, %v2592_v32 }
 0x73e   :  { %v2594_v39 = vpop.eup %2593 }
 0x73f   :  { %2603 = vrcp.f32 %v1890_v41  ;;  %v1902_v44 = vadd.f32 1.0, %v2594_v39  ;;  %v3903_v39 = vld [vmem:[#allocation55_spill] sm:$0xff] }
 0x740   :  { %v2596_v10 = vpop.eup %2595  ;;  %2605 = vpow2.f32 %v1912_v40 }
 0x741   :  { %2607 = vrcp.f32 %v1902_v44  ;;  %v1891_v45 = vadd.f32 1.0, %v2596_v10 }
 0x742   :  { %2609 = vpow2.f32 %v1914_v42  ;;  %v2598_v11 = vpop.eup %2597 }
 0x743   :  { %2611 = vrcp.f32 %v1891_v45  ;;  %v1903_v20 = vadd.f32 1.0, %v2598_v11  ;;  %v2600_v36 = vpop.eup %2599 }
 0x744   :  { %v2602_v26 = vpop.eup %2601 }
 0x745   :  { %2613 = vrcp.f32 %v1903_v20 }
 0x74c   :  { %v2604_v37 = vpop.eup %2603 }
 0x74d   :  { %v2606_v33 = vpop.eup %2605  ;;  %v1924_v22 = vmul.f32 %v2604_v37, %v2600_v36 }
 0x74e   :  { %v2608_v34 = vpop.eup %2607  ;;  %v1916_v30 = vadd.f32 1.0, %v2606_v33 }
 0x74f   :  { %v2610_v38 = vpop.eup %2609  ;;  %v1922_v61 = vmul.f32 %v2608_v34, %v3716_v43 }
 0x750   :  { %v2612_v7 = vpop.eup %2611  ;;  %v1917_v19 = vadd.f32 1.0, %v2610_v38  ;;  %2615 = vrcp.f32 %v1916_v30 }
 0x751   :  { %v3767_v24 = vadd.f32 %v1924_v22, %v1922_v61  ;;  %v1925_v35 = vmul.f32 %v2612_v7, %v2602_v26 }
 0x752   :  { %v2614_v9 = vpop.eup %2613 }
 0x753   :  { %v1923_v23 = vmul.f32 %v2614_v9, %v3719_v17  ;;  %2617 = vtanh.f32 %v3767_v24 }
 0x754   :  { %2619 = vrcp.f32 %v1917_v19 }
 0x755   :  { %v3770_v29 = vadd.f32 %v1925_v35, %v1923_v23 }
 0x757   :  { %2621 = vtanh.f32 %v3770_v29 }
 0x75d   :  { %v2616_v52 = vpop.eup %2615 }
 0x760   :  { %v2618_v18 = vpop.eup %2617 }
 0x761   :  { %v2620_v43 = vpop.eup %2619  ;;  %v1930_v16 = vmul.f32 %v2618_v18, %v2616_v52 }
 0x764   :  { %v2622_v25 = vpop.eup %2621 }
 0x765   :  { %v1931_v46 = vmul.f32 %v2622_v25, %v2620_v43 }
 0x767   :  { %v1932_v47 = vpack.c.bf16 %v1931_v46, %v1930_v16 }
 0x769   :  { %2291 = vst [vmem:[%s3794_s4 + $0x30] sm:$0xff] %v1932_v47   ;;  %1987 = vmatmul.mubr.bf16.vlgmr.msra.gmra.mxu0 %v1932_v47  ;;  %2030 = vmatmul.mubr.bf16.vlgmr.msra.gmra.mxu1 %v1932_v47 }
 0x829   :  { %v1988_v17 = vpop.f32.mrf.mxu0  ;;  %v2031_v48 = vpop.f32.mrf.mxu1 }
 0x82a   :  { %v2040_v50 = vadd.f32 %v1988_v17, %v3896_v49  ;;  %v2042_v31 = vadd.f32 %v2031_v48, %v3902_v13 }
 0x82b   :  { %v1990_v51 = vpop.f32.mrf.mxu0  ;;  %v2033_v56 = vpop.f32.mrf.mxu1 }
 0x82c   :  { %v2048_v53 = vsub.f32 0.0, %v2040_v50  ;;  %v2041_v55 = vadd.f32 %v1990_v51, %v3897_v54  ;;  %v2043_v8 = vadd.f32 %v2033_v56, %v3900_v14 }
 0x82d   :  { %v1992_v57 = vpop.f32.mrf.mxu0  ;;  %v2035_v3 = vpop.f32.mrf.mxu1 }
 0x82e   :  { %v2050_v58 = vmul.f32 1.442695, %v2048_v53  ;;  %v2060_v59 = vsub.f32 0.0, %v2041_v55  ;;  %v2044_v62 = vadd.f32 %v1992_v57, %v3898_v60  ;;  %v2074_v28 = vsub.f32 0.0, %v2043_v8 }
 0x82f   :  { %v1994_v63 = vpop.f32.mrf.mxu0  ;;  %v2037_v27 = vpop.f32.mrf.mxu1  ;;  %v2046_v42 = vadd.f32 %v2035_v3, %v3903_v39 }
 0x830   :  { %2623 = vpow2.f32 %v2050_v58  ;;  %v2062_v0 = vmul.f32 1.442695, %v2060_v59  ;;  %v2049_v2 = vsub.f32 0.0, %v2044_v62  ;;  %v2045_v5 = vadd.f32 %v1994_v63, %v3899_v4 }
 0x831   :  { %v2047_v1 = vadd.f32 %v2037_v27, %v3901_v15  ;;  %v2076_v32 = vmul.f32 1.442695, %v2074_v28 }
 0x832   :  { %2625 = vpow2.f32 %v2062_v0  ;;  %v2052_v6 = vmul.f32 1.442695, %v2049_v2  ;;  %v2061_v21 = vsub.f32 0.0, %v2045_v5 }
 0x833   :  { %v2075_v40 = vsub.f32 0.0, %v2047_v1 }
 0x834   :  { %2627 = vpow2.f32 %v2052_v6  ;;  %v2064_v12 = vmul.f32 1.442695, %v2061_v21 }
 0x835   :  { %v2078_v45 = vmul.f32 1.442695, %v2075_v40 }
 0x836   :  { %2629 = vpow2.f32 %v2064_v12 }
 0x837   :  { %2631 = vtanh.f32 %v2042_v31 }
 0x838   :  { %2633 = vpow2.f32 %v2076_v32 }
 0x83d   :  { %v2624_v41 = vpop.eup %2623 }
 0x83e   :  { %v2054_v44 = vadd.f32 1.0, %v2624_v41 }
 0x83f   :  { %v2626_v10 = vpop.eup %2625 }
 0x840   :  { %2635 = vrcp.f32 %v2054_v44  ;;  %v2066_v11 = vadd.f32 1.0, %v2626_v10 }
 0x841   :  { %v2628_v20 = vpop.eup %2627  ;;  %2637 = vtanh.f32 %v2046_v42 }
 0x842   :  { %2639 = vrcp.f32 %v2066_v11  ;;  %v2055_v36 = vadd.f32 1.0, %v2628_v20 }
 0x843   :  { %2641 = vpow2.f32 %v2078_v45  ;;  %v2630_v26 = vpop.eup %2629 }
 0x844   :  { %2643 = vrcp.f32 %v2055_v36  ;;  %v2067_v37 = vadd.f32 1.0, %v2630_v26  ;;  %v2632_v33 = vpop.eup %2631 }
 0x845   :  { %v2634_v22 = vpop.eup %2633 }
 0x846   :  { %2645 = vrcp.f32 %v2067_v37  ;;  %v2080_v30 = vadd.f32 1.0, %v2634_v22 }
 0x848   :  { %2647 = vrcp.f32 %v2080_v30 }
 0x84d   :  { %v2636_v34 = vpop.eup %2635 }
 0x84e   :  { %v2638_v38 = vpop.eup %2637  ;;  %v2088_v61 = vmul.f32 %v2636_v34, %v2632_v33 }
 0x84f   :  { %v2640_v7 = vpop.eup %2639 }
 0x850   :  { %v2642_v35 = vpop.eup %2641  ;;  %v2086_v9 = vmul.f32 %v2640_v7, %v3767_v24 }
 0x851   :  { %v2644_v19 = vpop.eup %2643  ;;  %v2081_v43 = vadd.f32 1.0, %v2642_v35 }
 0x852   :  { %v2090_v23 = vadd.f32 %v2088_v61, %v2086_v9  ;;  %v2089_v52 = vmul.f32 %v2644_v19, %v2638_v38 }
 0x853   :  { %v2646_v18 = vpop.eup %2645 }
 0x854   :  { %2649 = vtanh.f32 %v2090_v23  ;;  %v2087_v25 = vmul.f32 %v2646_v18, %v3770_v29 }
 0x855   :  { %2651 = vrcp.f32 %v2081_v43  ;;  %v2648_v46 = vpop.eup %2647 }
 0x856   :  { %v2091_v16 = vadd.f32 %v2089_v52, %v2087_v25 }
 0x858   :  { %2653 = vtanh.f32 %v2091_v16 }
 0x861   :  { %v2650_v47 = vpop.eup %2649 }
 0x862   :  { %v2094_v17 = vmul.f32 %v2650_v47, %v2648_v46  ;;  %v2652_v48 = vpop.eup %2651 }
 0x865   :  { %v2654_v49 = vpop.eup %2653 }
 0x866   :  { %v2095_v50 = vmul.f32 %v2654_v49, %v2652_v48 }
 0x868   :  { %v2279_v51 = vpack.c.bf16 %v2095_v50, %v2094_v17 }
 0x86a   :  { %2292 = vst [vmem:[%s3794_s4 + $0x38] sm:$0xff] %v2279_v51   ;;  %2285 = vst [vmem:[#allocation3] sm:$0xff] %v2279_v51  }

// kernel: lstm_model_pallas.3
= control target key start
LH: loop header
LB: loop body
LE: loop exit
PB: predicated region body
PF: predicated region fallthrough
CT: control target
= control target key end

     0   :  { %9 = vsyncpa [#allocation6], 0  ;;  %s3590_s0 = inlined_call_operand.vmem [shape: bf16[8,16,128], index: 0, kind: input, shape index: {}]   ;;  %s3591_s1 = inlined_call_operand.hbm [shape: bf16[128,512], index: 1, kind: input, shape index: {}]   ;;  %s3592_s2 = inlined_call_operand.hbm [shape: bf16[128,512], index: 2, kind: input, shape index: {}]   ;;  %s3593_s3 = inlined_call_operand.vmem [shape: f32[1,512], index: 3, kind: input, shape index: {}]   ;;  %s3594_s4 = inlined_call_operand.vmem [shape: bf16[8,16,128], index: 4, kind: output, shape index: {}]  }
   0x1   :  { %10 = vsyncpa [#allocation8], 0  ;;  %s2765_s15 = smov [#allocation5]  }
   0x2   :  { %s18_s16 = sshll.u32 %s2765_s15, 4  ;;  %s19_s16 = int_to_ptr.vmem [resolvable:$true] %s18_s16 }
   0x3   :  { %s2729_s17 = scalar_lea.vmem %s19_s16, 4096  ;;  %p2734_p1 = scmp.lt.s32.totalorder %s19_s16, %s19_s16 }
   0x4   :  { %p2730_p0 = scmp.ne.s32.totalorder %s19_s16, %s2729_s17  ;;  %p2735_p2 = scmp.lt.s32.totalorder %s2729_s17, %s2729_s17 }
   0x6   :  { %p2736_p3 = por %p2735_p2, %p2734_p1 }
   0x8   :  { %p2737_p4 = pnand %p2736_p3, %p2730_p0 }
   0xa   :  { %2740 = shalt.err (!%p2737_p4)
}
   0xb   :  { %s2766_s18 = smov 256   ;;  %s2767_s19 = smov 16  }
   0xc   :  { %24 = dma.hbm_to_vmem [thread:$0]  %s3591_s1, 4096, %s19_s16, [#allocation6], %s2766_s18, %s2766_s18, %s2767_s19  }
   0xd   :  { %s2768_s22 = smov [#allocation7]  }
   0xe   :  { %s30_s23 = sshll.u32 %s2768_s22, 4  ;;  %s31_s23 = int_to_ptr.vmem [resolvable:$true] %s30_s23 }
   0xf   :  { %s2749_s24 = scalar_lea.vmem %s31_s23, 4096  ;;  %p2754_p6 = scmp.lt.s32.totalorder %s31_s23, %s31_s23 }
  0x10   :  { %p2750_p5 = scmp.ne.s32.totalorder %s31_s23, %s2749_s24  ;;  %p2755_p7 = scmp.lt.s32.totalorder %s2749_s24, %s2749_s24 }
  0x12   :  { %p2756_p8 = por %p2755_p7, %p2754_p6 }
  0x14   :  { %p2757_p9 = pnand %p2756_p8, %p2750_p5 }
  0x16   :  { %2760 = shalt.err (!%p2757_p9)
}
  0x17   :  { %36 = dma.hbm_to_vmem [thread:$0]  %s3592_s2, 4096, %s31_s23, [#allocation8], %s2766_s18, %s2766_s18, %s2767_s19  }
  0x18   :  { %2761 = dma.done.wait [#allocation6], 4096  }
  0x19   :  { %2762 = vsyncadd [#allocation6], 4294963200 }
  0x1a   :  { %2763 = dma.done.wait [#allocation8], 4096  }
  0x1b   :  { %2764 = vsyncadd [#allocation8], 4294963200  ;;  %v3595_v0 = vmov 0   ;;  %v2328_v1 = vld [vmem:[#allocation5 + $0xe4] ss:$16 sps:$4 sm:$0xff]   ;;  %v2376_v35 = vld [vmem:[%s3590_s0] sm:$0xff]  }
  0x1c   :  { %364 = vmatprep.mubr.bf16.mxu0 %v3595_v0  ;;  %50 = vst [vmem:[#allocation3] sm:$0xf] %v3595_v0  ;;  %51 = vst [vmem:[#allocation3 + $0x4] sm:$0xf] %v3595_v0  ;;  %477 = vmatprep.mubr.bf16.mxu1 %v3595_v0  ;;  %v2330_v2 = vld [vmem:[#allocation5 + $0xec] ss:$16 sps:$4 sm:$0xff]  }
  0x1d   :  { %332 = vmatprep.subr.bf16.mxu0 %v2328_v1  ;;  %v2332_v3 = vld [vmem:[#allocation5 + $0xe0] ss:$16 sps:$4 sm:$0xff]   ;;  %v2333_v4 = vld [vmem:[#allocation5 + $0xe8] ss:$16 sps:$4 sm:$0xff]   ;;  %445 = vmatprep.subr.bf16.mxu1 %v2330_v2  ;;  %v2334_v5 = vld [vmem:[#allocation5 + $0xc4] ss:$16 sps:$4 sm:$0xff]  }
  0x1e   :  { %333 = vmatpush1.bf16.msra.mxu0 %v2332_v3  ;;  %446 = vmatpush1.bf16.msra.mxu1 %v2333_v4  ;;  %v2336_v6 = vld [vmem:[#allocation5 + $0xcc] ss:$16 sps:$4 sm:$0xff]   ;;  %v2338_v7 = vld [vmem:[#allocation5 + $0xc0] ss:$16 sps:$4 sm:$0xff]   ;;  %v2339_v8 = vld [vmem:[#allocation5 + $0xc8] ss:$16 sps:$4 sm:$0xff]  }
  0x1f   :  { %334 = vmatprep.subr.bf16.mxu0 %v2334_v5  ;;  %447 = vmatprep.subr.bf16.mxu1 %v2336_v6  ;;  %v2340_v9 = vld [vmem:[#allocation5 + $0xa4] ss:$16 sps:$4 sm:$0xff]   ;;  %v2342_v10 = vld [vmem:[#allocation5 + $0xac] ss:$16 sps:$4 sm:$0xff]   ;;  %v2344_v11 = vld [vmem:[#allocation5 + $0xa0] ss:$16 sps:$4 sm:$0xff]  }
  0x20   :  { %v2345_v12 = vld [vmem:[#allocation5 + $0xa8] ss:$16 sps:$4 sm:$0xff]   ;;  %v2346_v13 = vld [vmem:[#allocation5 + $0x84] ss:$16 sps:$4 sm:$0xff]   ;;  %v2348_v14 = vld [vmem:[#allocation5 + $0x8c] ss:$16 sps:$4 sm:$0xff]  }
  0x21   :  { %v2350_v15 = vld [vmem:[#allocation5 + $0x80] ss:$16 sps:$4 sm:$0xff]   ;;  %v2351_v16 = vld [vmem:[#allocation5 + $0x88] ss:$16 sps:$4 sm:$0xff]   ;;  %v2352_v17 = vld [vmem:[#allocation5 + $0x64] ss:$16 sps:$4 sm:$0xff]  }
  0x22   :  { %335 = vmatpush1.bf16.msra.mxu0 %v2338_v7  ;;  %448 = vmatpush1.bf16.msra.mxu1 %v2339_v8  ;;  %v2354_v18 = vld [vmem:[#allocation5 + $0x6c] ss:$16 sps:$4 sm:$0xff]   ;;  %v2356_v19 = vld [vmem:[#allocation5 + $0x60] ss:$16 sps:$4 sm:$0xff]   ;;  %v2357_v20 = vld [vmem:[#allocation5 + $0x68] ss:$16 sps:$4 sm:$0xff]  }
  0x23   :  { %336 = vmatprep.subr.bf16.mxu0 %v2340_v9  ;;  %449 = vmatprep.subr.bf16.mxu1 %v2342_v10  ;;  %v2358_v21 = vld [vmem:[#allocation5 + $0x44] ss:$16 sps:$4 sm:$0xff]   ;;  %v2360_v22 = vld [vmem:[#allocation5 + $0x4c] ss:$16 sps:$4 sm:$0xff]   ;;  %v2362_v23 = vld [vmem:[#allocation5 + $0x40] ss:$16 sps:$4 sm:$0xff]  }
  0x24   :  { %v2363_v24 = vld [vmem:[#allocation5 + $0x48] ss:$16 sps:$4 sm:$0xff]   ;;  %v2364_v25 = vld [vmem:[#allocation5 + $0x24] ss:$16 sps:$4 sm:$0xff]   ;;  %v2366_v26 = vld [vmem:[#allocation5 + $0x2c] ss:$16 sps:$4 sm:$0xff]  }
  0x25   :  { %v2368_v27 = vld [vmem:[#allocation5 + $0x20] ss:$16 sps:$4 sm:$0xff]   ;;  %v2369_v28 = vld [vmem:[#allocation5 + $0x28] ss:$16 sps:$4 sm:$0xff]   ;;  %v2370_v29 = vld [vmem:[#allocation5 + $0x4] ss:$16 sps:$4 sm:$0xff]  }
  0x26   :  { %337 = vmatpush1.bf16.msra.mxu0 %v2344_v11  ;;  %450 = vmatpush1.bf16.msra.mxu1 %v2345_v12  ;;  %v2372_v30 = vld [vmem:[#allocation5 + $0xc] ss:$16 sps:$4 sm:$0xff]   ;;  %v2374_v31 = vld [vmem:[#allocation5] ss:$16 sps:$4 sm:$0xff]   ;;  %v2375_v32 = vld [vmem:[#allocation5 + $0x8] ss:$16 sps:$4 sm:$0xff]   ;;  %v104_v11 = vlaneseq }
  0x27   :  { %338 = vmatprep.subr.bf16.mxu0 %v2346_v13  ;;  %451 = vmatprep.subr.bf16.mxu1 %v2348_v14  ;;  %v2805_v33 = vld [vmem:[#allocation7 + $0xe4] ss:$16 sps:$4 sm:$0xff]   ;;  %v2807_v34 = vld [vmem:[#allocation7 + $0xec] ss:$16 sps:$4 sm:$0xff]   ;;  %v2812_v36 = vld [vmem:[#allocation7 + $0xe0] ss:$16 sps:$4 sm:$0xff]  }
  0x28   :  { %v2815_v37 = vld [vmem:[#allocation7 + $0xc4] ss:$16 sps:$4 sm:$0xff]   ;;  %v2818_v38 = vld [vmem:[#allocation7 + $0xe8] ss:$16 sps:$4 sm:$0xff]   ;;  %v2820_v39 = vld [vmem:[#allocation7 + $0xcc] ss:$16 sps:$4 sm:$0xff]  }
  0x29   :  { %v2824_v40 = vld [vmem:[#allocation7 + $0xc0] ss:$16 sps:$4 sm:$0xff]   ;;  %v2828_v41 = vld [vmem:[#allocation7 + $0xa4] ss:$16 sps:$4 sm:$0xff]   ;;  %v2831_v42 = vld [vmem:[#allocation7 + $0xc8] ss:$16 sps:$4 sm:$0xff]  }
  0x2a   :  { %339 = vmatpush1.bf16.msra.mxu0 %v2350_v15  ;;  %452 = vmatpush1.bf16.msra.mxu1 %v2351_v16  ;;  %v2380_v43 = vld [vmem:[%s3590_s0 + $0x8] sm:$0xff]   ;;  %v2843_v46 = vld [vmem:[#allocation7 + $0xac] ss:$16 sps:$4 sm:$0xff]   ;;  %v2846_v47 = vld [vmem:[#allocation7 + $0xa8] ss:$16 sps:$4 sm:$0xff]   ;;  %v105_v12 = vshrl.u32 %v104_v11, 7 }
  0x2b   :  { %340 = vmatprep.subr.bf16.mxu0 %v2352_v17  ;;  %453 = vmatprep.subr.bf16.mxu1 %v2354_v18  ;;  %v2838_v44 = vld [vmem:[#allocation7 + $0xa0] ss:$16 sps:$4 sm:$0xff]   ;;  %v2840_v45 = vld [vmem:[#allocation7 + $0x84] ss:$16 sps:$4 sm:$0xff]   ;;  %v2848_v48 = vld [vmem:[#allocation7 + $0x8c] ss:$16 sps:$4 sm:$0xff]  }
  0x2c   :  { %v2853_v49 = vld [vmem:[#allocation7 + $0x80] ss:$16 sps:$4 sm:$0xff]   ;;  %v2855_v50 = vld [vmem:[#allocation7 + $0x64] ss:$16 sps:$4 sm:$0xff]   ;;  %v2860_v51 = vld [vmem:[#allocation7 + $0x88] ss:$16 sps:$4 sm:$0xff]  }
  0x2d   :  { %v2384_v52 = vld [vmem:[%s3590_s0 + $0x10] sm:$0xff]   ;;  %v2866_v53 = vld [vmem:[#allocation7 + $0x60] ss:$16 sps:$4 sm:$0xff]   ;;  %v2872_v55 = vld [vmem:[#allocation7 + $0x44] ss:$16 sps:$4 sm:$0xff]   ;;  %v106_v17 = vsub.s32 0, %v105_v12 }
  0x2e   :  { %341 = vmatpush1.bf16.msra.mxu0 %v2356_v19  ;;  %454 = vmatpush1.bf16.msra.mxu1 %v2357_v20  ;;  %v2869_v54 = vld [vmem:[#allocation7 + $0x6c] ss:$16 sps:$4 sm:$0xff]   ;;  %v2875_v56 = vld [vmem:[#allocation7 + $0x68] ss:$16 sps:$4 sm:$0xff]   ;;  %v2882_v58 = vld [vmem:[#allocation7 + $0x40] ss:$16 sps:$4 sm:$0xff]  }
  0x2f   :  { %342 = vmatprep.subr.bf16.mxu0 %v2358_v21  ;;  %455 = vmatprep.subr.bf16.mxu1 %v2360_v22  ;;  %v2877_v57 = vld [vmem:[#allocation7 + $0x4c] ss:$16 sps:$4 sm:$0xff]   ;;  %v2886_v59 = vld [vmem:[#allocation7 + $0x24] ss:$16 sps:$4 sm:$0xff]   ;;  %v2889_v60 = vld [vmem:[#allocation7 + $0x48] ss:$16 sps:$4 sm:$0xff]  }
  0x30   :  { %v2391_v61 = vld [vmem:[%s3590_s0 + $0x18] sm:$0xff]   ;;  %v2898_v63 = vld [vmem:[#allocation7 + $0x2c] ss:$16 sps:$4 sm:$0xff]   ;;  %v2904_v2 = vld [vmem:[#allocation7 + $0x28] ss:$16 sps:$4 sm:$0xff]   ;;  %v114_v18 = vsub.s32 2, %v105_v12 }
  0x31   :  { %v2896_v62 = vld [vmem:[#allocation7 + $0x20] ss:$16 sps:$4 sm:$0xff]   ;;  %v2902_v1 = vld [vmem:[#allocation7 + $0x4] ss:$16 sps:$4 sm:$0xff]   ;;  %v2906_v3 = vld [vmem:[#allocation7 + $0xc] ss:$16 sps:$4 sm:$0xff]  }
  0x32   :  { %343 = vmatpush1.bf16.msra.mxu0 %v2362_v23  ;;  %456 = vmatpush1.bf16.msra.mxu1 %v2363_v24  ;;  %v2912_v4 = vld [vmem:[#allocation7] ss:$16 sps:$4 sm:$0xff]   ;;  %v2916_v5 = vld [vmem:[#allocation7 + $0x8] ss:$16 sps:$4 sm:$0xff]   ;;  %v110_v22 = vsub.s32 1, %v105_v12  ;;  %v118_v23 = vsub.s32 3, %v105_v12 }
  0x33   :  { %344 = vmatprep.subr.bf16.mxu0 %v2364_v25  ;;  %457 = vmatprep.subr.bf16.mxu1 %v2366_v26  ;;  %v2398_v6 = vld [vmem:[%s3590_s0 + $0x20] sm:$0xff]   ;;  %v2405_v7 = vld [vmem:[%s3590_s0 + $0x28] sm:$0xff]   ;;  %v2412_v8 = vld [vmem:[%s3590_s0 + $0x30] sm:$0xff]  }
  0x34   :  { %v2422_v9 = vld [vmem:[%s3590_s0 + $0x38] sm:$0xff]   ;;  %v2432_v10 = vld [vmem:[#allocation3] sm:$0xff]  }
  0x35   :  { %v102_v19 = vld [vmem:[%s3593_s3] sm:$0xf] }
  0x36   :  { %345 = vmatpush1.bf16.msra.mxu0 %v2368_v27  ;;  %458 = vmatpush1.bf16.msra.mxu1 %v2369_v28  ;;  %v2996_v26 = vrot.slane %v102_v19, %v106_v17  ;;  %v2998_v27 = vrot.slane %v102_v19, %v114_v18 }
  0x37   :  { %346 = vmatprep.subr.bf16.mxu0 %v2370_v29  ;;  %459 = vmatprep.subr.bf16.mxu1 %v2372_v30  ;;  %v3000_v30 = vrot.slane %v102_v19, %v110_v22 }
  0x3a   :  { %347 = vmatpush1.bf16.msra.mxu0 %v2374_v31  ;;  %460 = vmatpush1.bf16.msra.mxu1 %v2375_v32  ;;  %v3002_v31 = vrot.slane %v102_v19, %v118_v23 }
  0x3b   :  { %835 = vmatprep.subr.bf16.mxu0 %v2805_v33  ;;  %878 = vmatprep.subr.bf16.mxu1 %v2807_v34 }
  0x3d   :  { %365 = vmatmul.mubr.bf16.vlgmr.msra.gmra.mxu0 %v2376_v35  ;;  %478 = vmatmul.mubr.bf16.vlgmr.msra.gmra.mxu1 %v2376_v35 }
  0x3e   :  { %836 = vmatpush1.bf16.msra.mxu0 %v2812_v36  ;;  %374 = vmatprep.mubr.bf16.mxu0 %v3595_v0 }
  0x3f   :  { %487 = vmatprep.mubr.bf16.mxu1 %v3595_v0  ;;  %837 = vmatprep.subr.bf16.mxu0 %v2815_v37 }
  0x40   :  { %879 = vmatpush1.bf16.msra.mxu1 %v2818_v38 }
  0x41   :  { %880 = vmatprep.subr.bf16.mxu1 %v2820_v39 }
  0x42   :  { %838 = vmatpush1.bf16.msra.mxu0 %v2824_v40 }
  0x43   :  { %839 = vmatprep.subr.bf16.mxu0 %v2828_v41 }
  0x44   :  { %881 = vmatpush1.bf16.msra.mxu1 %v2831_v42 }
  0x45   :  { %375 = vmatmul.mubr.bf16.gmra.mxu0 %v2380_v43  ;;  %488 = vmatmul.mubr.bf16.gmra.mxu1 %v2380_v43 }
  0x46   :  { %384 = vmatprep.mubr.bf16.mxu0 %v3595_v0  ;;  %497 = vmatprep.mubr.bf16.mxu1 %v3595_v0 }
  0x47   :  { %840 = vmatpush1.bf16.msra.mxu0 %v2838_v44  ;;  %882 = vmatprep.subr.bf16.mxu1 %v2843_v46 }
  0x48   :  { %841 = vmatprep.subr.bf16.mxu0 %v2840_v45  ;;  %883 = vmatpush1.bf16.msra.mxu1 %v2846_v47 }
  0x49   :  { %884 = vmatprep.subr.bf16.mxu1 %v2848_v48 }
  0x4b   :  { %842 = vmatpush1.bf16.msra.mxu0 %v2853_v49 }
  0x4c   :  { %843 = vmatprep.subr.bf16.mxu0 %v2855_v50  ;;  %885 = vmatpush1.bf16.msra.mxu1 %v2860_v51 }
  0x4d   :  { %385 = vmatmul.mubr.bf16.gmra.mxu0 %v2384_v52  ;;  %498 = vmatmul.mubr.bf16.gmra.mxu1 %v2384_v52 }
  0x4e   :  { %394 = vmatprep.mubr.bf16.mxu0 %v3595_v0  ;;  %507 = vmatprep.mubr.bf16.mxu1 %v3595_v0 }
  0x4f   :  { %844 = vmatpush1.bf16.msra.mxu0 %v2866_v53  ;;  %886 = vmatprep.subr.bf16.mxu1 %v2869_v54 }
  0x50   :  { %845 = vmatprep.subr.bf16.mxu0 %v2872_v55  ;;  %887 = vmatpush1.bf16.msra.mxu1 %v2875_v56 }
  0x51   :  { %888 = vmatprep.subr.bf16.mxu1 %v2877_v57 }
  0x53   :  { %846 = vmatpush1.bf16.msra.mxu0 %v2882_v58 }
  0x54   :  { %847 = vmatprep.subr.bf16.mxu0 %v2886_v59  ;;  %889 = vmatpush1.bf16.msra.mxu1 %v2889_v60 }
  0x55   :  { %395 = vmatmul.mubr.bf16.gmra.mxu0 %v2391_v61  ;;  %508 = vmatmul.mubr.bf16.gmra.mxu1 %v2391_v61 }
  0x56   :  { %404 = vmatprep.mubr.bf16.mxu0 %v3595_v0  ;;  %517 = vmatprep.mubr.bf16.mxu1 %v3595_v0 }
  0x57   :  { %848 = vmatpush1.bf16.msra.mxu0 %v2896_v62  ;;  %890 = vmatprep.subr.bf16.mxu1 %v2898_v63 }
  0x58   :  { %849 = vmatprep.subr.bf16.mxu0 %v2902_v1  ;;  %891 = vmatpush1.bf16.msra.mxu1 %v2904_v2 }
  0x59   :  { %892 = vmatprep.subr.bf16.mxu1 %v2906_v3 }
  0x5b   :  { %850 = vmatpush1.bf16.msra.mxu0 %v2912_v4 }
  0x5c   :  { %893 = vmatpush1.bf16.msra.mxu1 %v2916_v5  ;;  %998 = vmatprep.subr.bf16.mxu0 %v2805_v33 }
  0x5d   :  { %405 = vmatmul.mubr.bf16.gmra.mxu0 %v2398_v6  ;;  %518 = vmatmul.mubr.bf16.gmra.mxu1 %v2398_v6 }
  0x5e   :  { %414 = vmatprep.mubr.bf16.mxu0 %v3595_v0  ;;  %527 = vmatprep.mubr.bf16.mxu1 %v3595_v0 }
  0x5f   :  { %1041 = vmatprep.subr.bf16.mxu1 %v2807_v34 }
  0x65   :  { %415 = vmatmul.mubr.bf16.gmra.mxu0 %v2405_v7  ;;  %528 = vmatmul.mubr.bf16.gmra.mxu1 %v2405_v7 }
  0x66   :  { %424 = vmatprep.mubr.bf16.mxu0 %v3595_v0  ;;  %537 = vmatprep.mubr.bf16.mxu1 %v3595_v0 }
  0x6d   :  { %425 = vmatmul.mubr.bf16.gmra.mxu0 %v2412_v8  ;;  %538 = vmatmul.mubr.bf16.gmra.mxu1 %v2412_v8 }
  0x6e   :  { %434 = vmatprep.mubr.bf16.mxu0 %v3595_v0  ;;  %547 = vmatprep.mubr.bf16.mxu1 %v3595_v0 }
  0x75   :  { %435 = vmatmul.mubr.bf16.gmra.mxu0 %v2422_v9  ;;  %548 = vmatmul.mubr.bf16.gmra.mxu1 %v2422_v9 }
  0x76   :  { %867 = vmatprep.mubr.bf16.mxu0 %v3595_v0  ;;  %910 = vmatprep.mubr.bf16.mxu1 %v3595_v0 }
  0x7d   :  { %868 = vmatmul.mubr.bf16.vlgmr.msra.gmra.mxu0 %v2432_v10  ;;  %911 = vmatmul.mubr.bf16.vlgmr.msra.gmra.mxu1 %v2432_v10 }
  0x7e   :  { %999 = vmatpush1.bf16.msra.mxu0 %v2812_v36  ;;  %1042 = vmatpush1.bf16.msra.mxu1 %v2818_v38 }
  0x7f   :  { %1000 = vmatprep.subr.bf16.mxu0 %v2815_v37  ;;  %1043 = vmatprep.subr.bf16.mxu1 %v2820_v39 }
  0x80   :  { %1030 = vmatprep.mubr.bf16.mxu0 %v3595_v0  ;;  %1073 = vmatprep.mubr.bf16.mxu1 %v3595_v0 }
  0x82   :  { %1001 = vmatpush1.bf16.msra.mxu0 %v2824_v40  ;;  %1044 = vmatpush1.bf16.msra.mxu1 %v2831_v42 }
  0x83   :  { %1002 = vmatprep.subr.bf16.mxu0 %v2828_v41  ;;  %1045 = vmatprep.subr.bf16.mxu1 %v2843_v46 }
  0x86   :  { %1003 = vmatpush1.bf16.msra.mxu0 %v2838_v44  ;;  %1046 = vmatpush1.bf16.msra.mxu1 %v2846_v47 }
  0x87   :  { %1004 = vmatprep.subr.bf16.mxu0 %v2840_v45  ;;  %1047 = vmatprep.subr.bf16.mxu1 %v2848_v48 }
  0x8a   :  { %1005 = vmatpush1.bf16.msra.mxu0 %v2853_v49  ;;  %1048 = vmatpush1.bf16.msra.mxu1 %v2860_v51 }
  0x8b   :  { %1006 = vmatprep.subr.bf16.mxu0 %v2855_v50  ;;  %1049 = vmatprep.subr.bf16.mxu1 %v2869_v54 }
  0x8e   :  { %1007 = vmatpush1.bf16.msra.mxu0 %v2866_v53  ;;  %1050 = vmatpush1.bf16.msra.mxu1 %v2875_v56 }
  0x8f   :  { %1008 = vmatprep.subr.bf16.mxu0 %v2872_v55  ;;  %1051 = vmatprep.subr.bf16.mxu1 %v2877_v57 }
  0x92   :  { %1009 = vmatpush1.bf16.msra.mxu0 %v2882_v58  ;;  %1052 = vmatpush1.bf16.msra.mxu1 %v2889_v60 }
  0x93   :  { %1010 = vmatprep.subr.bf16.mxu0 %v2886_v59  ;;  %1053 = vmatprep.subr.bf16.mxu1 %v2898_v63 }
  0x96   :  { %1011 = vmatpush1.bf16.msra.mxu0 %v2896_v62  ;;  %1054 = vmatpush1.bf16.msra.mxu1 %v2904_v2 }
  0x97   :  { %1012 = vmatprep.subr.bf16.mxu0 %v2902_v1  ;;  %1055 = vmatprep.subr.bf16.mxu1 %v2906_v3 }
  0x9a   :  { %1013 = vmatpush1.bf16.msra.mxu0 %v2912_v4  ;;  %1056 = vmatpush1.bf16.msra.mxu1 %v2916_v5 }
  0x9b   :  { %1162 = vmatprep.subr.bf16.mxu0 %v2805_v33  ;;  %1205 = vmatprep.subr.bf16.mxu1 %v2807_v34 }
  0xfd   :  { %v2977_v13 = vpop.f32.mrf.mxu0  ;;  %v2979_v14 = vpop.f32.mrf.mxu1 }
  0xff   :  { %v2981_v15 = vpop.f32.mrf.mxu0  ;;  %v2983_v16 = vpop.f32.mrf.mxu1 }
 0x101   :  { %v2988_v20 = vpop.f32.mrf.mxu0  ;;  %v2990_v21 = vpop.f32.mrf.mxu1 }
 0x103   :  { %v2992_v24 = vpop.f32.mrf.mxu0  ;;  %v2994_v25 = vpop.f32.mrf.mxu1 }
 0x105   :  { %v376_v28 = vpop.f32.mrf.mxu0  ;;  %v489_v29 = vpop.f32.mrf.mxu1 }
 0x106   :  { %v3005_v32 = vadd.f32 %v376_v28, %v2996_v26  ;;  %v3008_v35 = vadd.f32 %v489_v29, %v2998_v27 }
 0x107   :  { %v378_v43 = vpop.f32.mrf.mxu0  ;;  %v491_v52 = vpop.f32.mrf.mxu1 }
 0x108   :  { %3597 = vst [vmem:[#allocation11_spill] sm:$0xff] %v3008_v35  ;;  %v3011_v61 = vadd.f32 %v378_v43, %v3000_v30  ;;  %v3014_v6 = vadd.f32 %v491_v52, %v3002_v31 }
 0x109   :  { %v380_v7 = vpop.f32.mrf.mxu0  ;;  %v493_v8 = vpop.f32.mrf.mxu1 }
 0x10a   :  { %3598 = vst [vmem:[#allocation12_spill] sm:$0xff] %v3014_v6  ;;  %v3017_v9 = vadd.f32 %v380_v7, %v2996_v26  ;;  %v3020_v10 = vadd.f32 %v493_v8, %v2998_v27 }
 0x10b   :  { %v382_v11 = vpop.f32.mrf.mxu0  ;;  %v495_v12 = vpop.f32.mrf.mxu1 }
 0x10c   :  { %3599 = vst [vmem:[#allocation13_spill] sm:$0xff] %v3020_v10  ;;  %v3023_v17 = vadd.f32 %v382_v11, %v3000_v30  ;;  %v3026_v18 = vadd.f32 %v495_v12, %v3002_v31 }
 0x10d   :  { %v386_v19 = vpop.f32.mrf.mxu0  ;;  %v499_v22 = vpop.f32.mrf.mxu1 }
 0x10e   :  { %3600 = vst [vmem:[#allocation14_spill] sm:$0xff] %v3023_v17  ;;  %3601 = vst [vmem:[#allocation15_spill] sm:$0xff] %v3026_v18  ;;  %v3029_v23 = vadd.f32 %v386_v19, %v2996_v26  ;;  %v3032_v28 = vadd.f32 %v499_v22, %v2998_v27 }
 0x10f   :  { %v388_v29 = vpop.f32.mrf.mxu0  ;;  %v501_v43 = vpop.f32.mrf.mxu1 }
 0x110   :  { %3602 = vst [vmem:[#allocation16_spill] sm:$0xff] %v3029_v23  ;;  %3603 = vst [vmem:[#allocation17_spill] sm:$0xff] %v3032_v28  ;;  %v3035_v52 = vadd.f32 %v388_v29, %v3000_v30  ;;  %v3038_v7 = vadd.f32 %v501_v43, %v3002_v31 }
 0x111   :  { %v390_v8 = vpop.f32.mrf.mxu0  ;;  %v503_v11 = vpop.f32.mrf.mxu1 }
 0x112   :  { %3604 = vst [vmem:[#allocation18_spill] sm:$0xff] %v3035_v52  ;;  %3605 = vst [vmem:[#allocation19_spill] sm:$0xff] %v3038_v7  ;;  %v3041_v12 = vadd.f32 %v390_v8, %v2996_v26  ;;  %v3044_v0 = vadd.f32 %v503_v11, %v2998_v27 }
 0x113   :  { %v392_v19 = vpop.f32.mrf.mxu0  ;;  %v505_v23 = vpop.f32.mrf.mxu1 }
 0x114   :  { %3606 = vst [vmem:[#allocation20_spill] sm:$0xff] %v3041_v12  ;;  %3607 = vst [vmem:[#allocation21_spill] sm:$0xff] %v3044_v0  ;;  %v3047_v22 = vadd.f32 %v392_v19, %v3000_v30  ;;  %v3050_v28 = vadd.f32 %v505_v23, %v3002_v31 }
 0x115   :  { %v396_v29 = vpop.f32.mrf.mxu0  ;;  %v509_v52 = vpop.f32.mrf.mxu1 }
 0x116   :  { %3608 = vst [vmem:[#allocation22_spill] sm:$0xff] %v3047_v22  ;;  %3609 = vst [vmem:[#allocation23_spill] sm:$0xff] %v3050_v28  ;;  %v3053_v43 = vadd.f32 %v396_v29, %v2996_v26  ;;  %v3056_v7 = vadd.f32 %v509_v52, %v2998_v27 }
 0x117   :  { %v398_v8 = vpop.f32.mrf.mxu0  ;;  %v511_v12 = vpop.f32.mrf.mxu1 }
 0x118   :  { %3610 = vst [vmem:[#allocation24_spill] sm:$0xff] %v3053_v43  ;;  %3611 = vst [vmem:[#allocation25_spill] sm:$0xff] %v3056_v7  ;;  %v3059_v11 = vadd.f32 %v398_v8, %v3000_v30  ;;  %v3062_v0 = vadd.f32 %v511_v12, %v3002_v31 }
 0x119   :  { %v400_v19 = vpop.f32.mrf.mxu0  ;;  %v513_v22 = vpop.f32.mrf.mxu1 }
 0x11a   :  { %3612 = vst [vmem:[#allocation26_spill] sm:$0xff] %v3059_v11  ;;  %3613 = vst [vmem:[#allocation27_spill] sm:$0xff] %v3062_v0  ;;  %v3065_v23 = vadd.f32 %v400_v19, %v2996_v26  ;;  %v3068_v28 = vadd.f32 %v513_v22, %v2998_v27 }
 0x11b   :  { %v402_v29 = vpop.f32.mrf.mxu0  ;;  %v515_v43 = vpop.f32.mrf.mxu1 }
 0x11c   :  { %3614 = vst [vmem:[#allocation28_spill] sm:$0xff] %v3065_v23  ;;  %3615 = vst [vmem:[#allocation29_spill] sm:$0xff] %v3068_v28  ;;  %v3071_v52 = vadd.f32 %v402_v29, %v3000_v30  ;;  %v3074_v7 = vadd.f32 %v515_v43, %v3002_v31 }
 0x11d   :  { %v406_v8 = vpop.f32.mrf.mxu0  ;;  %v519_v11 = vpop.f32.mrf.mxu1 }
 0x11e   :  { %3616 = vst [vmem:[#allocation30_spill] sm:$0xff] %v3071_v52  ;;  %3617 = vst [vmem:[#allocation31_spill] sm:$0xff] %v3074_v7  ;;  %v3077_v12 = vadd.f32 %v406_v8, %v2996_v26  ;;  %v3080_v0 = vadd.f32 %v519_v11, %v2998_v27 }
 0x11f   :  { %v408_v19 = vpop.f32.mrf.mxu0  ;;  %v521_v23 = vpop.f32.mrf.mxu1 }
 0x120   :  { %3618 = vst [vmem:[#allocation32_spill] sm:$0xff] %v3077_v12  ;;  %3619 = vst [vmem:[#allocation33_spill] sm:$0xff] %v3080_v0  ;;  %v3083_v22 = vadd.f32 %v408_v19, %v3000_v30  ;;  %v3086_v28 = vadd.f32 %v521_v23, %v3002_v31 }
 0x121   :  { %v410_v29 = vpop.f32.mrf.mxu0  ;;  %v523_v52 = vpop.f32.mrf.mxu1 }
 0x122   :  { %3620 = vst [vmem:[#allocation34_spill] sm:$0xff] %v3083_v22  ;;  %3621 = vst [vmem:[#allocation35_spill] sm:$0xff] %v3086_v28  ;;  %v3089_v43 = vadd.f32 %v410_v29, %v2996_v26  ;;  %v3092_v7 = vadd.f32 %v523_v52, %v2998_v27 }
 0x123   :  { %v412_v8 = vpop.f32.mrf.mxu0  ;;  %v525_v12 = vpop.f32.mrf.mxu1 }
 0x124   :  { %3622 = vst [vmem:[#allocation36_spill] sm:$0xff] %v3089_v43  ;;  %3623 = vst [vmem:[#allocation37_spill] sm:$0xff] %v3092_v7  ;;  %v3095_v11 = vadd.f32 %v412_v8, %v3000_v30  ;;  %v3098_v0 = vadd.f32 %v525_v12, %v3002_v31 }
 0x125   :  { %v416_v19 = vpop.f32.mrf.mxu0  ;;  %v529_v22 = vpop.f32.mrf.mxu1 }
 0x126   :  { %3624 = vst [vmem:[#allocation38_spill] sm:$0xff] %v3095_v11  ;;  %3625 = vst [vmem:[#allocation39_spill] sm:$0xff] %v3098_v0  ;;  %v3101_v23 = vadd.f32 %v416_v19, %v2996_v26  ;;  %v3104_v28 = vadd.f32 %v529_v22, %v2998_v27 }
 0x127   :  { %v418_v29 = vpop.f32.mrf.mxu0  ;;  %v531_v43 = vpop.f32.mrf.mxu1 }
 0x128   :  { %3626 = vst [vmem:[#allocation40_spill] sm:$0xff] %v3101_v23  ;;  %3627 = vst [vmem:[#allocation41_spill] sm:$0xff] %v3104_v28  ;;  %v3107_v52 = vadd.f32 %v418_v29, %v3000_v30  ;;  %v3110_v7 = vadd.f32 %v531_v43, %v3002_v31 }
 0x129   :  { %v420_v8 = vpop.f32.mrf.mxu0  ;;  %v533_v11 = vpop.f32.mrf.mxu1 }
 0x12a   :  { %3628 = vst [vmem:[#allocation42_spill] sm:$0xff] %v3107_v52  ;;  %3629 = vst [vmem:[#allocation43_spill] sm:$0xff] %v3110_v7  ;;  %v3113_v12 = vadd.f32 %v420_v8, %v2996_v26  ;;  %v3116_v0 = vadd.f32 %v533_v11, %v2998_v27 }
 0x12b   :  { %v422_v19 = vpop.f32.mrf.mxu0  ;;  %v535_v23 = vpop.f32.mrf.mxu1 }
 0x12c   :  { %3630 = vst [vmem:[#allocation44_spill] sm:$0xff] %v3113_v12  ;;  %3631 = vst [vmem:[#allocation45_spill] sm:$0xff] %v3116_v0  ;;  %v3119_v22 = vadd.f32 %v422_v19, %v3000_v30  ;;  %v3122_v28 = vadd.f32 %v535_v23, %v3002_v31 }
 0x12d   :  { %v426_v29 = vpop.f32.mrf.mxu0  ;;  %v539_v52 = vpop.f32.mrf.mxu1 }
 0x12e   :  { %3632 = vst [vmem:[#allocation46_spill] sm:$0xff] %v3119_v22  ;;  %3633 = vst [vmem:[#allocation47_spill] sm:$0xff] %v3122_v28  ;;  %v3125_v43 = vadd.f32 %v426_v29, %v2996_v26  ;;  %v3128_v7 = vadd.f32 %v539_v52, %v2998_v27 }
 0x12f   :  { %v428_v8 = vpop.f32.mrf.mxu0  ;;  %v541_v12 = vpop.f32.mrf.mxu1 }
 0x130   :  { %3634 = vst [vmem:[#allocation48_spill] sm:$0xff] %v3125_v43  ;;  %3635 = vst [vmem:[#allocation49_spill] sm:$0xff] %v3128_v7  ;;  %v3131_v11 = vadd.f32 %v428_v8, %v3000_v30  ;;  %v3134_v0 = vadd.f32 %v541_v12, %v3002_v31 }
 0x131   :  { %v430_v19 = vpop.f32.mrf.mxu0  ;;  %v543_v22 = vpop.f32.mrf.mxu1 }
 0x132   :  { %3636 = vst [vmem:[#allocation50_spill] sm:$0xff] %v3131_v11  ;;  %3637 = vst [vmem:[#allocation51_spill] sm:$0xff] %v3134_v0  ;;  %v3137_v23 = vadd.f32 %v430_v19, %v2996_v26  ;;  %v3140_v28 = vadd.f32 %v543_v22, %v2998_v27 }
 0x133   :  { %v432_v29 = vpop.f32.mrf.mxu0  ;;  %v545_v43 = vpop.f32.mrf.mxu1 }
 0x134   :  { %3638 = vst [vmem:[#allocation52_spill] sm:$0xff] %v3137_v23  ;;  %3639 = vst [vmem:[#allocation53_spill] sm:$0xff] %v3140_v28  ;;  %v3143_v52 = vadd.f32 %v432_v29, %v3000_v30  ;;  %v3146_v7 = vadd.f32 %v545_v43, %v3002_v31 }
 0x135   :  { %v436_v8 = vpop.f32.mrf.mxu0  ;;  %v549_v11 = vpop.f32.mrf.mxu1 }
 0x136   :  { %3640 = vst [vmem:[#allocation54_spill] sm:$0xff] %v3143_v52  ;;  %3641 = vst [vmem:[#allocation55_spill] sm:$0xff] %v3146_v7  ;;  %v3149_v12 = vadd.f32 %v436_v8, %v2996_v26  ;;  %v3152_v0 = vadd.f32 %v549_v11, %v2998_v27  ;;  %v367_v11 = vadd.f32 %v2977_v13, %v2996_v26 }
 0x137   :  { %v438_v19 = vpop.f32.mrf.mxu0  ;;  %v551_v23 = vpop.f32.mrf.mxu1 }
 0x138   :  { %3642 = vst [vmem:[#allocation56_spill] sm:$0xff] %v3149_v12  ;;  %3643 = vst [vmem:[#allocation57_spill] sm:$0xff] %v3152_v0  ;;  %v3155_v22 = vadd.f32 %v438_v19, %v3000_v30  ;;  %v3158_v28 = vadd.f32 %v551_v23, %v3002_v31 }
 0x139   :  { %v440_v29 = vpop.f32.mrf.mxu0  ;;  %v553_v52 = vpop.f32.mrf.mxu1 }
 0x13a   :  { %3644 = vst [vmem:[#allocation58_spill] sm:$0xff] %v3155_v22  ;;  %3645 = vst [vmem:[#allocation59_spill] sm:$0xff] %v3158_v28  ;;  %v3161_v43 = vadd.f32 %v440_v29, %v2996_v26  ;;  %v3164_v7 = vadd.f32 %v553_v52, %v2998_v27  ;;  %v369_v29 = vadd.f32 %v2981_v15, %v3000_v30 }
 0x13b   :  { %v442_v8 = vpop.f32.mrf.mxu0  ;;  %v555_v12 = vpop.f32.mrf.mxu1  ;;  %v371_v52 = vadd.f32 %v2988_v20, %v2996_v26  ;;  %v482_v20 = vadd.f32 %v2983_v16, %v3002_v31 }
 0x13c   :  { %3646 = vst [vmem:[#allocation60_spill] sm:$0xff] %v3161_v43  ;;  %3647 = vst [vmem:[#allocation61_spill] sm:$0xff] %v3164_v7  ;;  %v3169_v0 = vadd.f32 %v442_v8, %v3000_v30  ;;  %v3172_v19 = vadd.f32 %v555_v12, %v3002_v31  ;;  %v373_v12 = vadd.f32 %v2992_v24, %v3000_v30 }
 0x13d   :  { %v869_v23 = vpop.f32.mrf.mxu0  ;;  %v912_v28 = vpop.f32.mrf.mxu1  ;;  %v484_v30 = vadd.f32 %v2990_v21, %v2998_v27 }
 0x13e   :  { %3648 = vst [vmem:[#allocation62_spill] sm:$0xff] %v3169_v0  ;;  %3649 = vst [vmem:[#allocation63_spill] sm:$0xff] %v3172_v19  ;;  %v921_v43 = vadd.f32 %v869_v23, %v367_v11 }
 0x13f   :  { %v871_v22 = vpop.f32.mrf.mxu0  ;;  %v914_v35 = vpop.f32.mrf.mxu1 }
 0x140   :  { %v929_v7 = vsub.f32 0.0, %v921_v43  ;;  %v922_v10 = vadd.f32 %v871_v22, %v369_v29 }
 0x141   :  { %v873_v13 = vpop.f32.mrf.mxu0  ;;  %v916_v15 = vpop.f32.mrf.mxu1 }
 0x142   :  { %v931_v18 = vmul.f32 1.442695, %v929_v7  ;;  %v941_v8 = vsub.f32 0.0, %v922_v10  ;;  %v925_v0 = vadd.f32 %v873_v13, %v371_v52  ;;  %v486_v10 = vadd.f32 %v2994_v25, %v3002_v31 }
 0x143   :  { %v875_v19 = vpop.f32.mrf.mxu0  ;;  %v918_v22 = vpop.f32.mrf.mxu1  ;;  %v924_v7 = vadd.f32 %v914_v35, %v482_v20 }
 0x144   :  { %2433 = vpow2.f32 %v931_v18  ;;  %v943_v6 = vmul.f32 1.442695, %v941_v8  ;;  %v930_v17 = vsub.f32 0.0, %v925_v0  ;;  %v926_v11 = vadd.f32 %v875_v19, %v373_v12 }
 0x145   :  { %v928_v24 = vadd.f32 %v918_v22, %v486_v10  ;;  %v480_v0 = vadd.f32 %v2979_v14, %v2998_v27  ;;  %v927_v18 = vadd.f32 %v916_v15, %v484_v30 }
 0x146   :  { %2435 = vpow2.f32 %v943_v6  ;;  %v933_v23 = vmul.f32 1.442695, %v930_v17  ;;  %v942_v26 = vsub.f32 0.0, %v926_v11  ;;  %v955_v6 = vsub.f32 0.0, %v924_v7 }
 0x147   :  { %v923_v17 = vadd.f32 %v912_v28, %v480_v0  ;;  %v956_v16 = vsub.f32 0.0, %v928_v24 }
 0x148   :  { %2437 = vpow2.f32 %v933_v23  ;;  %v945_v43 = vmul.f32 1.442695, %v942_v26  ;;  %v957_v29 = vmul.f32 1.442695, %v955_v6 }
 0x149   :  { %v959_v25 = vmul.f32 1.442695, %v956_v16 }
 0x14a   :  { %2439 = vpow2.f32 %v945_v43 }
 0x14b   :  { %2441 = vtanh.f32 %v923_v17 }
 0x14c   :  { %2443 = vtanh.f32 %v927_v18 }
 0x151   :  { %v2434_v19 = vpop.eup %2433 }
 0x152   :  { %v935_v52 = vadd.f32 1.0, %v2434_v19 }
 0x153   :  { %v2436_v13 = vpop.eup %2435 }
 0x154   :  { %2445 = vrcp.f32 %v935_v52  ;;  %v947_v31 = vadd.f32 1.0, %v2436_v13 }
 0x155   :  { %v2438_v35 = vpop.eup %2437  ;;  %2447 = vpow2.f32 %v957_v29 }
 0x156   :  { %2449 = vrcp.f32 %v947_v31  ;;  %v936_v14 = vadd.f32 1.0, %v2438_v35 }
 0x157   :  { %2451 = vpow2.f32 %v959_v25  ;;  %v2440_v8 = vpop.eup %2439  ;;  %v3650_v25 = vmov 0  }
 0x158   :  { %2453 = vrcp.f32 %v936_v14  ;;  %v948_v21 = vadd.f32 1.0, %v2440_v8  ;;  %v2442_v27 = vpop.eup %2441 }
 0x159   :  { %v2444_v28 = vpop.eup %2443 }
 0x15a   :  { %2455 = vrcp.f32 %v948_v21 }
 0x161   :  { %v2446_v12 = vpop.eup %2445 }
 0x162   :  { %v2448_v15 = vpop.eup %2447  ;;  %v969_v11 = vmul.f32 %v2446_v12, %v2442_v27 }
 0x163   :  { %v2450_v23 = vpop.eup %2449  ;;  %v961_v7 = vadd.f32 1.0, %v2448_v15 }
 0x164   :  { %v2452_v20 = vpop.eup %2451  ;;  %v967_v26 = vmul.f32 0.0, %v2450_v23 }
 0x165   :  { %v2454_v22 = vpop.eup %2453  ;;  %v962_v0 = vadd.f32 1.0, %v2452_v20  ;;  %2457 = vrcp.f32 %v961_v7 }
 0x166   :  { %v3188_v10 = vadd.f32 %v969_v11, %v967_v26  ;;  %v970_v43 = vmul.f32 %v2454_v22, %v2444_v28 }
 0x167   :  { %v2456_v24 = vpop.eup %2455 }
 0x168   :  { %v968_v30 = vmul.f32 0.0, %v2456_v24  ;;  %2459 = vtanh.f32 %v3188_v10 }
 0x169   :  { %2461 = vrcp.f32 %v962_v0  ;;  %v3652_v0 = vld [vmem:[#allocation12_spill] sm:$0xff] }
 0x16a   :  { %v3191_v6 = vadd.f32 %v970_v43, %v968_v30 }
 0x16c   :  { %2463 = vtanh.f32 %v3191_v6 }
 0x172   :  { %v2458_v17 = vpop.eup %2457 }
 0x175   :  { %v2460_v18 = vpop.eup %2459 }
 0x176   :  { %v2462_v16 = vpop.eup %2461  ;;  %v975_v29 = vmul.f32 %v2460_v18, %v2458_v17  ;;  %v3653_v17 = vld [vmem:[#allocation15_spill] sm:$0xff] }
 0x179   :  { %v2464_v19 = vpop.eup %2463 }
 0x17a   :  { %v976_v52 = vmul.f32 %v2464_v19, %v2462_v16 }
 0x17c   :  { %v977_v13 = vpack.c.bf16 %v976_v52, %v975_v29  ;;  %v3655_v29 = vld [vmem:[#allocation13_spill] sm:$0xff] }
 0x17e   :  { %2275 = vst [vmem:[%s3594_s4] sm:$0xff] %v977_v13   ;;  %1031 = vmatmul.mubr.bf16.vlgmr.msra.gmra.mxu0 %v977_v13  ;;  %1074 = vmatmul.mubr.bf16.vlgmr.msra.gmra.mxu1 %v977_v13 }
 0x17f   :  { %1163 = vmatpush1.bf16.msra.mxu0 %v2812_v36  ;;  %1206 = vmatpush1.bf16.msra.mxu1 %v2818_v38 }
 0x180   :  { %1164 = vmatprep.subr.bf16.mxu0 %v2815_v37  ;;  %1207 = vmatprep.subr.bf16.mxu1 %v2820_v39 }
 0x181   :  { %1194 = vmatprep.mubr.bf16.mxu0 %v3650_v25  ;;  %1237 = vmatprep.mubr.bf16.mxu1 %v3650_v25 }
 0x183   :  { %1165 = vmatpush1.bf16.msra.mxu0 %v2824_v40  ;;  %1208 = vmatpush1.bf16.msra.mxu1 %v2831_v42 }
 0x184   :  { %1166 = vmatprep.subr.bf16.mxu0 %v2828_v41  ;;  %1209 = vmatprep.subr.bf16.mxu1 %v2843_v46 }
 0x187   :  { %1167 = vmatpush1.bf16.msra.mxu0 %v2838_v44  ;;  %1210 = vmatpush1.bf16.msra.mxu1 %v2846_v47 }
 0x188   :  { %1168 = vmatprep.subr.bf16.mxu0 %v2840_v45  ;;  %1211 = vmatprep.subr.bf16.mxu1 %v2848_v48 }
 0x18b   :  { %1169 = vmatpush1.bf16.msra.mxu0 %v2853_v49  ;;  %1212 = vmatpush1.bf16.msra.mxu1 %v2860_v51 }
 0x18c   :  { %1170 = vmatprep.subr.bf16.mxu0 %v2855_v50  ;;  %1213 = vmatprep.subr.bf16.mxu1 %v2869_v54 }
 0x18f   :  { %1171 = vmatpush1.bf16.msra.mxu0 %v2866_v53  ;;  %1214 = vmatpush1.bf16.msra.mxu1 %v2875_v56 }
 0x190   :  { %1172 = vmatprep.subr.bf16.mxu0 %v2872_v55  ;;  %1215 = vmatprep.subr.bf16.mxu1 %v2877_v57 }
 0x193   :  { %1173 = vmatpush1.bf16.msra.mxu0 %v2882_v58  ;;  %1216 = vmatpush1.bf16.msra.mxu1 %v2889_v60 }
 0x194   :  { %1174 = vmatprep.subr.bf16.mxu0 %v2886_v59  ;;  %1217 = vmatprep.subr.bf16.mxu1 %v2898_v63 }
 0x197   :  { %1175 = vmatpush1.bf16.msra.mxu0 %v2896_v62  ;;  %1218 = vmatpush1.bf16.msra.mxu1 %v2904_v2 }
 0x198   :  { %1176 = vmatprep.subr.bf16.mxu0 %v2902_v1  ;;  %1219 = vmatprep.subr.bf16.mxu1 %v2906_v3 }
 0x19b   :  { %1177 = vmatpush1.bf16.msra.mxu0 %v2912_v4  ;;  %1220 = vmatpush1.bf16.msra.mxu1 %v2916_v5 }
 0x19c   :  { %1326 = vmatprep.subr.bf16.mxu0 %v2805_v33  ;;  %1369 = vmatprep.subr.bf16.mxu1 %v2807_v34  ;;  %v3651_v34 = vld [vmem:[#allocation14_spill] sm:$0xff] }
 0x23e   :  { %v1032_v31 = vpop.f32.mrf.mxu0  ;;  %v1075_v35 = vpop.f32.mrf.mxu1 }
 0x23f   :  { %v1084_v14 = vadd.f32 %v1032_v31, %v3005_v32 }
 0x240   :  { %v1034_v8 = vpop.f32.mrf.mxu0  ;;  %v1077_v28 = vpop.f32.mrf.mxu1 }
 0x241   :  { %v1092_v21 = vsub.f32 0.0, %v1084_v14  ;;  %v1085_v27 = vadd.f32 %v1034_v8, %v3011_v61  ;;  %v1087_v61 = vadd.f32 %v1077_v28, %v3652_v0 }
 0x242   :  { %v1036_v12 = vpop.f32.mrf.mxu0  ;;  %v1079_v22 = vpop.f32.mrf.mxu1 }
 0x243   :  { %v1094_v15 = vmul.f32 1.442695, %v1092_v21  ;;  %v1104_v11 = vsub.f32 0.0, %v1085_v27  ;;  %v1088_v23 = vadd.f32 %v1036_v12, %v3017_v9  ;;  %v1118_v16 = vsub.f32 0.0, %v1087_v61  ;;  %v3654_v9 = vld [vmem:[#allocation11_spill] sm:$0xff] }
 0x244   :  { %v1038_v20 = vpop.f32.mrf.mxu0  ;;  %v1081_v24 = vpop.f32.mrf.mxu1  ;;  %v1086_v19 = vadd.f32 %v1075_v35, %v3654_v9  ;;  %v1090_v52 = vadd.f32 %v1079_v22, %v3655_v29 }
 0x245   :  { %2465 = vpow2.f32 %v1094_v15  ;;  %v1106_v26 = vmul.f32 1.442695, %v1104_v11  ;;  %v1093_v33 = vsub.f32 0.0, %v1088_v23  ;;  %v1089_v7 = vadd.f32 %v1038_v20, %v3651_v34 }
 0x246   :  { %v1091_v18 = vadd.f32 %v1081_v24, %v3653_v17  ;;  %v1120_v14 = vmul.f32 1.442695, %v1118_v16 }
 0x247   :  { %2467 = vpow2.f32 %v1106_v26  ;;  %v1096_v43 = vmul.f32 1.442695, %v1093_v33  ;;  %v1105_v32 = vsub.f32 0.0, %v1089_v7 }
 0x248   :  { %v1119_v13 = vsub.f32 0.0, %v1091_v18 }
 0x249   :  { %2469 = vpow2.f32 %v1096_v43  ;;  %v1108_v30 = vmul.f32 1.442695, %v1105_v32 }
 0x24a   :  { %v1122_v27 = vmul.f32 1.442695, %v1119_v13 }
 0x24b   :  { %2471 = vpow2.f32 %v1108_v30 }
 0x24c   :  { %2473 = vtanh.f32 %v1086_v19 }
 0x24d   :  { %2475 = vtanh.f32 %v1090_v52 }
 0x252   :  { %v2466_v31 = vpop.eup %2465 }
 0x253   :  { %v1098_v8 = vadd.f32 1.0, %v2466_v31 }
 0x254   :  { %v2468_v21 = vpop.eup %2467 }
 0x255   :  { %2477 = vrcp.f32 %v1098_v8  ;;  %v1110_v12 = vadd.f32 1.0, %v2468_v21  ;;  %v3663_v21 = vld [vmem:[#allocation21_spill] sm:$0xff] }
 0x256   :  { %v2470_v28 = vpop.eup %2469  ;;  %2479 = vpow2.f32 %v1120_v14  ;;  %v3662_v14 = vld [vmem:[#allocation17_spill] sm:$0xff] }
 0x257   :  { %2481 = vrcp.f32 %v1110_v12  ;;  %v1099_v15 = vadd.f32 1.0, %v2470_v28 }
 0x258   :  { %2483 = vpow2.f32 %v1122_v27  ;;  %v2472_v11 = vpop.eup %2471 }
 0x259   :  { %2485 = vrcp.f32 %v1099_v15  ;;  %v1111_v35 = vadd.f32 1.0, %v2472_v11  ;;  %v2474_v23 = vpop.eup %2473 }
 0x25a   :  { %v2476_v20 = vpop.eup %2475 }
 0x25b   :  { %2487 = vrcp.f32 %v1111_v35 }
 0x262   :  { %v2478_v26 = vpop.eup %2477 }
 0x263   :  { %v2480_v33 = vpop.eup %2479  ;;  %v1132_v22 = vmul.f32 %v2478_v26, %v2474_v23 }
 0x264   :  { %v2482_v34 = vpop.eup %2481  ;;  %v1124_v0 = vadd.f32 1.0, %v2480_v33 }
 0x265   :  { %v2484_v7 = vpop.eup %2483  ;;  %v1130_v43 = vmul.f32 %v2482_v34, %v3188_v10 }
 0x266   :  { %v2486_v32 = vpop.eup %2485  ;;  %v1125_v17 = vadd.f32 1.0, %v2484_v7  ;;  %2489 = vrcp.f32 %v1124_v0 }
 0x267   :  { %v3240_v24 = vadd.f32 %v1132_v22, %v1130_v43  ;;  %v1133_v61 = vmul.f32 %v2486_v32, %v2476_v20 }
 0x268   :  { %v2488_v30 = vpop.eup %2487 }
 0x269   :  { %v1131_v18 = vmul.f32 %v2488_v30, %v3191_v6  ;;  %2491 = vtanh.f32 %v3240_v24 }
 0x26a   :  { %2493 = vrcp.f32 %v1125_v17 }
 0x26b   :  { %v3243_v16 = vadd.f32 %v1133_v61, %v1131_v18 }
 0x26d   :  { %2495 = vtanh.f32 %v3243_v16 }
 0x273   :  { %v2490_v9 = vpop.eup %2489 }
 0x276   :  { %v2492_v19 = vpop.eup %2491 }
 0x277   :  { %v2494_v10 = vpop.eup %2493  ;;  %v1138_v52 = vmul.f32 %v2492_v19, %v2490_v9 }
 0x27a   :  { %v2496_v29 = vpop.eup %2495 }
 0x27b   :  { %v1139_v13 = vmul.f32 %v2496_v29, %v2494_v10 }
 0x27d   :  { %v1140_v31 = vpack.c.bf16 %v1139_v13, %v1138_v52 }
 0x27f   :  { %2316 = vst [vmem:[%s3594_s4 + $0x8] sm:$0xff] %v1140_v31   ;;  %1195 = vmatmul.mubr.bf16.vlgmr.msra.gmra.mxu0 %v1140_v31  ;;  %1238 = vmatmul.mubr.bf16.vlgmr.msra.gmra.mxu1 %v1140_v31 }
 0x280   :  { %1327 = vmatpush1.bf16.msra.mxu0 %v2812_v36  ;;  %1370 = vmatpush1.bf16.msra.mxu1 %v2818_v38  ;;  %v3282_v36 = vld [vmem:[#allocation7 + $0xe4] ss:$16 sps:$4 sm:$0xff]  }
 0x281   :  { %1328 = vmatprep.subr.bf16.mxu0 %v2815_v37  ;;  %1371 = vmatprep.subr.bf16.mxu1 %v2820_v39  ;;  %v3285_v37 = vld [vmem:[#allocation7 + $0xec] ss:$16 sps:$4 sm:$0xff]  }
 0x282   :  { %1358 = vmatprep.mubr.bf16.mxu0 %v3650_v25  ;;  %1401 = vmatprep.mubr.bf16.mxu1 %v3650_v25 }
 0x284   :  { %1329 = vmatpush1.bf16.msra.mxu0 %v2824_v40  ;;  %1372 = vmatpush1.bf16.msra.mxu1 %v2831_v42  ;;  %v3656_v40 = vld [vmem:[#allocation16_spill] sm:$0xff] }
 0x285   :  { %1330 = vmatprep.subr.bf16.mxu0 %v2828_v41  ;;  %1373 = vmatprep.subr.bf16.mxu1 %v2843_v46 }
 0x288   :  { %1331 = vmatpush1.bf16.msra.mxu0 %v2838_v44  ;;  %1374 = vmatpush1.bf16.msra.mxu1 %v2846_v47 }
 0x289   :  { %1332 = vmatprep.subr.bf16.mxu0 %v2840_v45  ;;  %1375 = vmatprep.subr.bf16.mxu1 %v2848_v48  ;;  %v3657_v45 = vld [vmem:[#allocation18_spill] sm:$0xff] }
 0x28c   :  { %1333 = vmatpush1.bf16.msra.mxu0 %v2853_v49  ;;  %1376 = vmatpush1.bf16.msra.mxu1 %v2860_v51  ;;  %v3658_v51 = vld [vmem:[#allocation20_spill] sm:$0xff] }
 0x28d   :  { %1334 = vmatprep.subr.bf16.mxu0 %v2855_v50  ;;  %1377 = vmatprep.subr.bf16.mxu1 %v2869_v54 }
 0x290   :  { %1335 = vmatpush1.bf16.msra.mxu0 %v2866_v53  ;;  %1378 = vmatpush1.bf16.msra.mxu1 %v2875_v56 }
 0x291   :  { %1336 = vmatprep.subr.bf16.mxu0 %v2872_v55  ;;  %1379 = vmatprep.subr.bf16.mxu1 %v2877_v57 }
 0x294   :  { %1337 = vmatpush1.bf16.msra.mxu0 %v2882_v58  ;;  %1380 = vmatpush1.bf16.msra.mxu1 %v2889_v60  ;;  %v3659_v58 = vld [vmem:[#allocation22_spill] sm:$0xff] }
 0x295   :  { %1338 = vmatprep.subr.bf16.mxu0 %v2886_v59  ;;  %1381 = vmatprep.subr.bf16.mxu1 %v2898_v63 }
 0x298   :  { %1339 = vmatpush1.bf16.msra.mxu0 %v2896_v62  ;;  %1382 = vmatpush1.bf16.msra.mxu1 %v2904_v2 }
 0x299   :  { %1340 = vmatprep.subr.bf16.mxu0 %v2902_v1  ;;  %1383 = vmatprep.subr.bf16.mxu1 %v2906_v3  ;;  %v3660_v1 = vld [vmem:[#allocation19_spill] sm:$0xff] }
 0x29c   :  { %1341 = vmatpush1.bf16.msra.mxu0 %v2912_v4  ;;  %1384 = vmatpush1.bf16.msra.mxu1 %v2916_v5  ;;  %v3661_v4 = vld [vmem:[#allocation23_spill] sm:$0xff] }
 0x29d   :  { %1490 = vmatprep.subr.bf16.mxu0 %v3282_v36  ;;  %1533 = vmatprep.subr.bf16.mxu1 %v3285_v37 }
 0x33f   :  { %v1196_v38 = vpop.f32.mrf.mxu0  ;;  %v1239_v39 = vpop.f32.mrf.mxu1 }
 0x340   :  { %v1248_v41 = vadd.f32 %v1196_v38, %v3656_v40  ;;  %v1250_v8 = vadd.f32 %v1239_v39, %v3662_v14  ;;  %v3378_v14 = vld [vmem:[#allocation7 + $0x2c] ss:$16 sps:$4 sm:$0xff]  }
 0x341   :  { %v1198_v42 = vpop.f32.mrf.mxu0  ;;  %v1241_v47 = vpop.f32.mrf.mxu1 }
 0x342   :  { %v1256_v44 = vsub.f32 0.0, %v1248_v41  ;;  %v1249_v46 = vadd.f32 %v1198_v42, %v3657_v45  ;;  %v1251_v2 = vadd.f32 %v1241_v47, %v3660_v1  ;;  %v3313_v47 = vld [vmem:[#allocation7 + $0xc4] ss:$16 sps:$4 sm:$0xff]   ;;  %v3360_v1 = vld [vmem:[#allocation7 + $0x68] ss:$16 sps:$4 sm:$0xff]  }
 0x343   :  { %v1200_v48 = vpop.f32.mrf.mxu0  ;;  %v1243_v57 = vpop.f32.mrf.mxu1 }
 0x344   :  { %v1258_v49 = vmul.f32 1.442695, %v1256_v44  ;;  %v1268_v50 = vsub.f32 0.0, %v1249_v46  ;;  %v1252_v53 = vadd.f32 %v1200_v48, %v3658_v51  ;;  %v1282_v6 = vsub.f32 0.0, %v1251_v2  ;;  %v3310_v46 = vld [vmem:[#allocation7 + $0xe8] ss:$16 sps:$4 sm:$0xff]  }
 0x345   :  { %v1202_v54 = vpop.f32.mrf.mxu0  ;;  %v1245_v63 = vpop.f32.mrf.mxu1  ;;  %v1254_v27 = vadd.f32 %v1243_v57, %v3663_v21  ;;  %v3316_v48 = vld [vmem:[#allocation7 + $0xcc] ss:$16 sps:$4 sm:$0xff]   ;;  %v3327_v51 = vld [vmem:[#allocation7 + $0xa4] ss:$16 sps:$4 sm:$0xff]   ;;  %v3384_v21 = vld [vmem:[#allocation7 + $0x28] ss:$16 sps:$4 sm:$0xff]  }
 0x346   :  { %2497 = vpow2.f32 %v1258_v49  ;;  %v1270_v55 = vmul.f32 1.442695, %v1268_v50  ;;  %v1257_v56 = vsub.f32 0.0, %v1252_v53  ;;  %v1253_v59 = vadd.f32 %v1202_v54, %v3659_v58  ;;  %v3321_v49 = vld [vmem:[#allocation7 + $0xc0] ss:$16 sps:$4 sm:$0xff]  }
 0x347   :  { %v1255_v5 = vadd.f32 %v1245_v63, %v3661_v4  ;;  %v1284_v15 = vmul.f32 1.442695, %v1282_v6  ;;  %v3324_v50 = vld [vmem:[#allocation7 + $0xc8] ss:$16 sps:$4 sm:$0xff]   ;;  %v3330_v53 = vld [vmem:[#allocation7 + $0xac] ss:$16 sps:$4 sm:$0xff]  }
 0x348   :  { %2499 = vpow2.f32 %v1270_v55  ;;  %v1260_v60 = vmul.f32 1.442695, %v1257_v56  ;;  %v1269_v62 = vsub.f32 0.0, %v1253_v59  ;;  %v3333_v54 = vld [vmem:[#allocation7 + $0xa0] ss:$16 sps:$4 sm:$0xff]  }
 0x349   :  { %v1283_v12 = vsub.f32 0.0, %v1255_v5  ;;  %v3336_v55 = vld [vmem:[#allocation7 + $0xa8] ss:$16 sps:$4 sm:$0xff]   ;;  %v3339_v56 = vld [vmem:[#allocation7 + $0x84] ss:$16 sps:$4 sm:$0xff]  }
 0x34a   :  { %2501 = vpow2.f32 %v1260_v60  ;;  %v1272_v3 = vmul.f32 1.442695, %v1269_v62  ;;  %v3342_v57 = vld [vmem:[#allocation7 + $0x8c] ss:$16 sps:$4 sm:$0xff]   ;;  %v3345_v58 = vld [vmem:[#allocation7 + $0x80] ss:$16 sps:$4 sm:$0xff]  }
 0x34b   :  { %v1286_v23 = vmul.f32 1.442695, %v1283_v12  ;;  %v3348_v59 = vld [vmem:[#allocation7 + $0x88] ss:$16 sps:$4 sm:$0xff]   ;;  %v3351_v60 = vld [vmem:[#allocation7 + $0x64] ss:$16 sps:$4 sm:$0xff]  }
 0x34c   :  { %2503 = vpow2.f32 %v1272_v3  ;;  %v3354_v62 = vld [vmem:[#allocation7 + $0x6c] ss:$16 sps:$4 sm:$0xff]   ;;  %v3357_v63 = vld [vmem:[#allocation7 + $0x60] ss:$16 sps:$4 sm:$0xff]   ;;  %v3363_v2 = vld [vmem:[#allocation7 + $0x44] ss:$16 sps:$4 sm:$0xff]  }
 0x34d   :  { %2505 = vtanh.f32 %v1250_v8  ;;  %v3366_v3 = vld [vmem:[#allocation7 + $0x4c] ss:$16 sps:$4 sm:$0xff]   ;;  %v3369_v4 = vld [vmem:[#allocation7 + $0x40] ss:$16 sps:$4 sm:$0xff]   ;;  %v3372_v5 = vld [vmem:[#allocation7 + $0x48] ss:$16 sps:$4 sm:$0xff]  }
 0x34e   :  { %2507 = vtanh.f32 %v1254_v27  ;;  %v3375_v6 = vld [vmem:[#allocation7 + $0x24] ss:$16 sps:$4 sm:$0xff]   ;;  %v3381_v8 = vld [vmem:[#allocation7 + $0x20] ss:$16 sps:$4 sm:$0xff]   ;;  %v3390_v12 = vld [vmem:[#allocation7 + $0xc] ss:$16 sps:$4 sm:$0xff]  }
 0x34f   :  { %v3387_v27 = vld [vmem:[#allocation7 + $0x4] ss:$16 sps:$4 sm:$0xff]  }
 0x353   :  { %v2498_v28 = vpop.eup %2497 }
 0x354   :  { %v1262_v11 = vadd.f32 1.0, %v2498_v28  ;;  %v3393_v28 = vld [vmem:[#allocation7] ss:$16 sps:$4 sm:$0xff]  }
 0x355   :  { %v2500_v35 = vpop.eup %2499 }
 0x356   :  { %2509 = vrcp.f32 %v1262_v11  ;;  %v1274_v20 = vadd.f32 1.0, %v2500_v35 }
 0x357   :  { %v2502_v26 = vpop.eup %2501  ;;  %2511 = vpow2.f32 %v1284_v15  ;;  %v3396_v15 = vld [vmem:[#allocation7 + $0x8] ss:$16 sps:$4 sm:$0xff]  }
 0x358   :  { %2513 = vrcp.f32 %v1274_v20  ;;  %v1263_v33 = vadd.f32 1.0, %v2502_v26 }
 0x359   :  { %2515 = vpow2.f32 %v1286_v23  ;;  %v2504_v22 = vpop.eup %2503  ;;  %v3664_v23 = vld [vmem:[#allocation24_spill] sm:$0xff] }
 0x35a   :  { %2517 = vrcp.f32 %v1263_v33  ;;  %v1275_v34 = vadd.f32 1.0, %v2504_v22  ;;  %v2506_v7 = vpop.eup %2505  ;;  %v3665_v22 = vld [vmem:[#allocation26_spill] sm:$0xff] }
 0x35b   :  { %v2508_v43 = vpop.eup %2507 }
 0x35c   :  { %2519 = vrcp.f32 %v1275_v34 }
 0x363   :  { %v2510_v32 = vpop.eup %2509 }
 0x364   :  { %v2512_v0 = vpop.eup %2511  ;;  %v1296_v61 = vmul.f32 %v2510_v32, %v2506_v7 }
 0x365   :  { %v2514_v30 = vpop.eup %2513  ;;  %v1288_v10 = vadd.f32 1.0, %v2512_v0 }
 0x366   :  { %v2516_v17 = vpop.eup %2515  ;;  %v1294_v18 = vmul.f32 %v2514_v30, %v3240_v24 }
 0x367   :  { %v2518_v9 = vpop.eup %2517  ;;  %v1289_v13 = vadd.f32 1.0, %v2516_v17  ;;  %2521 = vrcp.f32 %v1288_v10 }
 0x368   :  { %v3297_v19 = vadd.f32 %v1296_v61, %v1294_v18  ;;  %v1297_v29 = vmul.f32 %v2518_v9, %v2508_v43  ;;  %v3666_v61 = vld [vmem:[#allocation28_spill] sm:$0xff] }
 0x369   :  { %v2520_v52 = vpop.eup %2519 }
 0x36a   :  { %v1295_v31 = vmul.f32 %v2520_v52, %v3243_v16  ;;  %2523 = vtanh.f32 %v3297_v19  ;;  %v3307_v16 = vld [vmem:[#allocation7 + $0xe0] ss:$16 sps:$4 sm:$0xff]  }
 0x36b   :  { %2525 = vrcp.f32 %v1289_v13 }
 0x36c   :  { %v3300_v38 = vadd.f32 %v1297_v29, %v1295_v31  ;;  %v3667_v29 = vld [vmem:[#allocation30_spill] sm:$0xff] }
 0x36e   :  { %2527 = vtanh.f32 %v3300_v38 }
 0x374   :  { %v2522_v39 = vpop.eup %2521 }
 0x377   :  { %v2524_v40 = vpop.eup %2523 }
 0x378   :  { %v2526_v24 = vpop.eup %2525  ;;  %v1302_v42 = vmul.f32 %v2524_v40, %v2522_v39  ;;  %v3668_v40 = vld [vmem:[#allocation27_spill] sm:$0xff] }
 0x37b   :  { %v2528_v41 = vpop.eup %2527 }
 0x37c   :  { %v1303_v44 = vmul.f32 %v2528_v41, %v2526_v24 }
 0x37e   :  { %v1304_v45 = vpack.c.bf16 %v1303_v44, %v1302_v42  ;;  %v3669_v42 = vld [vmem:[#allocation31_spill] sm:$0xff] }
 0x380   :  { %2317 = vst [vmem:[%s3594_s4 + $0x10] sm:$0xff] %v1304_v45   ;;  %1359 = vmatmul.mubr.bf16.vlgmr.msra.gmra.mxu0 %v1304_v45  ;;  %1402 = vmatmul.mubr.bf16.vlgmr.msra.gmra.mxu1 %v1304_v45 }
 0x381   :  { %1491 = vmatpush1.bf16.msra.mxu0 %v3307_v16  ;;  %1534 = vmatpush1.bf16.msra.mxu1 %v3310_v46 }
 0x382   :  { %1492 = vmatprep.subr.bf16.mxu0 %v3313_v47  ;;  %1535 = vmatprep.subr.bf16.mxu1 %v3316_v48 }
 0x383   :  { %1522 = vmatprep.mubr.bf16.mxu0 %v3650_v25  ;;  %1565 = vmatprep.mubr.bf16.mxu1 %v3650_v25 }
 0x385   :  { %1493 = vmatpush1.bf16.msra.mxu0 %v3321_v49  ;;  %1536 = vmatpush1.bf16.msra.mxu1 %v3324_v50 }
 0x386   :  { %1494 = vmatprep.subr.bf16.mxu0 %v3327_v51  ;;  %1537 = vmatprep.subr.bf16.mxu1 %v3330_v53 }
 0x389   :  { %1495 = vmatpush1.bf16.msra.mxu0 %v3333_v54  ;;  %1538 = vmatpush1.bf16.msra.mxu1 %v3336_v55 }
 0x38a   :  { %1496 = vmatprep.subr.bf16.mxu0 %v3339_v56  ;;  %1539 = vmatprep.subr.bf16.mxu1 %v3342_v57 }
 0x38d   :  { %1497 = vmatpush1.bf16.msra.mxu0 %v3345_v58  ;;  %1540 = vmatpush1.bf16.msra.mxu1 %v3348_v59 }
 0x38e   :  { %1498 = vmatprep.subr.bf16.mxu0 %v3351_v60  ;;  %1541 = vmatprep.subr.bf16.mxu1 %v3354_v62 }
 0x391   :  { %1499 = vmatpush1.bf16.msra.mxu0 %v3357_v63  ;;  %1542 = vmatpush1.bf16.msra.mxu1 %v3360_v1 }
 0x392   :  { %1500 = vmatprep.subr.bf16.mxu0 %v3363_v2  ;;  %1543 = vmatprep.subr.bf16.mxu1 %v3366_v3 }
 0x395   :  { %1501 = vmatpush1.bf16.msra.mxu0 %v3369_v4  ;;  %1544 = vmatpush1.bf16.msra.mxu1 %v3372_v5 }
 0x396   :  { %1502 = vmatprep.subr.bf16.mxu0 %v3375_v6  ;;  %1545 = vmatprep.subr.bf16.mxu1 %v3378_v14 }
 0x399   :  { %1503 = vmatpush1.bf16.msra.mxu0 %v3381_v8  ;;  %1546 = vmatpush1.bf16.msra.mxu1 %v3384_v21 }
 0x39a   :  { %1504 = vmatprep.subr.bf16.mxu0 %v3387_v27  ;;  %1547 = vmatprep.subr.bf16.mxu1 %v3390_v12 }
 0x39d   :  { %1505 = vmatpush1.bf16.msra.mxu0 %v3393_v28  ;;  %1548 = vmatpush1.bf16.msra.mxu1 %v3396_v15 }
 0x39e   :  { %1654 = vmatprep.subr.bf16.mxu0 %v3282_v36  ;;  %1697 = vmatprep.subr.bf16.mxu1 %v3285_v37 }
 0x440   :  { %v1360_v11 = vpop.f32.mrf.mxu0  ;;  %v1403_v35 = vpop.f32.mrf.mxu1 }
 0x441   :  { %v1412_v20 = vadd.f32 %v1360_v11, %v3664_v23  ;;  %v3670_v11 = vld [vmem:[#allocation25_spill] sm:$0xff] }
 0x442   :  { %v1362_v26 = vpop.f32.mrf.mxu0  ;;  %v1405_v7 = vpop.f32.mrf.mxu1  ;;  %v1414_v23 = vadd.f32 %v1403_v35, %v3670_v11 }
 0x443   :  { %v1420_v33 = vsub.f32 0.0, %v1412_v20  ;;  %v1413_v34 = vadd.f32 %v1362_v26, %v3665_v22  ;;  %v1415_v24 = vadd.f32 %v1405_v7, %v3668_v40  ;;  %v3671_v20 = vld [vmem:[#allocation29_spill] sm:$0xff] }
 0x444   :  { %v1364_v43 = vpop.f32.mrf.mxu0  ;;  %v1407_v10 = vpop.f32.mrf.mxu1 }
 0x445   :  { %v1422_v32 = vmul.f32 1.442695, %v1420_v33  ;;  %v1432_v0 = vsub.f32 0.0, %v1413_v34  ;;  %v1416_v30 = vadd.f32 %v1364_v43, %v3666_v61  ;;  %v1446_v45 = vsub.f32 0.0, %v1415_v24 }
 0x446   :  { %v1366_v17 = vpop.f32.mrf.mxu0  ;;  %v1409_v39 = vpop.f32.mrf.mxu1  ;;  %v1418_v26 = vadd.f32 %v1407_v10, %v3671_v20 }
 0x447   :  { %2529 = vpow2.f32 %v1422_v32  ;;  %v1434_v18 = vmul.f32 1.442695, %v1432_v0  ;;  %v1421_v9 = vsub.f32 0.0, %v1416_v30  ;;  %v1417_v52 = vadd.f32 %v1366_v17, %v3667_v29 }
 0x448   :  { %v1419_v44 = vadd.f32 %v1409_v39, %v3669_v42  ;;  %v1448_v34 = vmul.f32 1.442695, %v1446_v45 }
 0x449   :  { %2531 = vpow2.f32 %v1434_v18  ;;  %v1424_v13 = vmul.f32 1.442695, %v1421_v9  ;;  %v1433_v31 = vsub.f32 0.0, %v1417_v52 }
 0x44a   :  { %v1447_v33 = vsub.f32 0.0, %v1419_v44 }
 0x44b   :  { %2533 = vpow2.f32 %v1424_v13  ;;  %v1436_v41 = vmul.f32 1.442695, %v1433_v31 }
 0x44c   :  { %v1450_v0 = vmul.f32 1.442695, %v1447_v33 }
 0x44d   :  { %2535 = vpow2.f32 %v1436_v41 }
 0x44e   :  { %2537 = vtanh.f32 %v1414_v23 }
 0x44f   :  { %2539 = vtanh.f32 %v1418_v26 }
 0x454   :  { %v2530_v22 = vpop.eup %2529 }
 0x455   :  { %v1426_v43 = vadd.f32 1.0, %v2530_v22 }
 0x456   :  { %v2532_v32 = vpop.eup %2531 }
 0x457   :  { %2541 = vrcp.f32 %v1426_v43  ;;  %v1438_v61 = vadd.f32 1.0, %v2532_v32 }
 0x458   :  { %v2534_v7 = vpop.eup %2533  ;;  %2543 = vpow2.f32 %v1448_v34 }
 0x459   :  { %2545 = vrcp.f32 %v1438_v61  ;;  %v1427_v30 = vadd.f32 1.0, %v2534_v7 }
 0x45a   :  { %2547 = vpow2.f32 %v1450_v0  ;;  %v2536_v17 = vpop.eup %2535  ;;  %v3672_v0 = vld [vmem:[#allocation32_spill] sm:$0xff] }
 0x45b   :  { %2549 = vrcp.f32 %v1427_v30  ;;  %v1439_v35 = vadd.f32 1.0, %v2536_v17  ;;  %v2538_v18 = vpop.eup %2537  ;;  %v3673_v17 = vld [vmem:[#allocation34_spill] sm:$0xff] }
 0x45c   :  { %v2540_v9 = vpop.eup %2539 }
 0x45d   :  { %2551 = vrcp.f32 %v1439_v35 }
 0x464   :  { %v2542_v10 = vpop.eup %2541 }
 0x465   :  { %v2544_v29 = vpop.eup %2543  ;;  %v1460_v52 = vmul.f32 %v2542_v10, %v2538_v18 }
 0x466   :  { %v2546_v13 = vpop.eup %2545  ;;  %v1452_v41 = vadd.f32 1.0, %v2544_v29 }
 0x467   :  { %v2548_v31 = vpop.eup %2547  ;;  %v1458_v39 = vmul.f32 %v2546_v13, %v3297_v19 }
 0x468   :  { %v2550_v40 = vpop.eup %2549  ;;  %v1453_v45 = vadd.f32 1.0, %v2548_v31  ;;  %2553 = vrcp.f32 %v1452_v41 }
 0x469   :  { %v3410_v24 = vadd.f32 %v1460_v52, %v1458_v39  ;;  %v1461_v42 = vmul.f32 %v2550_v40, %v2540_v9  ;;  %v3674_v52 = vld [vmem:[#allocation36_spill] sm:$0xff] }
 0x46a   :  { %v2552_v44 = vpop.eup %2551 }
 0x46b   :  { %v1459_v11 = vmul.f32 %v2552_v44, %v3300_v38  ;;  %2555 = vtanh.f32 %v3410_v24 }
 0x46c   :  { %2557 = vrcp.f32 %v1453_v45 }
 0x46d   :  { %v3413_v23 = vadd.f32 %v1461_v42, %v1459_v11  ;;  %v3675_v42 = vld [vmem:[#allocation38_spill] sm:$0xff] }
 0x46f   :  { %2559 = vtanh.f32 %v3413_v23 }
 0x475   :  { %v2554_v20 = vpop.eup %2553 }
 0x478   :  { %v2556_v26 = vpop.eup %2555 }
 0x479   :  { %v2558_v19 = vpop.eup %2557  ;;  %v1466_v22 = vmul.f32 %v2556_v26, %v2554_v20  ;;  %v3676_v26 = vld [vmem:[#allocation35_spill] sm:$0xff] }
 0x47c   :  { %v2560_v33 = vpop.eup %2559 }
 0x47d   :  { %v1467_v34 = vmul.f32 %v2560_v33, %v2558_v19 }
 0x47f   :  { %v1468_v43 = vpack.c.bf16 %v1467_v34, %v1466_v22  ;;  %v3677_v22 = vld [vmem:[#allocation39_spill] sm:$0xff] }
 0x481   :  { %2318 = vst [vmem:[%s3594_s4 + $0x18] sm:$0xff] %v1468_v43   ;;  %1523 = vmatmul.mubr.bf16.vlgmr.msra.gmra.mxu0 %v1468_v43  ;;  %1566 = vmatmul.mubr.bf16.vlgmr.msra.gmra.mxu1 %v1468_v43 }
 0x482   :  { %1655 = vmatpush1.bf16.msra.mxu0 %v3307_v16  ;;  %1698 = vmatpush1.bf16.msra.mxu1 %v3310_v46 }
 0x483   :  { %1656 = vmatprep.subr.bf16.mxu0 %v3313_v47  ;;  %1699 = vmatprep.subr.bf16.mxu1 %v3316_v48 }
 0x484   :  { %1686 = vmatprep.mubr.bf16.mxu0 %v3650_v25  ;;  %1729 = vmatprep.mubr.bf16.mxu1 %v3650_v25 }
 0x486   :  { %1657 = vmatpush1.bf16.msra.mxu0 %v3321_v49  ;;  %1700 = vmatpush1.bf16.msra.mxu1 %v3324_v50 }
 0x487   :  { %1658 = vmatprep.subr.bf16.mxu0 %v3327_v51  ;;  %1701 = vmatprep.subr.bf16.mxu1 %v3330_v53 }
 0x48a   :  { %1659 = vmatpush1.bf16.msra.mxu0 %v3333_v54  ;;  %1702 = vmatpush1.bf16.msra.mxu1 %v3336_v55 }
 0x48b   :  { %1660 = vmatprep.subr.bf16.mxu0 %v3339_v56  ;;  %1703 = vmatprep.subr.bf16.mxu1 %v3342_v57 }
 0x48e   :  { %1661 = vmatpush1.bf16.msra.mxu0 %v3345_v58  ;;  %1704 = vmatpush1.bf16.msra.mxu1 %v3348_v59 }
 0x48f   :  { %1662 = vmatprep.subr.bf16.mxu0 %v3351_v60  ;;  %1705 = vmatprep.subr.bf16.mxu1 %v3354_v62 }
 0x492   :  { %1663 = vmatpush1.bf16.msra.mxu0 %v3357_v63  ;;  %1706 = vmatpush1.bf16.msra.mxu1 %v3360_v1 }
 0x493   :  { %1664 = vmatprep.subr.bf16.mxu0 %v3363_v2  ;;  %1707 = vmatprep.subr.bf16.mxu1 %v3366_v3 }
 0x496   :  { %1665 = vmatpush1.bf16.msra.mxu0 %v3369_v4  ;;  %1708 = vmatpush1.bf16.msra.mxu1 %v3372_v5 }
 0x497   :  { %1666 = vmatprep.subr.bf16.mxu0 %v3375_v6  ;;  %1709 = vmatprep.subr.bf16.mxu1 %v3378_v14 }
 0x49a   :  { %1667 = vmatpush1.bf16.msra.mxu0 %v3381_v8  ;;  %1710 = vmatpush1.bf16.msra.mxu1 %v3384_v21 }
 0x49b   :  { %1668 = vmatprep.subr.bf16.mxu0 %v3387_v27  ;;  %1711 = vmatprep.subr.bf16.mxu1 %v3390_v12 }
 0x49e   :  { %1669 = vmatpush1.bf16.msra.mxu0 %v3393_v28  ;;  %1712 = vmatpush1.bf16.msra.mxu1 %v3396_v15 }
 0x49f   :  { %1818 = vmatprep.subr.bf16.mxu0 %v3282_v36  ;;  %1861 = vmatprep.subr.bf16.mxu1 %v3285_v37 }
 0x541   :  { %v1524_v38 = vpop.f32.mrf.mxu0  ;;  %v1567_v32 = vpop.f32.mrf.mxu1 }
 0x542   :  { %v1576_v61 = vadd.f32 %v1524_v38, %v3672_v0  ;;  %v3678_v38 = vld [vmem:[#allocation33_spill] sm:$0xff] }
 0x543   :  { %v1526_v7 = vpop.f32.mrf.mxu0  ;;  %v1569_v18 = vpop.f32.mrf.mxu1  ;;  %v1578_v0 = vadd.f32 %v1567_v32, %v3678_v38 }
 0x544   :  { %v1584_v30 = vsub.f32 0.0, %v1576_v61  ;;  %v1577_v35 = vadd.f32 %v1526_v7, %v3673_v17  ;;  %v1579_v19 = vadd.f32 %v1569_v18, %v3676_v26  ;;  %v3679_v61 = vld [vmem:[#allocation37_spill] sm:$0xff] }
 0x545   :  { %v1528_v9 = vpop.f32.mrf.mxu0  ;;  %v1571_v41 = vpop.f32.mrf.mxu1 }
 0x546   :  { %v1586_v10 = vmul.f32 1.442695, %v1584_v30  ;;  %v1596_v29 = vsub.f32 0.0, %v1577_v35  ;;  %v1580_v13 = vadd.f32 %v1528_v9, %v3674_v52  ;;  %v1610_v43 = vsub.f32 0.0, %v1579_v19 }
 0x547   :  { %v1530_v31 = vpop.f32.mrf.mxu0  ;;  %v1573_v20 = vpop.f32.mrf.mxu1  ;;  %v1582_v7 = vadd.f32 %v1571_v41, %v3679_v61 }
 0x548   :  { %2561 = vpow2.f32 %v1586_v10  ;;  %v1598_v39 = vmul.f32 1.442695, %v1596_v29  ;;  %v1585_v40 = vsub.f32 0.0, %v1580_v13  ;;  %v1581_v44 = vadd.f32 %v1530_v31, %v3675_v42 }
 0x549   :  { %v1583_v34 = vadd.f32 %v1573_v20, %v3677_v22  ;;  %v1612_v35 = vmul.f32 1.442695, %v1610_v43 }
 0x54a   :  { %2563 = vpow2.f32 %v1598_v39  ;;  %v1588_v45 = vmul.f32 1.442695, %v1585_v40  ;;  %v1597_v11 = vsub.f32 0.0, %v1581_v44 }
 0x54b   :  { %v1611_v30 = vsub.f32 0.0, %v1583_v34 }
 0x54c   :  { %2565 = vpow2.f32 %v1588_v45  ;;  %v1600_v33 = vmul.f32 1.442695, %v1597_v11 }
 0x54d   :  { %v1614_v29 = vmul.f32 1.442695, %v1611_v30 }
 0x54e   :  { %2567 = vpow2.f32 %v1600_v33 }
 0x54f   :  { %2569 = vtanh.f32 %v1578_v0 }
 0x550   :  { %2571 = vtanh.f32 %v1582_v7 }
 0x555   :  { %v2562_v17 = vpop.eup %2561 }
 0x556   :  { %v1590_v9 = vadd.f32 1.0, %v2562_v17 }
 0x557   :  { %v2564_v10 = vpop.eup %2563 }
 0x558   :  { %2573 = vrcp.f32 %v1590_v9  ;;  %v1602_v52 = vadd.f32 1.0, %v2564_v10 }
 0x559   :  { %v2566_v18 = vpop.eup %2565  ;;  %2575 = vpow2.f32 %v1612_v35 }
 0x55a   :  { %2577 = vrcp.f32 %v1602_v52  ;;  %v1591_v13 = vadd.f32 1.0, %v2566_v18 }
 0x55b   :  { %2579 = vpow2.f32 %v1614_v29  ;;  %v2568_v31 = vpop.eup %2567  ;;  %v3680_v29 = vld [vmem:[#allocation40_spill] sm:$0xff] }
 0x55c   :  { %2581 = vrcp.f32 %v1591_v13  ;;  %v1603_v32 = vadd.f32 1.0, %v2568_v31  ;;  %v2570_v39 = vpop.eup %2569  ;;  %v3681_v31 = vld [vmem:[#allocation42_spill] sm:$0xff] }
 0x55d   :  { %v2572_v40 = vpop.eup %2571 }
 0x55e   :  { %2583 = vrcp.f32 %v1603_v32 }
 0x565   :  { %v2574_v41 = vpop.eup %2573 }
 0x566   :  { %v2576_v42 = vpop.eup %2575  ;;  %v1624_v44 = vmul.f32 %v2574_v41, %v2570_v39 }
 0x567   :  { %v2578_v45 = vpop.eup %2577  ;;  %v1616_v33 = vadd.f32 1.0, %v2576_v42 }
 0x568   :  { %v2580_v11 = vpop.eup %2579  ;;  %v1622_v20 = vmul.f32 %v2578_v45, %v3410_v24 }
 0x569   :  { %v2582_v26 = vpop.eup %2581  ;;  %v1617_v43 = vadd.f32 1.0, %v2580_v11  ;;  %2585 = vrcp.f32 %v1616_v33 }
 0x56a   :  { %v3463_v19 = vadd.f32 %v1624_v44, %v1622_v20  ;;  %v1625_v22 = vmul.f32 %v2582_v26, %v2572_v40  ;;  %v3682_v44 = vld [vmem:[#allocation44_spill] sm:$0xff] }
 0x56b   :  { %v2584_v34 = vpop.eup %2583 }
 0x56c   :  { %v1623_v38 = vmul.f32 %v2584_v34, %v3413_v23  ;;  %2587 = vtanh.f32 %v3463_v19 }
 0x56d   :  { %2589 = vrcp.f32 %v1617_v43 }
 0x56e   :  { %v3466_v0 = vadd.f32 %v1625_v22, %v1623_v38  ;;  %v3684_v38 = vld [vmem:[#allocation43_spill] sm:$0xff] }
 0x570   :  { %2591 = vtanh.f32 %v3466_v0 }
 0x576   :  { %v2586_v61 = vpop.eup %2585 }
 0x579   :  { %v2588_v7 = vpop.eup %2587 }
 0x57a   :  { %v2590_v24 = vpop.eup %2589  ;;  %v1630_v17 = vmul.f32 %v2588_v7, %v2586_v61 }
 0x57d   :  { %v2592_v30 = vpop.eup %2591 }
 0x57e   :  { %v1631_v35 = vmul.f32 %v2592_v30, %v2590_v24  ;;  %v3685_v24 = vld [vmem:[#allocation47_spill] sm:$0xff] }
 0x580   :  { %v1632_v9 = vpack.c.bf16 %v1631_v35, %v1630_v17  ;;  %v3686_v35 = vld [vmem:[#allocation41_spill] sm:$0xff] }
 0x582   :  { %2319 = vst [vmem:[%s3594_s4 + $0x20] sm:$0xff] %v1632_v9   ;;  %1687 = vmatmul.mubr.bf16.vlgmr.msra.gmra.mxu0 %v1632_v9  ;;  %1730 = vmatmul.mubr.bf16.vlgmr.msra.gmra.mxu1 %v1632_v9 }
 0x583   :  { %1819 = vmatpush1.bf16.msra.mxu0 %v3307_v16  ;;  %1862 = vmatpush1.bf16.msra.mxu1 %v3310_v46 }
 0x584   :  { %1820 = vmatprep.subr.bf16.mxu0 %v3313_v47  ;;  %1863 = vmatprep.subr.bf16.mxu1 %v3316_v48 }
 0x585   :  { %1850 = vmatprep.mubr.bf16.mxu0 %v3650_v25  ;;  %1893 = vmatprep.mubr.bf16.mxu1 %v3650_v25 }
 0x587   :  { %1821 = vmatpush1.bf16.msra.mxu0 %v3321_v49  ;;  %1864 = vmatpush1.bf16.msra.mxu1 %v3324_v50 }
 0x588   :  { %1822 = vmatprep.subr.bf16.mxu0 %v3327_v51  ;;  %1865 = vmatprep.subr.bf16.mxu1 %v3330_v53 }
 0x58b   :  { %1823 = vmatpush1.bf16.msra.mxu0 %v3333_v54  ;;  %1866 = vmatpush1.bf16.msra.mxu1 %v3336_v55 }
 0x58c   :  { %1824 = vmatprep.subr.bf16.mxu0 %v3339_v56  ;;  %1867 = vmatprep.subr.bf16.mxu1 %v3342_v57 }
 0x58f   :  { %1825 = vmatpush1.bf16.msra.mxu0 %v3345_v58  ;;  %1868 = vmatpush1.bf16.msra.mxu1 %v3348_v59 }
 0x590   :  { %1826 = vmatprep.subr.bf16.mxu0 %v3351_v60  ;;  %1869 = vmatprep.subr.bf16.mxu1 %v3354_v62 }
 0x593   :  { %1827 = vmatpush1.bf16.msra.mxu0 %v3357_v63  ;;  %1870 = vmatpush1.bf16.msra.mxu1 %v3360_v1 }
 0x594   :  { %1828 = vmatprep.subr.bf16.mxu0 %v3363_v2  ;;  %1871 = vmatprep.subr.bf16.mxu1 %v3366_v3 }
 0x597   :  { %1829 = vmatpush1.bf16.msra.mxu0 %v3369_v4  ;;  %1872 = vmatpush1.bf16.msra.mxu1 %v3372_v5 }
 0x598   :  { %1830 = vmatprep.subr.bf16.mxu0 %v3375_v6  ;;  %1873 = vmatprep.subr.bf16.mxu1 %v3378_v14 }
 0x59b   :  { %1831 = vmatpush1.bf16.msra.mxu0 %v3381_v8  ;;  %1874 = vmatpush1.bf16.msra.mxu1 %v3384_v21 }
 0x59c   :  { %1832 = vmatprep.subr.bf16.mxu0 %v3387_v27  ;;  %1875 = vmatprep.subr.bf16.mxu1 %v3390_v12 }
 0x59f   :  { %1833 = vmatpush1.bf16.msra.mxu0 %v3393_v28  ;;  %1876 = vmatpush1.bf16.msra.mxu1 %v3396_v15 }
 0x5a0   :  { %1982 = vmatprep.subr.bf16.mxu0 %v3282_v36  ;;  %2025 = vmatprep.subr.bf16.mxu1 %v3285_v37  ;;  %v3683_v37 = vld [vmem:[#allocation46_spill] sm:$0xff] }
 0x642   :  { %v1688_v23 = vpop.f32.mrf.mxu0  ;;  %v1731_v10 = vpop.f32.mrf.mxu1 }
 0x643   :  { %v1740_v52 = vadd.f32 %v1688_v23, %v3680_v29  ;;  %v1742_v9 = vadd.f32 %v1731_v10, %v3686_v35  ;;  %v3687_v23 = vld [vmem:[#allocation45_spill] sm:$0xff] }
 0x644   :  { %v1690_v18 = vpop.f32.mrf.mxu0  ;;  %v1733_v39 = vpop.f32.mrf.mxu1 }
 0x645   :  { %v1748_v13 = vsub.f32 0.0, %v1740_v52  ;;  %v1741_v32 = vadd.f32 %v1690_v18, %v3681_v31  ;;  %v1743_v61 = vadd.f32 %v1733_v39, %v3684_v38 }
 0x646   :  { %v1692_v40 = vpop.f32.mrf.mxu0  ;;  %v1735_v26 = vpop.f32.mrf.mxu1 }
 0x647   :  { %v1750_v41 = vmul.f32 1.442695, %v1748_v13  ;;  %v1760_v42 = vsub.f32 0.0, %v1741_v32  ;;  %v1744_v45 = vadd.f32 %v1692_v40, %v3682_v44  ;;  %v1774_v17 = vsub.f32 0.0, %v1743_v61 }
 0x648   :  { %v1694_v11 = vpop.f32.mrf.mxu0  ;;  %v1737_v43 = vpop.f32.mrf.mxu1  ;;  %v1746_v29 = vadd.f32 %v1735_v26, %v3687_v23 }
 0x649   :  { %2593 = vpow2.f32 %v1750_v41  ;;  %v1762_v20 = vmul.f32 1.442695, %v1760_v42  ;;  %v1749_v36 = vsub.f32 0.0, %v1744_v45  ;;  %v1745_v33 = vadd.f32 %v1694_v11, %v3683_v37 }
 0x64a   :  { %v1747_v30 = vadd.f32 %v1737_v43, %v3685_v24  ;;  %v1776_v13 = vmul.f32 1.442695, %v1774_v17 }
 0x64b   :  { %2595 = vpow2.f32 %v1762_v20  ;;  %v1752_v22 = vmul.f32 1.442695, %v1749_v36  ;;  %v1761_v34 = vsub.f32 0.0, %v1745_v33 }
 0x64c   :  { %v1775_v52 = vsub.f32 0.0, %v1747_v30 }
 0x64d   :  { %2597 = vpow2.f32 %v1752_v22  ;;  %v1764_v7 = vmul.f32 1.442695, %v1761_v34 }
 0x64e   :  { %v1778_v40 = vmul.f32 1.442695, %v1775_v52 }
 0x64f   :  { %2599 = vpow2.f32 %v1764_v7 }
 0x650   :  { %2601 = vtanh.f32 %v1742_v9 }
 0x651   :  { %2603 = vtanh.f32 %v1746_v29 }
 0x656   :  { %v2594_v18 = vpop.eup %2593 }
 0x657   :  { %v1754_v31 = vadd.f32 1.0, %v2594_v18 }
 0x658   :  { %v2596_v32 = vpop.eup %2595 }
 0x659   :  { %2605 = vrcp.f32 %v1754_v31  ;;  %v1766_v41 = vadd.f32 1.0, %v2596_v32 }
 0x65a   :  { %v2598_v39 = vpop.eup %2597  ;;  %2607 = vpow2.f32 %v1776_v13 }
 0x65b   :  { %2609 = vrcp.f32 %v1766_v41  ;;  %v1755_v42 = vadd.f32 1.0, %v2598_v39 }
 0x65c   :  { %2611 = vpow2.f32 %v1778_v40  ;;  %v2600_v44 = vpop.eup %2599 }
 0x65d   :  { %2613 = vrcp.f32 %v1755_v42  ;;  %v1767_v10 = vadd.f32 1.0, %v2600_v44  ;;  %v2602_v45 = vpop.eup %2601 }
 0x65e   :  { %v2604_v11 = vpop.eup %2603 }
 0x65f   :  { %2615 = vrcp.f32 %v1767_v10 }
 0x666   :  { %v2606_v20 = vpop.eup %2605 }
 0x667   :  { %v2608_v36 = vpop.eup %2607  ;;  %v1788_v26 = vmul.f32 %v2606_v20, %v2602_v45 }
 0x668   :  { %v2610_v37 = vpop.eup %2609  ;;  %v1780_v38 = vadd.f32 1.0, %v2608_v36 }
 0x669   :  { %v2612_v33 = vpop.eup %2611  ;;  %v1786_v22 = vmul.f32 %v2610_v37, %v3463_v19 }
 0x66a   :  { %v2614_v34 = vpop.eup %2613  ;;  %v1781_v24 = vadd.f32 1.0, %v2612_v33  ;;  %2617 = vrcp.f32 %v1780_v38 }
 0x66b   :  { %v3516_v43 = vadd.f32 %v1788_v26, %v1786_v22  ;;  %v1789_v61 = vmul.f32 %v2614_v34, %v2604_v11 }
 0x66c   :  { %v2616_v7 = vpop.eup %2615 }
 0x66d   :  { %v1787_v30 = vmul.f32 %v2616_v7, %v3466_v0  ;;  %2619 = vtanh.f32 %v3516_v43  ;;  %v3695_v0 = vld [vmem:[#allocation53_spill] sm:$0xff] }
 0x66e   :  { %2621 = vrcp.f32 %v1781_v24 }
 0x66f   :  { %v3519_v17 = vadd.f32 %v1789_v61, %v1787_v30 }
 0x671   :  { %2623 = vtanh.f32 %v3519_v17 }
 0x677   :  { %v2618_v35 = vpop.eup %2617 }
 0x67a   :  { %v2620_v9 = vpop.eup %2619 }
 0x67b   :  { %v2622_v19 = vpop.eup %2621  ;;  %v1794_v29 = vmul.f32 %v2620_v9, %v2618_v35 }
 0x67e   :  { %v2624_v23 = vpop.eup %2623 }
 0x67f   :  { %v1795_v52 = vmul.f32 %v2624_v23, %v2622_v19 }
 0x681   :  { %v1796_v18 = vpack.c.bf16 %v1795_v52, %v1794_v29 }
 0x683   :  { %2320 = vst [vmem:[%s3594_s4 + $0x28] sm:$0xff] %v1796_v18   ;;  %1851 = vmatmul.mubr.bf16.vlgmr.msra.gmra.mxu0 %v1796_v18  ;;  %1894 = vmatmul.mubr.bf16.vlgmr.msra.gmra.mxu1 %v1796_v18 }
 0x684   :  { %1983 = vmatpush1.bf16.msra.mxu0 %v3307_v16  ;;  %2026 = vmatpush1.bf16.msra.mxu1 %v3310_v46  ;;  %v3688_v46 = vld [vmem:[#allocation48_spill] sm:$0xff] }
 0x685   :  { %1984 = vmatprep.subr.bf16.mxu0 %v3313_v47  ;;  %2027 = vmatprep.subr.bf16.mxu1 %v3316_v48 }
 0x686   :  { %2014 = vmatprep.mubr.bf16.mxu0 %v3650_v25  ;;  %2057 = vmatprep.mubr.bf16.mxu1 %v3650_v25 }
 0x688   :  { %1985 = vmatpush1.bf16.msra.mxu0 %v3321_v49  ;;  %2028 = vmatpush1.bf16.msra.mxu1 %v3324_v50  ;;  %v3689_v50 = vld [vmem:[#allocation50_spill] sm:$0xff] }
 0x689   :  { %1986 = vmatprep.subr.bf16.mxu0 %v3327_v51  ;;  %2029 = vmatprep.subr.bf16.mxu1 %v3330_v53 }
 0x68c   :  { %1987 = vmatpush1.bf16.msra.mxu0 %v3333_v54  ;;  %2030 = vmatpush1.bf16.msra.mxu1 %v3336_v55 }
 0x68d   :  { %1988 = vmatprep.subr.bf16.mxu0 %v3339_v56  ;;  %2031 = vmatprep.subr.bf16.mxu1 %v3342_v57  ;;  %v3690_v57 = vld [vmem:[#allocation52_spill] sm:$0xff] }
 0x690   :  { %1989 = vmatpush1.bf16.msra.mxu0 %v3345_v58  ;;  %2032 = vmatpush1.bf16.msra.mxu1 %v3348_v59 }
 0x691   :  { %1990 = vmatprep.subr.bf16.mxu0 %v3351_v60  ;;  %2033 = vmatprep.subr.bf16.mxu1 %v3354_v62 }
 0x694   :  { %1991 = vmatpush1.bf16.msra.mxu0 %v3357_v63  ;;  %2034 = vmatpush1.bf16.msra.mxu1 %v3360_v1  ;;  %v3691_v1 = vld [vmem:[#allocation54_spill] sm:$0xff] }
 0x695   :  { %1992 = vmatprep.subr.bf16.mxu0 %v3363_v2  ;;  %2035 = vmatprep.subr.bf16.mxu1 %v3366_v3 }
 0x698   :  { %1993 = vmatpush1.bf16.msra.mxu0 %v3369_v4  ;;  %2036 = vmatpush1.bf16.msra.mxu1 %v3372_v5 }
 0x699   :  { %1994 = vmatprep.subr.bf16.mxu0 %v3375_v6  ;;  %2037 = vmatprep.subr.bf16.mxu1 %v3378_v14  ;;  %v3692_v6 = vld [vmem:[#allocation51_spill] sm:$0xff] }
 0x69c   :  { %1995 = vmatpush1.bf16.msra.mxu0 %v3381_v8  ;;  %2038 = vmatpush1.bf16.msra.mxu1 %v3384_v21  ;;  %v3693_v21 = vld [vmem:[#allocation55_spill] sm:$0xff] }
 0x69d   :  { %1996 = vmatprep.subr.bf16.mxu0 %v3387_v27  ;;  %2039 = vmatprep.subr.bf16.mxu1 %v3390_v12 }
 0x6a0   :  { %1997 = vmatpush1.bf16.msra.mxu0 %v3393_v28  ;;  %2040 = vmatpush1.bf16.msra.mxu1 %v3396_v15  ;;  %v3694_v28 = vld [vmem:[#allocation49_spill] sm:$0xff] }
 0x743   :  { %v1852_v25 = vpop.f32.mrf.mxu0  ;;  %v1895_v16 = vpop.f32.mrf.mxu1 }
 0x744   :  { %v1904_v47 = vadd.f32 %v1852_v25, %v3688_v46  ;;  %v1906_v15 = vadd.f32 %v1895_v16, %v3694_v28 }
 0x745   :  { %v1854_v48 = vpop.f32.mrf.mxu0  ;;  %v1897_v53 = vpop.f32.mrf.mxu1 }
 0x746   :  { %v1912_v49 = vsub.f32 0.0, %v1904_v47  ;;  %v1905_v51 = vadd.f32 %v1854_v48, %v3689_v50  ;;  %v1907_v14 = vadd.f32 %v1897_v53, %v3692_v6 }
 0x747   :  { %v1856_v54 = vpop.f32.mrf.mxu0  ;;  %v1899_v63 = vpop.f32.mrf.mxu1 }
 0x748   :  { %v1914_v55 = vmul.f32 1.442695, %v1912_v49  ;;  %v1924_v56 = vsub.f32 0.0, %v1905_v51  ;;  %v1908_v58 = vadd.f32 %v1856_v54, %v3690_v57  ;;  %v1938_v12 = vsub.f32 0.0, %v1907_v14  ;;  %v3696_v49 = vld [vmem:[#allocation56_spill] sm:$0xff]  ;;  %v3697_v54 = vld [vmem:[#allocation58_spill] sm:$0xff] }
 0x749   :  { %v1858_v59 = vpop.f32.mrf.mxu0  ;;  %v1901_v5 = vpop.f32.mrf.mxu1  ;;  %v1910_v13 = vadd.f32 %v1899_v63, %v3695_v0  ;;  %v3700_v14 = vld [vmem:[#allocation59_spill] sm:$0xff] }
 0x74a   :  { %2625 = vpow2.f32 %v1914_v55  ;;  %v1926_v60 = vmul.f32 1.442695, %v1924_v56  ;;  %v1913_v62 = vsub.f32 0.0, %v1908_v58  ;;  %v1909_v2 = vadd.f32 %v1858_v59, %v3691_v1 }
 0x74b   :  { %v1911_v27 = vadd.f32 %v1901_v5, %v3693_v21  ;;  %v1940_v40 = vmul.f32 1.442695, %v1938_v12 }
 0x74c   :  { %2627 = vpow2.f32 %v1926_v60  ;;  %v1916_v3 = vmul.f32 1.442695, %v1913_v62  ;;  %v1925_v4 = vsub.f32 0.0, %v1909_v2  ;;  %v3698_v60 = vld [vmem:[#allocation60_spill] sm:$0xff] }
 0x74d   :  { %v1939_v31 = vsub.f32 0.0, %v1911_v27 }
 0x74e   :  { %2629 = vpow2.f32 %v1916_v3  ;;  %v1928_v8 = vmul.f32 1.442695, %v1925_v4  ;;  %v3699_v4 = vld [vmem:[#allocation62_spill] sm:$0xff] }
 0x74f   :  { %v1942_v42 = vmul.f32 1.442695, %v1939_v31 }
 0x750   :  { %2631 = vpow2.f32 %v1928_v8 }
 0x751   :  { %2633 = vtanh.f32 %v1906_v15  ;;  %v3701_v15 = vld [vmem:[#allocation63_spill] sm:$0xff] }
 0x752   :  { %2635 = vtanh.f32 %v1910_v13  ;;  %v3702_v13 = vld [vmem:[#allocation57_spill] sm:$0xff] }
 0x757   :  { %v2626_v32 = vpop.eup %2625 }
 0x758   :  { %v1918_v41 = vadd.f32 1.0, %v2626_v32 }
 0x759   :  { %v2628_v39 = vpop.eup %2627 }
 0x75a   :  { %2637 = vrcp.f32 %v1918_v41  ;;  %v1930_v44 = vadd.f32 1.0, %v2628_v39  ;;  %v3703_v39 = vld [vmem:[#allocation61_spill] sm:$0xff] }
 0x75b   :  { %v2630_v10 = vpop.eup %2629  ;;  %2639 = vpow2.f32 %v1940_v40 }
 0x75c   :  { %2641 = vrcp.f32 %v1930_v44  ;;  %v1919_v45 = vadd.f32 1.0, %v2630_v10 }
 0x75d   :  { %2643 = vpow2.f32 %v1942_v42  ;;  %v2632_v11 = vpop.eup %2631 }
 0x75e   :  { %2645 = vrcp.f32 %v1919_v45  ;;  %v1931_v20 = vadd.f32 1.0, %v2632_v11  ;;  %v2634_v36 = vpop.eup %2633 }
 0x75f   :  { %v2636_v26 = vpop.eup %2635 }
 0x760   :  { %2647 = vrcp.f32 %v1931_v20 }
 0x767   :  { %v2638_v37 = vpop.eup %2637 }
 0x768   :  { %v2640_v33 = vpop.eup %2639  ;;  %v1952_v22 = vmul.f32 %v2638_v37, %v2634_v36 }
 0x769   :  { %v2642_v34 = vpop.eup %2641  ;;  %v1944_v30 = vadd.f32 1.0, %v2640_v33 }
 0x76a   :  { %v2644_v38 = vpop.eup %2643  ;;  %v1950_v61 = vmul.f32 %v2642_v34, %v3516_v43 }
 0x76b   :  { %v2646_v7 = vpop.eup %2645  ;;  %v1945_v19 = vadd.f32 1.0, %v2644_v38  ;;  %2649 = vrcp.f32 %v1944_v30 }
 0x76c   :  { %v3567_v24 = vadd.f32 %v1952_v22, %v1950_v61  ;;  %v1953_v35 = vmul.f32 %v2646_v7, %v2636_v26 }
 0x76d   :  { %v2648_v9 = vpop.eup %2647 }
 0x76e   :  { %v1951_v23 = vmul.f32 %v2648_v9, %v3519_v17  ;;  %2651 = vtanh.f32 %v3567_v24 }
 0x76f   :  { %2653 = vrcp.f32 %v1945_v19 }
 0x770   :  { %v3570_v29 = vadd.f32 %v1953_v35, %v1951_v23 }
 0x772   :  { %2655 = vtanh.f32 %v3570_v29 }
 0x778   :  { %v2650_v52 = vpop.eup %2649 }
 0x77b   :  { %v2652_v18 = vpop.eup %2651 }
 0x77c   :  { %v2654_v43 = vpop.eup %2653  ;;  %v1958_v16 = vmul.f32 %v2652_v18, %v2650_v52 }
 0x77f   :  { %v2656_v25 = vpop.eup %2655 }
 0x780   :  { %v1959_v46 = vmul.f32 %v2656_v25, %v2654_v43 }
 0x782   :  { %v1960_v47 = vpack.c.bf16 %v1959_v46, %v1958_v16 }
 0x784   :  { %2321 = vst [vmem:[%s3594_s4 + $0x30] sm:$0xff] %v1960_v47   ;;  %2015 = vmatmul.mubr.bf16.vlgmr.msra.gmra.mxu0 %v1960_v47  ;;  %2058 = vmatmul.mubr.bf16.vlgmr.msra.gmra.mxu1 %v1960_v47 }
 0x844   :  { %v2016_v17 = vpop.f32.mrf.mxu0  ;;  %v2059_v48 = vpop.f32.mrf.mxu1 }
 0x845   :  { %v2068_v50 = vadd.f32 %v2016_v17, %v3696_v49  ;;  %v2070_v31 = vadd.f32 %v2059_v48, %v3702_v13 }
 0x846   :  { %v2018_v51 = vpop.f32.mrf.mxu0  ;;  %v2061_v56 = vpop.f32.mrf.mxu1 }
 0x847   :  { %v2076_v53 = vsub.f32 0.0, %v2068_v50  ;;  %v2069_v55 = vadd.f32 %v2018_v51, %v3697_v54  ;;  %v2071_v8 = vadd.f32 %v2061_v56, %v3700_v14 }
 0x848   :  { %v2020_v57 = vpop.f32.mrf.mxu0  ;;  %v2063_v3 = vpop.f32.mrf.mxu1 }
 0x849   :  { %v2078_v58 = vmul.f32 1.442695, %v2076_v53  ;;  %v2088_v59 = vsub.f32 0.0, %v2069_v55  ;;  %v2072_v62 = vadd.f32 %v2020_v57, %v3698_v60  ;;  %v2102_v28 = vsub.f32 0.0, %v2071_v8 }
 0x84a   :  { %v2022_v63 = vpop.f32.mrf.mxu0  ;;  %v2065_v27 = vpop.f32.mrf.mxu1  ;;  %v2074_v42 = vadd.f32 %v2063_v3, %v3703_v39 }
 0x84b   :  { %2657 = vpow2.f32 %v2078_v58  ;;  %v2090_v1 = vmul.f32 1.442695, %v2088_v59  ;;  %v2077_v2 = vsub.f32 0.0, %v2072_v62  ;;  %v2073_v5 = vadd.f32 %v2022_v63, %v3699_v4 }
 0x84c   :  { %v2075_v0 = vadd.f32 %v2065_v27, %v3701_v15  ;;  %v2104_v32 = vmul.f32 1.442695, %v2102_v28 }
 0x84d   :  { %2659 = vpow2.f32 %v2090_v1  ;;  %v2080_v6 = vmul.f32 1.442695, %v2077_v2  ;;  %v2089_v21 = vsub.f32 0.0, %v2073_v5 }
 0x84e   :  { %v2103_v40 = vsub.f32 0.0, %v2075_v0 }
 0x84f   :  { %2661 = vpow2.f32 %v2080_v6  ;;  %v2092_v12 = vmul.f32 1.442695, %v2089_v21 }
 0x850   :  { %v2106_v45 = vmul.f32 1.442695, %v2103_v40 }
 0x851   :  { %2663 = vpow2.f32 %v2092_v12 }
 0x852   :  { %2665 = vtanh.f32 %v2070_v31 }
 0x853   :  { %2667 = vpow2.f32 %v2104_v32 }
 0x858   :  { %v2658_v41 = vpop.eup %2657 }
 0x859   :  { %v2082_v44 = vadd.f32 1.0, %v2658_v41 }
 0x85a   :  { %v2660_v10 = vpop.eup %2659 }
 0x85b   :  { %2669 = vrcp.f32 %v2082_v44  ;;  %v2094_v11 = vadd.f32 1.0, %v2660_v10 }
 0x85c   :  { %v2662_v20 = vpop.eup %2661  ;;  %2671 = vtanh.f32 %v2074_v42 }
 0x85d   :  { %2673 = vrcp.f32 %v2094_v11  ;;  %v2083_v36 = vadd.f32 1.0, %v2662_v20 }
 0x85e   :  { %2675 = vpow2.f32 %v2106_v45  ;;  %v2664_v26 = vpop.eup %2663 }
 0x85f   :  { %2677 = vrcp.f32 %v2083_v36  ;;  %v2095_v37 = vadd.f32 1.0, %v2664_v26  ;;  %v2666_v33 = vpop.eup %2665 }
 0x860   :  { %v2668_v22 = vpop.eup %2667 }
 0x861   :  { %2679 = vrcp.f32 %v2095_v37  ;;  %v2108_v30 = vadd.f32 1.0, %v2668_v22 }
 0x863   :  { %2681 = vrcp.f32 %v2108_v30 }
 0x868   :  { %v2670_v34 = vpop.eup %2669 }
 0x869   :  { %v2672_v38 = vpop.eup %2671  ;;  %v2116_v61 = vmul.f32 %v2670_v34, %v2666_v33 }
 0x86a   :  { %v2674_v7 = vpop.eup %2673 }
 0x86b   :  { %v2676_v35 = vpop.eup %2675  ;;  %v2114_v9 = vmul.f32 %v2674_v7, %v3567_v24 }
 0x86c   :  { %v2678_v19 = vpop.eup %2677  ;;  %v2109_v43 = vadd.f32 1.0, %v2676_v35 }
 0x86d   :  { %v2118_v23 = vadd.f32 %v2116_v61, %v2114_v9  ;;  %v2117_v52 = vmul.f32 %v2678_v19, %v2672_v38 }
 0x86e   :  { %v2680_v18 = vpop.eup %2679 }
 0x86f   :  { %2683 = vtanh.f32 %v2118_v23  ;;  %v2115_v25 = vmul.f32 %v2680_v18, %v3570_v29 }
 0x870   :  { %2685 = vrcp.f32 %v2109_v43  ;;  %v2682_v46 = vpop.eup %2681 }
 0x871   :  { %v2119_v16 = vadd.f32 %v2117_v52, %v2115_v25 }
 0x873   :  { %2687 = vtanh.f32 %v2119_v16 }
 0x87c   :  { %v2684_v47 = vpop.eup %2683 }
 0x87d   :  { %v2122_v17 = vmul.f32 %v2684_v47, %v2682_v46  ;;  %v2686_v48 = vpop.eup %2685 }
 0x880   :  { %v2688_v49 = vpop.eup %2687 }
 0x881   :  { %v2123_v50 = vmul.f32 %v2688_v49, %v2686_v48 }
 0x883   :  { %v2309_v51 = vpack.c.bf16 %v2123_v50, %v2122_v17 }
 0x885   :  { %2322 = vst [vmem:[%s3594_s4 + $0x38] sm:$0xff] %v2309_v51   ;;  %2315 = vst [vmem:[#allocation3] sm:$0xff] %v2309_v51  }
 0x886   :  { %2143 = vsyncpa [#allocation6], 1 }
 0x887   :  { %2144 = vsyncpa [#allocation8], 1 }

</bundles_post_ra>
